<compile_context>
chip_gen: v7x
topology: tpu7x:2x2x1
jax: 0.10.0
libtpu: 0.0.40
codegen_flags: <defaults>
</compile_context>

<pallas_src>
import jax
import jax.numpy as jnp
from jax.experimental import pallas as pl
from jax.experimental.pallas import tpu as pltpu

C, H, W = 3, 128, 128
N = C * H * W          # 49152 flattened elements
S = 10                 # memory slots
LANE = 128
ROWS = N // LANE       # 384 sublane-dense rows (384 % 8 == 0)
BLK = 5                # slots per grid step
STEPS = S // BLK       # grid = (2,)


def net_kernel(x_ref, k_ref, v_ref, out_ref, m_ref, l_ref, acc_ref):
    # x_ref:   (ROWS, LANE)      f32  resident flattened input image (lane-dense)
    # k_ref:   (BLK, ROWS, LANE) f32  keys block for this grid step
    # v_ref:   (BLK, ROWS, LANE) f32  values block for this grid step
    # out_ref: (ROWS, LANE)      f32  resident output, written on the last step only
    # m_ref / l_ref: (1, 1) f32  online-softmax running max / denominator
    # acc_ref: (ROWS, LANE) f32  running attention-weighted value accumulator
    i = pl.program_id(0)

    @pl.when(i == 0)
    def _init():
        m_ref[...] = jnp.full_like(m_ref, -jnp.inf)
        l_ref[...] = jnp.zeros_like(l_ref)
        acc_ref[...] = jnp.zeros_like(acc_ref)

    x = x_ref[...]                                                # (ROWS, LANE)

    # Block logits: dot(keys[s], x.flatten()) for the BLK slots of this block,
    # as VPU broadcast-multiply + lane/sublane reduces (kept off the MXU),
    # batched into one (1, BLK) row.
    logit_cols = []
    for s in range(BLK):                                          # static unroll
        part = jnp.sum(k_ref[s] * x, axis=1, keepdims=True)       # (ROWS, 1)
        logit_cols.append(jnp.sum(part, axis=0, keepdims=True))   # (1, 1)
    logits = jnp.concatenate(logit_cols, axis=1)                  # (1, BLK)

    # Block-local softmax pieces (one max/exp/sum per block, not per slot).
    blk_max = jnp.max(logits, axis=1, keepdims=True)              # (1, 1)
    p = jnp.exp(logits - blk_max)                                 # (1, BLK)
    blk_l = jnp.sum(p, axis=1, keepdims=True)                     # (1, 1)

    # Weighted sum of this block's values (VPU broadcast-FMA over BLK slots).
    blk_acc = p[:, 0:1] * v_ref[0]                                # (ROWS, LANE)
    for s in range(1, BLK):
        blk_acc = blk_acc + p[:, s:s + 1] * v_ref[s]

    # Online-softmax combine across blocks: one rescale of acc per grid step.
    m_old = m_ref[...]                                            # (1, 1)
    m_new = jnp.maximum(m_old, blk_max)
    corr_old = jnp.exp(m_old - m_new)                             # == 0 on step 0
    corr_blk = jnp.exp(blk_max - m_new)
    l_ref[...] = l_ref[...] * corr_old + blk_l * corr_blk
    acc_ref[...] = acc_ref[...] * corr_old + blk_acc * corr_blk
    m_ref[...] = m_new

    @pl.when(i == pl.num_programs(0) - 1)
    def _finalize():
        # value = sum_i softmax(attention)_i * values_i  ==  acc / l
        val = acc_ref[...] * pl.reciprocal(l_ref[...], approx=False)
        # softmax over all N elements of the flattened value vector
        vmax = jnp.max(val, axis=1, keepdims=True)
        vmax = jnp.max(vmax, axis=0, keepdims=True)               # (1, 1)
        e = jnp.exp(val - vmax)
        denom = jnp.sum(e, axis=1, keepdims=True)
        denom = jnp.sum(denom, axis=0, keepdims=True)             # (1, 1)
        folded = e * pl.reciprocal(denom, approx=False)
        # Net.forward: folded * input
        out_ref[...] = folded * x


@jax.jit
def net_forward(x_nchw, keys, values):
    # x_nchw: (1, C, H, W) f32 ; keys/values: (S, N) f32
    x2d = x_nchw.reshape(ROWS, LANE)            # contiguous -> free
    keys3d = keys.reshape(S, ROWS, LANE)
    values3d = values.reshape(S, ROWS, LANE)

    out2d = pl.pallas_call(
        net_kernel,
        out_shape=jax.ShapeDtypeStruct((ROWS, LANE), jnp.float32),
        grid_spec=pltpu.PrefetchScalarGridSpec(
            num_scalar_prefetch=0,
            grid=(STEPS,),
            in_specs=[
                pl.BlockSpec((ROWS, LANE), lambda i: (0, 0)),           # x: resident
                pl.BlockSpec((BLK, ROWS, LANE), lambda i: (i, 0, 0)),   # keys block i
                pl.BlockSpec((BLK, ROWS, LANE), lambda i: (i, 0, 0)),   # values block i
            ],
            out_specs=pl.BlockSpec((ROWS, LANE), lambda i: (0, 0)),     # resident output
            scratch_shapes=[
                pltpu.VMEM((1, 1), jnp.float32),        # m: running max of logits
                pltpu.VMEM((1, 1), jnp.float32),        # l: running softmax denom
                pltpu.VMEM((ROWS, LANE), jnp.float32),  # acc: weighted value accum
            ],
        ),
        compiler_params=pltpu.CompilerParams(
            dimension_semantics=("arbitrary",),   # slot-block axis is a reduction
        ),
    )(x2d, keys3d, values3d)
    return out2d.reshape(x_nchw.shape)


def net_forward_ref(x_nchw, keys, values):
    # Pure-JAX reference mirroring the PyTorch code exactly.
    key = x_nchw.reshape(-1)                        # flatten
    att = keys @ key                                # (S,)
    att = jax.nn.softmax(att, axis=0)
    value = jnp.sum(values * att[:, None], axis=0)  # (N,)
    value = jax.nn.softmax(value, axis=0)
    folded = value.reshape(1, C, H, W)
    return folded * x_nchw


if __name__ == "__main__":
    root = jax.random.PRNGKey(0)
    k_in, k_keys, k_vals = jax.random.split(root, 3)

    # deterministic "randn"-style init (shapes hard-coded by Net/MemB.__init__)
    x = jax.random.normal(k_in, (1, C, H, W), dtype=jnp.float32)
    keys = jax.random.normal(k_keys, (S, N), dtype=jnp.float32)
    values = jax.random.normal(k_vals, (S, N), dtype=jnp.float32)

    out = jax.block_until_ready(net_forward(x, keys, values))
    ref = jax.block_until_ready(net_forward_ref(x, keys, values))

    assert out.shape == (1, C, H, W)
    # Two-block online softmax changes accumulation order slightly vs the
    # single-pass reference; keep a tight-but-robust tolerance.
    assert jnp.allclose(out, ref, atol=1e-6, rtol=5e-5), "mismatch vs reference"
    print("KERNEL_OK")
</pallas_src>

<mosaic_0001>
module attributes {stable_mosaic.version = 11 : i64} {
  func.func @net_kernel(%arg0: i32, %arg1: memref<384x128xf32, #tpu.memory_space<vmem>>, %arg2: memref<5x384x128xf32, #tpu.memory_space<vmem>>, %arg3: memref<5x384x128xf32, #tpu.memory_space<vmem>>, %arg4: memref<384x128xf32, #tpu.memory_space<vmem>>, %arg5: memref<1x1xf32, #tpu.memory_space<vmem>>, %arg6: memref<1x1xf32, #tpu.memory_space<vmem>>, %arg7: memref<384x128xf32, #tpu.memory_space<vmem>>) attributes {dimension_semantics = [#tpu.dimension_semantics<arbitrary>], iteration_bounds = array<i64: 2>, scalar_prefetch = 0 : i64, scratch_operands = 3 : i64, tpu.core_type = #tpu.core_type<tc>, window_params = [{pipeline_mode = #tpu.pipeline_mode<synchronous>, transform_indices = @transform_0, window_bounds = array<i64: 384, 128>}, {transform_indices = @transform_1, window_bounds = array<i64: 5, 384, 128>}, {transform_indices = @transform_2, window_bounds = array<i64: 5, 384, 128>}, {pipeline_mode = #tpu.pipeline_mode<synchronous>, transform_indices = @transform_3, window_bounds = array<i64: 384, 128>}]} {
    %c0_i32 = arith.constant 0 : i32
    %0 = arith.cmpi eq, %arg0, %c0_i32 : i32
    %1 = arith.extui %0 : i1 to i32
    %c0_i32_0 = arith.constant 0 : i32
    %2 = arith.cmpi ne, %1, %c0_i32_0 : i32
    scf.if %2 {
      %cst_52 = arith.constant 0xFF800000 : f32
      %98 = vector.broadcast %cst_52 : f32 to vector<1x1xf32>
      %c0_53 = arith.constant 0 : index
      %c0_54 = arith.constant 0 : index
      %99 = vector.load %arg5[%c0_53, %c0_54] : memref<1x1xf32, #tpu.memory_space<vmem>>, vector<1x1xf32>
      tpu.vector_store %arg5[%c0_53, %c0_54], %98 {strides = array<i32>} : memref<1x1xf32, #tpu.memory_space<vmem>>, vector<1x1xf32>,
      %cst_55 = arith.constant 0.000000e+00 : f32
      %100 = vector.broadcast %cst_55 : f32 to vector<1x1xf32>
      %c0_56 = arith.constant 0 : index
      %c0_57 = arith.constant 0 : index
      %101 = vector.load %arg6[%c0_56, %c0_57] : memref<1x1xf32, #tpu.memory_space<vmem>>, vector<1x1xf32>
      tpu.vector_store %arg6[%c0_56, %c0_57], %100 {strides = array<i32>} : memref<1x1xf32, #tpu.memory_space<vmem>>, vector<1x1xf32>,
      %cst_58 = arith.constant 0.000000e+00 : f32
      %102 = vector.broadcast %cst_58 : f32 to vector<384x128xf32>
      %c0_59 = arith.constant 0 : index
      %c0_60 = arith.constant 0 : index
      %103 = vector.load %arg7[%c0_59, %c0_60] : memref<384x128xf32, #tpu.memory_space<vmem>>, vector<384x128xf32>
      tpu.vector_store %arg7[%c0_59, %c0_60], %102 {strides = array<i32>} : memref<384x128xf32, #tpu.memory_space<vmem>>, vector<384x128xf32>,
    } else {
    }
    %c0 = arith.constant 0 : index
    %c0_1 = arith.constant 0 : index
    %3 = vector.load %arg1[%c0, %c0_1] : memref<384x128xf32, #tpu.memory_space<vmem>>, vector<384x128xf32>
    %c0_2 = arith.constant 0 : index
    %c0_3 = arith.constant 0 : index
    %c0_4 = arith.constant 0 : index
    %4 = vector.load %arg2[%c0_2, %c0_3, %c0_4] : memref<5x384x128xf32, #tpu.memory_space<vmem>>, vector<1x384x128xf32>
    %5 = vector.shape_cast %4 : vector<1x384x128xf32> to vector<384x128xf32>
    %6 = arith.mulf %5, %3 : vector<384x128xf32>
    %cst = arith.constant dense<0.000000e+00> : vector<384xf32>
    %7 = vector.multi_reduction <add>, %6, %cst [1] : vector<384x128xf32> to vector<384xf32>
    %8 = vector.shape_cast %7 : vector<384xf32> to vector<384x1xf32>
    %cst_5 = arith.constant dense<0.000000e+00> : vector<1xf32>
    %9 = vector.multi_reduction <add>, %8, %cst_5 [0] : vector<384x1xf32> to vector<1xf32>
    %10 = vector.shape_cast %9 : vector<1xf32> to vector<1x1xf32>
    %c1 = arith.constant 1 : index
    %c0_6 = arith.constant 0 : index
    %c0_7 = arith.constant 0 : index
    %11 = vector.load %arg2[%c1, %c0_6, %c0_7] : memref<5x384x128xf32, #tpu.memory_space<vmem>>, vector<1x384x128xf32>
    %12 = vector.shape_cast %11 : vector<1x384x128xf32> to vector<384x128xf32>
    %13 = arith.mulf %12, %3 : vector<384x128xf32>
    %cst_8 = arith.constant dense<0.000000e+00> : vector<384xf32>
    %14 = vector.multi_reduction <add>, %13, %cst_8 [1] : vector<384x128xf32> to vector<384xf32>
    %15 = vector.shape_cast %14 : vector<384xf32> to vector<384x1xf32>
    %cst_9 = arith.constant dense<0.000000e+00> : vector<1xf32>
    %16 = vector.multi_reduction <add>, %15, %cst_9 [0] : vector<384x1xf32> to vector<1xf32>
    %17 = vector.shape_cast %16 : vector<1xf32> to vector<1x1xf32>
    %c2 = arith.constant 2 : index
    %c0_10 = arith.constant 0 : index
    %c0_11 = arith.constant 0 : index
    %18 = vector.load %arg2[%c2, %c0_10, %c0_11] : memref<5x384x128xf32, #tpu.memory_space<vmem>>, vector<1x384x128xf32>
    %19 = vector.shape_cast %18 : vector<1x384x128xf32> to vector<384x128xf32>
    %20 = arith.mulf %19, %3 : vector<384x128xf32>
    %cst_12 = arith.constant dense<0.000000e+00> : vector<384xf32>
    %21 = vector.multi_reduction <add>, %20, %cst_12 [1] : vector<384x128xf32> to vector<384xf32>
    %22 = vector.shape_cast %21 : vector<384xf32> to vector<384x1xf32>
    %cst_13 = arith.constant dense<0.000000e+00> : vector<1xf32>
    %23 = vector.multi_reduction <add>, %22, %cst_13 [0] : vector<384x1xf32> to vector<1xf32>
    %24 = vector.shape_cast %23 : vector<1xf32> to vector<1x1xf32>
    %c3 = arith.constant 3 : index
    %c0_14 = arith.constant 0 : index
    %c0_15 = arith.constant 0 : index
    %25 = vector.load %arg2[%c3, %c0_14, %c0_15] : memref<5x384x128xf32, #tpu.memory_space<vmem>>, vector<1x384x128xf32>
    %26 = vector.shape_cast %25 : vector<1x384x128xf32> to vector<384x128xf32>
    %27 = arith.mulf %26, %3 : vector<384x128xf32>
    %cst_16 = arith.constant dense<0.000000e+00> : vector<384xf32>
    %28 = vector.multi_reduction <add>, %27, %cst_16 [1] : vector<384x128xf32> to vector<384xf32>
    %29 = vector.shape_cast %28 : vector<384xf32> to vector<384x1xf32>
    %cst_17 = arith.constant dense<0.000000e+00> : vector<1xf32>
    %30 = vector.multi_reduction <add>, %29, %cst_17 [0] : vector<384x1xf32> to vector<1xf32>
    %31 = vector.shape_cast %30 : vector<1xf32> to vector<1x1xf32>
    %c4 = arith.constant 4 : index
    %c0_18 = arith.constant 0 : index
    %c0_19 = arith.constant 0 : index
    %32 = vector.load %arg2[%c4, %c0_18, %c0_19] : memref<5x384x128xf32, #tpu.memory_space<vmem>>, vector<1x384x128xf32>
    %33 = vector.shape_cast %32 : vector<1x384x128xf32> to vector<384x128xf32>
    %34 = arith.mulf %33, %3 : vector<384x128xf32>
    %cst_20 = arith.constant dense<0.000000e+00> : vector<384xf32>
    %35 = vector.multi_reduction <add>, %34, %cst_20 [1] : vector<384x128xf32> to vector<384xf32>
    %36 = vector.shape_cast %35 : vector<384xf32> to vector<384x1xf32>
    %cst_21 = arith.constant dense<0.000000e+00> : vector<1xf32>
    %37 = vector.multi_reduction <add>, %36, %cst_21 [0] : vector<384x1xf32> to vector<1xf32>
    %38 = vector.shape_cast %37 : vector<1xf32> to vector<1x1xf32>
    %39 = tpu.concatenate %10, %17, %24, %31, %38 in 1 : vector<1x1xf32>, vector<1x1xf32>, vector<1x1xf32>, vector<1x1xf32>, vector<1x1xf32> -> vector<1x5xf32>
    %cst_22 = arith.constant dense<0xFF800000> : vector<1xf32>
    %40 = vector.multi_reduction <maximumf>, %39, %cst_22 [1] : vector<1x5xf32> to vector<1xf32>
    %41 = vector.shape_cast %40 : vector<1xf32> to vector<1x1xf32>
    %42 = vector.broadcast %41 : vector<1x1xf32> to vector<1x5xf32>
    %43 = arith.subf %39, %42 : vector<1x5xf32>
    %44 = math.exp %43 : vector<1x5xf32>
    %cst_23 = arith.constant dense<0.000000e+00> : vector<1xf32>
    %45 = vector.multi_reduction <add>, %44, %cst_23 [1] : vector<1x5xf32> to vector<1xf32>
    %46 = vector.shape_cast %45 : vector<1xf32> to vector<1x1xf32>
    %47 = vector.extract_strided_slice %44 {offsets = [0, 0], sizes = [1, 1], strides = [1, 1]} : vector<1x5xf32> to vector<1x1xf32>
    %c0_24 = arith.constant 0 : index
    %c0_25 = arith.constant 0 : index
    %c0_26 = arith.constant 0 : index
    %48 = vector.load %arg3[%c0_24, %c0_25, %c0_26] : memref<5x384x128xf32, #tpu.memory_space<vmem>>, vector<1x384x128xf32>
    %49 = vector.shape_cast %48 : vector<1x384x128xf32> to vector<384x128xf32>
    %50 = vector.broadcast %47 : vector<1x1xf32> to vector<384x128xf32>
    %51 = arith.mulf %50, %49 : vector<384x128xf32>
    %52 = vector.extract_strided_slice %44 {offsets = [0, 1], sizes = [1, 1], strides = [1, 1]} : vector<1x5xf32> to vector<1x1xf32>
    %c1_27 = arith.constant 1 : index
    %c0_28 = arith.constant 0 : index
    %c0_29 = arith.constant 0 : index
    %53 = vector.load %arg3[%c1_27, %c0_28, %c0_29] : memref<5x384x128xf32, #tpu.memory_space<vmem>>, vector<1x384x128xf32>
    %54 = vector.shape_cast %53 : vector<1x384x128xf32> to vector<384x128xf32>
    %55 = vector.broadcast %52 : vector<1x1xf32> to vector<384x128xf32>
    %56 = arith.mulf %55, %54 : vector<384x128xf32>
    %57 = arith.addf %51, %56 : vector<384x128xf32>
    %58 = vector.extract_strided_slice %44 {offsets = [0, 2], sizes = [1, 1], strides = [1, 1]} : vector<1x5xf32> to vector<1x1xf32>
    %c2_30 = arith.constant 2 : index
    %c0_31 = arith.constant 0 : index
    %c0_32 = arith.constant 0 : index
    %59 = vector.load %arg3[%c2_30, %c0_31, %c0_32] : memref<5x384x128xf32, #tpu.memory_space<vmem>>, vector<1x384x128xf32>
    %60 = vector.shape_cast %59 : vector<1x384x128xf32> to vector<384x128xf32>
    %61 = vector.broadcast %58 : vector<1x1xf32> to vector<384x128xf32>
    %62 = arith.mulf %61, %60 : vector<384x128xf32>
    %63 = arith.addf %57, %62 : vector<384x128xf32>
    %64 = vector.extract_strided_slice %44 {offsets = [0, 3], sizes = [1, 1], strides = [1, 1]} : vector<1x5xf32> to vector<1x1xf32>
    %c3_33 = arith.constant 3 : index
    %c0_34 = arith.constant 0 : index
    %c0_35 = arith.constant 0 : index
    %65 = vector.load %arg3[%c3_33, %c0_34, %c0_35] : memref<5x384x128xf32, #tpu.memory_space<vmem>>, vector<1x384x128xf32>
    %66 = vector.shape_cast %65 : vector<1x384x128xf32> to vector<384x128xf32>
    %67 = vector.broadcast %64 : vector<1x1xf32> to vector<384x128xf32>
    %68 = arith.mulf %67, %66 : vector<384x128xf32>
    %69 = arith.addf %63, %68 : vector<384x128xf32>
    %70 = vector.extract_strided_slice %44 {offsets = [0, 4], sizes = [1, 1], strides = [1, 1]} : vector<1x5xf32> to vector<1x1xf32>
    %c4_36 = arith.constant 4 : index
    %c0_37 = arith.constant 0 : index
    %c0_38 = arith.constant 0 : index
    %71 = vector.load %arg3[%c4_36, %c0_37, %c0_38] : memref<5x384x128xf32, #tpu.memory_space<vmem>>, vector<1x384x128xf32>
    %72 = vector.shape_cast %71 : vector<1x384x128xf32> to vector<384x128xf32>
    %73 = vector.broadcast %70 : vector<1x1xf32> to vector<384x128xf32>
    %74 = arith.mulf %73, %72 : vector<384x128xf32>
    %75 = arith.addf %69, %74 : vector<384x128xf32>
    %c0_39 = arith.constant 0 : index
    %c0_40 = arith.constant 0 : index
    %76 = vector.load %arg5[%c0_39, %c0_40] : memref<1x1xf32, #tpu.memory_space<vmem>>, vector<1x1xf32>
    %77 = arith.maximumf %76, %41 : vector<1x1xf32>
    %78 = arith.subf %76, %77 : vector<1x1xf32>
    %79 = math.exp %78 : vector<1x1xf32>
    %80 = arith.subf %41, %77 : vector<1x1xf32>
    %81 = math.exp %80 : vector<1x1xf32>
    %c0_41 = arith.constant 0 : index
    %c0_42 = arith.constant 0 : index
    %82 = vector.load %arg6[%c0_41, %c0_42] : memref<1x1xf32, #tpu.memory_space<vmem>>, vector<1x1xf32>
    %83 = arith.mulf %82, %79 : vector<1x1xf32>
    %84 = arith.mulf %46, %81 : vector<1x1xf32>
    %85 = arith.addf %83, %84 : vector<1x1xf32>
    %c0_43 = arith.constant 0 : index
    %c0_44 = arith.constant 0 : index
    %86 = vector.load %arg6[%c0_43, %c0_44] : memref<1x1xf32, #tpu.memory_space<vmem>>, vector<1x1xf32>
    tpu.vector_store %arg6[%c0_43, %c0_44], %85 {strides = array<i32>} : memref<1x1xf32, #tpu.memory_space<vmem>>, vector<1x1xf32>,
    %c0_45 = arith.constant 0 : index
    %c0_46 = arith.constant 0 : index
    %87 = vector.load %arg7[%c0_45, %c0_46] : memref<384x128xf32, #tpu.memory_space<vmem>>, vector<384x128xf32>
    %88 = vector.broadcast %79 : vector<1x1xf32> to vector<384x128xf32>
    %89 = arith.mulf %87, %88 : vector<384x128xf32>
    %90 = vector.broadcast %81 : vector<1x1xf32> to vector<384x128xf32>
    %91 = arith.mulf %75, %90 : vector<384x128xf32>
    %92 = arith.addf %89, %91 : vector<384x128xf32>
    %c0_47 = arith.constant 0 : index
    %c0_48 = arith.constant 0 : index
    %93 = vector.load %arg7[%c0_47, %c0_48] : memref<384x128xf32, #tpu.memory_space<vmem>>, vector<384x128xf32>
    tpu.vector_store %arg7[%c0_47, %c0_48], %92 {strides = array<i32>} : memref<384x128xf32, #tpu.memory_space<vmem>>, vector<384x128xf32>,
    %c0_49 = arith.constant 0 : index
    %c0_50 = arith.constant 0 : index
    %94 = vector.load %arg5[%c0_49, %c0_50] : memref<1x1xf32, #tpu.memory_space<vmem>>, vector<1x1xf32>
    tpu.vector_store %arg5[%c0_49, %c0_50], %77 {strides = array<i32>} : memref<1x1xf32, #tpu.memory_space<vmem>>, vector<1x1xf32>,
    %c1_i32 = arith.constant 1 : i32
    %95 = arith.cmpi eq, %arg0, %c1_i32 : i32
    %96 = arith.extui %95 : i1 to i32
    %c0_i32_51 = arith.constant 0 : i32
    %97 = arith.cmpi ne, %96, %c0_i32_51 : i32
    scf.if %97 {
      %c0_52 = arith.constant 0 : index
      %c0_53 = arith.constant 0 : index
      %98 = vector.load %arg7[%c0_52, %c0_53] : memref<384x128xf32, #tpu.memory_space<vmem>>, vector<384x128xf32>
      %c0_54 = arith.constant 0 : index
      %c0_55 = arith.constant 0 : index
      %99 = vector.load %arg6[%c0_54, %c0_55] : memref<1x1xf32, #tpu.memory_space<vmem>>, vector<1x1xf32>
      %100 = tpu.reciprocal %99 : vector<1x1xf32> -> vector<1x1xf32>
      %101 = vector.broadcast %100 : vector<1x1xf32> to vector<384x128xf32>
      %102 = arith.mulf %98, %101 : vector<384x128xf32>
      %cst_56 = arith.constant dense<0xFF800000> : vector<384xf32>
      %103 = vector.multi_reduction <maximumf>, %102, %cst_56 [1] : vector<384x128xf32> to vector<384xf32>
      %104 = vector.shape_cast %103 : vector<384xf32> to vector<384x1xf32>
      %cst_57 = arith.constant dense<0xFF800000> : vector<1xf32>
      %105 = vector.multi_reduction <maximumf>, %104, %cst_57 [0] : vector<384x1xf32> to vector<1xf32>
      %106 = vector.shape_cast %105 : vector<1xf32> to vector<1x1xf32>
      %107 = vector.broadcast %106 : vector<1x1xf32> to vector<384x128xf32>
      %108 = arith.subf %102, %107 : vector<384x128xf32>
      %109 = math.exp %108 : vector<384x128xf32>
      %cst_58 = arith.constant dense<0.000000e+00> : vector<384xf32>
      %110 = vector.multi_reduction <add>, %109, %cst_58 [1] : vector<384x128xf32> to vector<384xf32>
      %111 = vector.shape_cast %110 : vector<384xf32> to vector<384x1xf32>
      %cst_59 = arith.constant dense<0.000000e+00> : vector<1xf32>
      %112 = vector.multi_reduction <add>, %111, %cst_59 [0] : vector<384x1xf32> to vector<1xf32>
      %113 = vector.shape_cast %112 : vector<1xf32> to vector<1x1xf32>
      %114 = tpu.reciprocal %113 : vector<1x1xf32> -> vector<1x1xf32>
      %115 = vector.broadcast %114 : vector<1x1xf32> to vector<384x128xf32>
      %116 = arith.mulf %109, %115 : vector<384x128xf32>
      %117 = arith.mulf %116, %3 : vector<384x128xf32>
      %c0_60 = arith.constant 0 : index
      %c0_61 = arith.constant 0 : index
      %118 = vector.load %arg4[%c0_60, %c0_61] : memref<384x128xf32, #tpu.memory_space<vmem>>, vector<384x128xf32>
      tpu.vector_store %arg4[%c0_60, %c0_61], %117 {strides = array<i32>} : memref<384x128xf32, #tpu.memory_space<vmem>>, vector<384x128xf32>,
    } else {
    }
    return
  }
  func.func @transform_0(%arg0: i32) -> (i32, i32) {
    %c0_i32 = arith.constant 0 : i32
    %c0_i32_0 = arith.constant 0 : i32
    %c0_i32_1 = arith.constant 0 : i32
    return %c0_i32, %c0_i32_0 : i32, i32
  }
  func.func @transform_1(%arg0: i32) -> (i32, i32, i32) {
    %c0_i32 = arith.constant 0 : i32
    %c0_i32_0 = arith.constant 0 : i32
    %c0_i32_1 = arith.constant 0 : i32
    return %arg0, %c0_i32, %c0_i32_0 : i32, i32, i32
  }
  func.func @transform_2(%arg0: i32) -> (i32, i32, i32) {
    %c0_i32 = arith.constant 0 : i32
    %c0_i32_0 = arith.constant 0 : i32
    %c0_i32_1 = arith.constant 0 : i32
    return %arg0, %c0_i32, %c0_i32_0 : i32, i32, i32
  }
  func.func @transform_3(%arg0: i32) -> (i32, i32) {
    %c0_i32 = arith.constant 0 : i32
    %c0_i32_0 = arith.constant 0 : i32
    %c0_i32_1 = arith.constant 0 : i32
    return %c0_i32, %c0_i32_0 : i32, i32
  }
}

</mosaic_0001>

<bundles_post_ra>
// kernel: net_forward.1
= control target key start
LH: loop header
LB: loop body
LE: loop exit
PB: predicated region body
PF: predicated region fallthrough
CT: control target
= control target key end

     0   :  { %8 = vsyncpa [#allocation6], 0  ;;  %s3900_s12 = smov 0   ;;  %s6896_s0 = inlined_call_operand.vmem [shape: f32[384,128], index: 0, kind: input, shape index: {}]   ;;  %s6897_s1 = inlined_call_operand.vmem [shape: f32[10,384,128], index: 1, kind: input, shape index: {}]   ;;  %s6898_s2 = inlined_call_operand.vmem [shape: f32[10,384,128], index: 2, kind: input, shape index: {}]   ;;  %s6899_s3 = inlined_call_operand.hbm [shape: f32[384,128], index: 3, kind: output, shape index: {}]  }
   0x1 LB: > { %s3906_s13 = sadd.s32 4294967295, %s3867_s12   ;;  %p3266_p0 = scmp.ge.s32.totalorder %s3867_s12, 1  ;;  %s3867_s12 = sphi %s3900_s12, %s14_s12  }
   0x2   : > { %p147_p1 = scmp.lt.s32.totalorder %s3867_s12, 3 }
   0x4   : > { %p148_p2 = pnand %p3266_p0, %p147_p1 }
   0x6   : > { %151 = sbr.rel (%p148_p2) target bundleno = 1951 (0x79f), region = 32 }
   0xd   : > { %s173_s14 = smul.u32 5, %s3906_s13  ;;  %p3269_p4 = scmp.ne.s32.totalorder %s3906_s13, 0 }
   0xe   : > { %vm191_vm0 = vcmask (!%p3269_p4), 0   ;;  %v3869_v0 = vmov (!%p3269_p4), -inf   ;;  %v3870_v1 = vmov (!%p3269_p4), 0.0  }
   0xf   : > { %p174_p3 = scmp.lt.s32.totalorder %s173_s14, 9  ;;  %190 = sbr.rel (%p3269_p4) target bundleno = 40 (0x28), region = 36  ;;  %192 = vst.msk [vmem:[#allocation2] sm:$0x1] (!%p3269_p4), %vm191_vm0, %v3869_v0  ;;  %193 = vst.msk [vmem:[#allocation3] sm:$0x1] (!%p3269_p4), %vm191_vm0, %v3870_v1 }
  0x10   : > { %194 = vst [vmem:[#allocation4] sm:$0xff] (!%p3269_p4), %v3870_v1  ;;  %195 = vst [vmem:[#allocation4 + $0x8] sm:$0xff] (!%p3269_p4), %v3870_v1 }
  0x11   : > { %s7663_s14 = smov (!%p174_p3, %s173_s14), 9  ;;  %196 = vst [vmem:[#allocation4 + $0x10] sm:$0xff] (!%p3269_p4), %v3870_v1  ;;  %197 = vst [vmem:[#allocation4 + $0x18] sm:$0xff] (!%p3269_p4), %v3870_v1 }
  0x12   : > { %s3659_s15 = smul.u32 384, %s7663_s14  ;;  %198 = vst [vmem:[#allocation4 + $0x20] sm:$0xff] (!%p3269_p4), %v3870_v1  ;;  %199 = vst [vmem:[#allocation4 + $0x28] sm:$0xff] (!%p3269_p4), %v3870_v1 }
  0x13   : > { %200 = vst [vmem:[#allocation4 + $0x30] sm:$0xff] (!%p3269_p4), %v3870_v1  ;;  %201 = vst [vmem:[#allocation4 + $0x38] sm:$0xff] (!%p3269_p4), %v3870_v1 }
  0x14   : > { %s3914_s18 = scalar_lea.vmem %s6897_s1, %s3659_s15  ;;  %s3919_s21 = scalar_lea.vmem %s6898_s2, %s3659_s15  ;;  %202 = vst [vmem:[#allocation4 + $0x40] sm:$0xff] (!%p3269_p4), %v3870_v1  ;;  %203 = vst [vmem:[#allocation4 + $0x48] sm:$0xff] (!%p3269_p4), %v3870_v1 }
  0x15   : > { %204 = vst [vmem:[#allocation4 + $0x50] sm:$0xff] (!%p3269_p4), %v3870_v1  ;;  %205 = vst [vmem:[#allocation4 + $0x58] sm:$0xff] (!%p3269_p4), %v3870_v1 }
  0x16   : > { %206 = vst [vmem:[#allocation4 + $0x60] sm:$0xff] %v3870_v1  ;;  %207 = vst [vmem:[#allocation4 + $0x68] sm:$0xff] %v3870_v1 }
  0x17   : > { %208 = vst [vmem:[#allocation4 + $0x70] sm:$0xff] %v3870_v1  ;;  %209 = vst [vmem:[#allocation4 + $0x78] sm:$0xff] %v3870_v1 }
  0x18   : > { %210 = vst [vmem:[#allocation4 + $0x80] sm:$0xff] %v3870_v1  ;;  %211 = vst [vmem:[#allocation4 + $0x88] sm:$0xff] %v3870_v1 }
  0x19   : > { %212 = vst [vmem:[#allocation4 + $0x90] sm:$0xff] %v3870_v1  ;;  %213 = vst [vmem:[#allocation4 + $0x98] sm:$0xff] %v3870_v1 }
  0x1a   : > { %214 = vst [vmem:[#allocation4 + $0xa0] sm:$0xff] %v3870_v1  ;;  %215 = vst [vmem:[#allocation4 + $0xa8] sm:$0xff] %v3870_v1 }
  0x1b   : > { %216 = vst [vmem:[#allocation4 + $0xb0] sm:$0xff] %v3870_v1  ;;  %217 = vst [vmem:[#allocation4 + $0xb8] sm:$0xff] %v3870_v1 }
  0x1c   : > { %218 = vst [vmem:[#allocation4 + $0xc0] sm:$0xff] %v3870_v1  ;;  %219 = vst [vmem:[#allocation4 + $0xc8] sm:$0xff] %v3870_v1 }
  0x1d   : > { %220 = vst [vmem:[#allocation4 + $0xd0] sm:$0xff] %v3870_v1  ;;  %221 = vst [vmem:[#allocation4 + $0xd8] sm:$0xff] %v3870_v1 }
  0x1e   : > { %222 = vst [vmem:[#allocation4 + $0xe0] sm:$0xff] %v3870_v1  ;;  %223 = vst [vmem:[#allocation4 + $0xe8] sm:$0xff] %v3870_v1 }
  0x1f   : > { %224 = vst [vmem:[#allocation4 + $0xf0] sm:$0xff] %v3870_v1  ;;  %225 = vst [vmem:[#allocation4 + $0xf8] sm:$0xff] %v3870_v1 }
  0x20   : > { %226 = vst [vmem:[#allocation4 + $0x100] sm:$0xff] %v3870_v1  ;;  %227 = vst [vmem:[#allocation4 + $0x108] sm:$0xff] %v3870_v1 }
  0x21   : > { %228 = vst [vmem:[#allocation4 + $0x110] sm:$0xff] %v3870_v1  ;;  %229 = vst [vmem:[#allocation4 + $0x118] sm:$0xff] %v3870_v1 }
  0x22   : > { %230 = vst [vmem:[#allocation4 + $0x120] sm:$0xff] %v3870_v1  ;;  %231 = vst [vmem:[#allocation4 + $0x128] sm:$0xff] %v3870_v1 }
  0x23   : > { %232 = vst [vmem:[#allocation4 + $0x130] sm:$0xff] %v3870_v1  ;;  %233 = vst [vmem:[#allocation4 + $0x138] sm:$0xff] %v3870_v1 }
  0x24   : > { %234 = vst [vmem:[#allocation4 + $0x140] sm:$0xff] %v3870_v1  ;;  %235 = vst [vmem:[#allocation4 + $0x148] sm:$0xff] %v3870_v1 }
  0x25   : > { %236 = vst [vmem:[#allocation4 + $0x150] sm:$0xff] %v3870_v1  ;;  %237 = vst [vmem:[#allocation4 + $0x158] sm:$0xff] %v3870_v1 }
  0x26   : > { %238 = vst [vmem:[#allocation4 + $0x160] sm:$0xff] %v3870_v1  ;;  %239 = vst [vmem:[#allocation4 + $0x168] sm:$0xff] %v3870_v1 }
  0x27   : > { %240 = vst [vmem:[#allocation4 + $0x170] sm:$0xff] %v3870_v1  ;;  %241 = vst [vmem:[#allocation4 + $0x178] sm:$0xff] %v3870_v1 }
  0x28 PF: > { %v3925_v2 = vld [vmem:[%s6896_s0 + $0x10] sm:$0xff]  ;;  %v3931_v4 = vld [vmem:[%s6896_s0] sm:$0xff]  ;;  %v3938_v7 = vld [vmem:[%s6896_s0 + $0x18] sm:$0xff]  ;;  %vm1519_vm1 = vcmask 7168   ;;  %vm1521_vm2 = vcmask 15360   ;;  %vm1523_vm3 = vcmask 23552  }
  0x29   : > { %7001 = vst [vmem:[#allocation8_spill] sm:$0xff] %v3925_v2  ;;  %v292_v3 = vld [vmem:[%s3914_s18 + $0x10] sm:$0xff]  ;;  %7002 = vst [vmem:[#allocation9_spill] sm:$0xff] %v3931_v4  ;;  %v290_v6 = vld [vmem:[%s3914_s18] sm:$0xff]  ;;  %vm1525_vm4 = vcmask 31744   ;;  %vm1527_vm5 = vcmask 32768  }
  0x2a   : > { %v340_v5 = vmul.f32 %v292_v3, %v3925_v2  ;;  %7003 = vst [vmem:[#allocation10_spill] sm:$0xff] %v3938_v7  ;;  %v293_v8 = vld [vmem:[%s3914_s18 + $0x18] sm:$0xff]  ;;  %v338_v9 = vmul.f32 %v290_v6, %v3931_v4  ;;  %v3945_v10 = vld [vmem:[%s6896_s0 + $0x8] sm:$0xff]  ;;  %v3959_v16 = vld [vmem:[%s6896_s0 + $0x20] sm:$0xff]  ;;  %vm2249_vm6 = vcmask 0   ;;  %s3873_s5 = smov 127  }
  0x2b   : > { %7004 = vst [vmem:[#allocation11_spill] sm:$0xff] %v3945_v10  ;;  %v291_v11 = vld [vmem:[%s3914_s18 + $0x8] sm:$0xff]  ;;  %v341_v12 = vmul.f32 %v293_v8, %v3938_v7  ;;  %7006 = vst [vmem:[#allocation13_spill] sm:$0xff] %v3959_v16  ;;  %v294_v17 = vld [vmem:[%s3914_s18 + $0x20] sm:$0xff]  ;;  %s3874_s6 = smov 125   ;;  %s3875_s7 = smov 124  }
  0x2c   : > { %390 = vadd.xlane.f32.xlu1 %v340_v5  ;;  %386 = vadd.xlane.f32.xlu0 %v338_v9  ;;  %v339_v13 = vmul.f32 %v291_v11, %v3945_v10  ;;  %v3953_v14 = vld [vmem:[%s6896_s0 + $0x28] sm:$0xff]  ;;  %v342_v19 = vmul.f32 %v294_v17, %v3959_v16  ;;  %v3967_v20 = vld [vmem:[%s6896_s0 + $0x38] sm:$0xff]  ;;  %v3973_v22 = vld [vmem:[%s6896_s0 + $0x30] sm:$0xff]  ;;  %p3654_p5 = scmp.ne.s32.totalorder %s3906_s13, 1 }
  0x2d   : > { %7005 = vst [vmem:[#allocation12_spill] sm:$0xff] %v3953_v14  ;;  %v295_v15 = vld [vmem:[%s3914_s18 + $0x28] sm:$0xff]  ;;  %7007 = vst [vmem:[#allocation14_spill] sm:$0xff] %v3967_v20  ;;  %v297_v21 = vld [vmem:[%s3914_s18 + $0x38] sm:$0xff] }
  0x2e   : > { %v343_v18 = vmul.f32 %v295_v15, %v3953_v14  ;;  %7008 = vst [vmem:[#allocation15_spill] sm:$0xff] %v3973_v22  ;;  %v296_v23 = vld [vmem:[%s3914_s18 + $0x30] sm:$0xff]  ;;  %v345_v24 = vmul.f32 %v297_v21, %v3967_v20  ;;  %v3981_v26 = vld [vmem:[%s6896_s0 + $0x48] sm:$0xff]  ;;  %v3987_v28 = vld [vmem:[%s6896_s0 + $0x40] sm:$0xff] }
  0x2f   : > { %v344_v25 = vmul.f32 %v296_v23, %v3973_v22  ;;  %7009 = vst [vmem:[#allocation16_spill] sm:$0xff] %v3981_v26  ;;  %v299_v27 = vld [vmem:[%s3914_s18 + $0x48] sm:$0xff]  ;;  %7010 = vst [vmem:[#allocation17_spill] sm:$0xff] %v3987_v28  ;;  %v298_v29 = vld [vmem:[%s3914_s18 + $0x40] sm:$0xff] }
  0x30   : > { %392 = vadd.xlane.f32.xlu1 %v341_v12  ;;  %388 = vadd.xlane.f32.xlu0 %v339_v13  ;;  %v347_v30 = vmul.f32 %v299_v27, %v3981_v26  ;;  %v346_v31 = vmul.f32 %v298_v29, %v3987_v28  ;;  %v3995_v32 = vld [vmem:[%s6896_s0 + $0x58] sm:$0xff]  ;;  %v4001_v34 = vld [vmem:[%s6896_s0 + $0x50] sm:$0xff]  ;;  %v4009_v38 = vld [vmem:[%s6896_s0 + $0x68] sm:$0xff] }
  0x31   : > { %7011 = vst [vmem:[#allocation18_spill] sm:$0xff] %v3995_v32  ;;  %v301_v33 = vld [vmem:[%s3914_s18 + $0x58] sm:$0xff]  ;;  %7012 = vst [vmem:[#allocation19_spill] sm:$0xff] %v4001_v34  ;;  %v300_v35 = vld [vmem:[%s3914_s18 + $0x50] sm:$0xff] }
  0x32   : > { %v349_v36 = vmul.f32 %v301_v33, %v3995_v32  ;;  %v348_v37 = vmul.f32 %v300_v35, %v4001_v34  ;;  %7013 = vst [vmem:[#allocation20_spill] sm:$0xff] %v4009_v38  ;;  %v303_v39 = vld [vmem:[%s3914_s18 + $0x68] sm:$0xff]  ;;  %v4015_v40 = vld [vmem:[%s6896_s0 + $0x60] sm:$0xff]  ;;  %v4023_v44 = vld [vmem:[%s6896_s0 + $0x78] sm:$0xff] }
  0x33   : > { %7014 = vst [vmem:[#allocation21_spill] sm:$0xff] %v4015_v40  ;;  %v302_v41 = vld [vmem:[%s3914_s18 + $0x60] sm:$0xff]  ;;  %v351_v42 = vmul.f32 %v303_v39, %v4009_v38  ;;  %7015 = vst [vmem:[#allocation22_spill] sm:$0xff] %v4023_v44  ;;  %v305_v45 = vld [vmem:[%s3914_s18 + $0x78] sm:$0xff] }
  0x34   : > { %396 = vadd.xlane.f32.xlu1 %v343_v18  ;;  %394 = vadd.xlane.f32.xlu0 %v342_v19  ;;  %v350_v43 = vmul.f32 %v302_v41, %v4015_v40  ;;  %v4029_v46 = vld [vmem:[%s6896_s0 + $0x70] sm:$0xff]  ;;  %v353_v48 = vmul.f32 %v305_v45, %v4023_v44  ;;  %v4037_v50 = vld [vmem:[%s6896_s0 + $0x88] sm:$0xff]  ;;  %v4043_v52 = vld [vmem:[%s6896_s0 + $0x80] sm:$0xff] }
  0x35   : > { %7016 = vst [vmem:[#allocation23_spill] sm:$0xff] %v4029_v46  ;;  %v304_v47 = vld [vmem:[%s3914_s18 + $0x70] sm:$0xff]  ;;  %7017 = vst [vmem:[#allocation24_spill] sm:$0xff] %v4037_v50  ;;  %v307_v51 = vld [vmem:[%s3914_s18 + $0x88] sm:$0xff] }
  0x36   : > { %v352_v49 = vmul.f32 %v304_v47, %v4029_v46  ;;  %7018 = vst [vmem:[#allocation25_spill] sm:$0xff] %v4043_v52  ;;  %v306_v53 = vld [vmem:[%s3914_s18 + $0x80] sm:$0xff]  ;;  %v355_v54 = vmul.f32 %v307_v51, %v4037_v50  ;;  %v4051_v56 = vld [vmem:[%s6896_s0 + $0x98] sm:$0xff]  ;;  %v4057_v58 = vld [vmem:[%s6896_s0 + $0x90] sm:$0xff] }
  0x37   : > { %v354_v55 = vmul.f32 %v306_v53, %v4043_v52  ;;  %7019 = vst [vmem:[#allocation26_spill] sm:$0xff] %v4051_v56  ;;  %v309_v57 = vld [vmem:[%s3914_s18 + $0x98] sm:$0xff]  ;;  %7020 = vst [vmem:[#allocation27_spill] sm:$0xff] %v4057_v58  ;;  %v308_v59 = vld [vmem:[%s3914_s18 + $0x90] sm:$0xff] }
  0x38   : > { %400 = vadd.xlane.f32.xlu1 %v345_v24  ;;  %398 = vadd.xlane.f32.xlu0 %v344_v25  ;;  %v357_v60 = vmul.f32 %v309_v57, %v4051_v56  ;;  %v356_v61 = vmul.f32 %v308_v59, %v4057_v58  ;;  %v4065_v62 = vld [vmem:[%s6896_s0 + $0xa8] sm:$0xff]  ;;  %v4071_v0 = vld [vmem:[%s6896_s0 + $0xa0] sm:$0xff]  ;;  %v4079_v6 = vld [vmem:[%s6896_s0 + $0xb8] sm:$0xff] }
  0x39   : > { %7021 = vst [vmem:[#allocation28_spill] sm:$0xff] %v4065_v62  ;;  %v311_v63 = vld [vmem:[%s3914_s18 + $0xa8] sm:$0xff]  ;;  %7022 = vst [vmem:[#allocation29_spill] sm:$0xff] %v4071_v0  ;;  %v310_v1 = vld [vmem:[%s3914_s18 + $0xa0] sm:$0xff] }
  0x3a   : > { %v359_v3 = vmul.f32 %v311_v63, %v4065_v62  ;;  %v358_v5 = vmul.f32 %v310_v1, %v4071_v0  ;;  %7023 = vst [vmem:[#allocation30_spill] sm:$0xff] %v4079_v6  ;;  %v313_v8 = vld [vmem:[%s3914_s18 + $0xb8] sm:$0xff]  ;;  %v4085_v9 = vld [vmem:[%s6896_s0 + $0xb0] sm:$0xff]  ;;  %v4093_v15 = vld [vmem:[%s6896_s0 + $0xc8] sm:$0xff] }
  0x3b   : > { %7024 = vst [vmem:[#allocation31_spill] sm:$0xff] %v4085_v9  ;;  %v312_v11 = vld [vmem:[%s3914_s18 + $0xb0] sm:$0xff]  ;;  %v361_v12 = vmul.f32 %v313_v8, %v4079_v6  ;;  %7025 = vst [vmem:[#allocation32_spill] sm:$0xff] %v4093_v15  ;;  %v315_v17 = vld [vmem:[%s3914_s18 + $0xc8] sm:$0xff] }
  0x3c   : > { %404 = vadd.xlane.f32.xlu1 %v347_v30  ;;  %402 = vadd.xlane.f32.xlu0 %v346_v31  ;;  %v360_v13 = vmul.f32 %v312_v11, %v4085_v9  ;;  %v4099_v18 = vld [vmem:[%s6896_s0 + $0xc0] sm:$0xff]  ;;  %v363_v21 = vmul.f32 %v315_v17, %v4093_v15  ;;  %v4107_v24 = vld [vmem:[%s6896_s0 + $0xd8] sm:$0xff]  ;;  %v4113_v27 = vld [vmem:[%s6896_s0 + $0xd0] sm:$0xff] }
  0x3d   : > { %7026 = vst [vmem:[#allocation33_spill] sm:$0xff] %v4099_v18  ;;  %v314_v19 = vld [vmem:[%s3914_s18 + $0xc0] sm:$0xff]  ;;  %7027 = vst [vmem:[#allocation34_spill] sm:$0xff] %v4107_v24  ;;  %v317_v25 = vld [vmem:[%s3914_s18 + $0xd8] sm:$0xff] }
  0x3e   : > { %v362_v23 = vmul.f32 %v314_v19, %v4099_v18  ;;  %7028 = vst [vmem:[#allocation35_spill] sm:$0xff] %v4113_v27  ;;  %v316_v29 = vld [vmem:[%s3914_s18 + $0xd0] sm:$0xff]  ;;  %v365_v30 = vmul.f32 %v317_v25, %v4107_v24  ;;  %v4121_v33 = vld [vmem:[%s6896_s0 + $0xe8] sm:$0xff] }
  0x3f   : > { %v364_v31 = vmul.f32 %v316_v29, %v4113_v27  ;;  %7029 = vst [vmem:[#allocation36_spill] sm:$0xff] %v4121_v33  ;;  %v319_v35 = vld [vmem:[%s3914_s18 + $0xe8] sm:$0xff]  ;;  %v4141_v45 = vld [vmem:[%s6896_s0 + $0xf0] sm:$0xff] }
  0x40   : > { %408 = vadd.xlane.f32.xlu1 %v349_v36  ;;  %406 = vadd.xlane.f32.xlu0 %v348_v37  ;;  %v4127_v36 = vld [vmem:[%s6896_s0 + $0xe0] sm:$0xff]  ;;  %v367_v39 = vmul.f32 %v319_v35, %v4121_v33  ;;  %7032 = vst [vmem:[#allocation39_spill] sm:$0xff] %v4141_v45  ;;  %v320_v47 = vld [vmem:[%s3914_s18 + $0xf0] sm:$0xff]  ;;  %v4149_v51 = vld [vmem:[%s6896_s0 + $0x108] sm:$0xff] }
  0x41   : > { %7030 = vst [vmem:[#allocation37_spill] sm:$0xff] %v4127_v36  ;;  %v318_v37 = vld [vmem:[%s3914_s18 + $0xe0] sm:$0xff]  ;;  %7033 = vst [vmem:[#allocation40_spill] sm:$0xff] %v4149_v51  ;;  %v323_v53 = vld [vmem:[%s3914_s18 + $0x108] sm:$0xff] }
  0x42   : > { %v366_v41 = vmul.f32 %v318_v37, %v4127_v36  ;;  %v371_v57 = vmul.f32 %v323_v53, %v4149_v51  ;;  %v4169_v63 = vld [vmem:[%s6896_s0 + $0x110] sm:$0xff]  ;;  %v4177_v8 = vld [vmem:[%s6896_s0 + $0x128] sm:$0xff] }
  0x43   : > { %7036 = vst [vmem:[#allocation43_spill] sm:$0xff] %v4169_v63  ;;  %v324_v1 = vld [vmem:[%s3914_s18 + $0x110] sm:$0xff]  ;;  %7037 = vst [vmem:[#allocation44_spill] sm:$0xff] %v4177_v8  ;;  %v327_v11 = vld [vmem:[%s3914_s18 + $0x128] sm:$0xff] }
  0x44   : > { %412 = vadd.xlane.f32.xlu1 %v351_v42  ;;  %410 = vadd.xlane.f32.xlu0 %v350_v43  ;;  %v4135_v42 = vld [vmem:[%s6896_s0 + $0xf8] sm:$0xff]  ;;  %v375_v17 = vmul.f32 %v327_v11, %v4177_v8  ;;  %v4197_v25 = vld [vmem:[%s6896_s0 + $0x130] sm:$0xff]  ;;  %v4205_v35 = vld [vmem:[%s6896_s0 + $0x148] sm:$0xff] }
  0x45   : > { %7031 = vst [vmem:[#allocation38_spill] sm:$0xff] %v4135_v42  ;;  %v321_v43 = vld [vmem:[%s3914_s18 + $0xf8] sm:$0xff]  ;;  %7040 = vst [vmem:[#allocation47_spill] sm:$0xff] %v4197_v25  ;;  %v328_v29 = vld [vmem:[%s3914_s18 + $0x130] sm:$0xff] }
  0x46   : > { %7041 = vst [vmem:[#allocation48_spill] sm:$0xff] %v4205_v35  ;;  %v331_v37 = vld [vmem:[%s3914_s18 + $0x148] sm:$0xff]  ;;  %v4225_v53 = vld [vmem:[%s6896_s0 + $0x150] sm:$0xff] }
  0x47   : > { %7044 = vst [vmem:[#allocation51_spill] sm:$0xff] %v4225_v53 }
  0x48   : > { %416 = vadd.xlane.f32.xlu1 %v353_v48  ;;  %414 = vadd.xlane.f32.xlu0 %v352_v49  ;;  %v369_v48 = vmul.f32 %v321_v43, %v4135_v42  ;;  %v368_v49 = vmul.f32 %v320_v47, %v4141_v45  ;;  %v379_v43 = vmul.f32 %v331_v37, %v4205_v35  ;;  %v3271_v37 = vld [vmem:[%s3914_s18 + $0x188] sm:$0xff] }
  0x4c   : > { %420 = vadd.xlane.f32.xlu1 %v355_v54  ;;  %418 = vadd.xlane.f32.xlu0 %v354_v55  ;;  %v4155_v54 = vld [vmem:[%s6896_s0 + $0x100] sm:$0xff] }
  0x4d   : > { %7034 = vst [vmem:[#allocation41_spill] sm:$0xff] %v4155_v54  ;;  %v322_v55 = vld [vmem:[%s3914_s18 + $0x100] sm:$0xff] }
  0x4e   : > { %v370_v59 = vmul.f32 %v322_v55, %v4155_v54  ;;  %v332_v55 = vld [vmem:[%s3914_s18 + $0x150] sm:$0xff] }
  0x50   : > { %424 = vadd.xlane.f32.xlu1 %v357_v60  ;;  %422 = vadd.xlane.f32.xlu0 %v356_v61  ;;  %v4163_v60 = vld [vmem:[%s6896_s0 + $0x118] sm:$0xff] }
  0x51   : > { %7035 = vst [vmem:[#allocation42_spill] sm:$0xff] %v4163_v60  ;;  %v325_v61 = vld [vmem:[%s3914_s18 + $0x118] sm:$0xff] }
  0x54   : > { %428 = vadd.xlane.f32.xlu1 %v359_v3  ;;  %426 = vadd.xlane.f32.xlu0 %v358_v5  ;;  %v373_v3 = vmul.f32 %v325_v61, %v4163_v60  ;;  %v372_v5 = vmul.f32 %v324_v1, %v4169_v63  ;;  %v4233_v61 = vld [vmem:[%s6896_s0 + $0x168] sm:$0xff] }
  0x55   : > { %7045 = vst [vmem:[#allocation52_spill] sm:$0xff] %v4233_v61  ;;  %v335_v1 = vld [vmem:[%s3914_s18 + $0x168] sm:$0xff] }
  0x56   : > { %v383_v11 = vmul.f32 %v335_v1, %v4233_v61  ;;  %v3275_v1 = vld [vmem:[%s3914_s18 + $0x1a8] sm:$0xff] }
  0x58   : > { %432 = vadd.xlane.f32.xlu1 %v361_v12  ;;  %430 = vadd.xlane.f32.xlu0 %v360_v13  ;;  %v4183_v12 = vld [vmem:[%s6896_s0 + $0x120] sm:$0xff] }
  0x59   : > { %7038 = vst [vmem:[#allocation45_spill] sm:$0xff] %v4183_v12  ;;  %v326_v13 = vld [vmem:[%s3914_s18 + $0x120] sm:$0xff] }
  0x5a   : > { %v374_v19 = vmul.f32 %v326_v13, %v4183_v12 }
  0x5c   : > { %436 = vadd.xlane.f32.xlu1 %v363_v21  ;;  %434 = vadd.xlane.f32.xlu0 %v362_v23  ;;  %v4191_v21 = vld [vmem:[%s6896_s0 + $0x138] sm:$0xff] }
  0x5d   : > { %7039 = vst [vmem:[#allocation46_spill] sm:$0xff] %v4191_v21  ;;  %v329_v23 = vld [vmem:[%s3914_s18 + $0x138] sm:$0xff] }
  0x60   : > { %440 = vadd.xlane.f32.xlu1 %v365_v30  ;;  %438 = vadd.xlane.f32.xlu0 %v364_v31  ;;  %v377_v30 = vmul.f32 %v329_v23, %v4191_v21  ;;  %v376_v31 = vmul.f32 %v328_v29, %v4197_v25  ;;  %v4253_v23 = vld [vmem:[%s6896_s0 + $0x170] sm:$0xff]  ;;  %v3314_v25 = vld [vmem:[%s3914_s18 + $0x2e0] sm:$0xff] }
  0x61   : > { %7048 = vst [vmem:[#allocation55_spill] sm:$0xff] %v4253_v23  ;;  %v336_v29 = vld [vmem:[%s3914_s18 + $0x170] sm:$0xff] }
  0x64   : > { %444 = vadd.xlane.f32.xlu1 %v367_v39  ;;  %442 = vadd.xlane.f32.xlu0 %v366_v41  ;;  %v4211_v39 = vld [vmem:[%s6896_s0 + $0x140] sm:$0xff] }
  0x65   : > { %7042 = vst [vmem:[#allocation49_spill] sm:$0xff] %v4211_v39  ;;  %v330_v41 = vld [vmem:[%s3914_s18 + $0x140] sm:$0xff] }
  0x66   : > { %v378_v47 = vmul.f32 %v330_v41, %v4211_v39  ;;  %v3270_v41 = vld [vmem:[%s3914_s18 + $0x180] sm:$0xff] }
  0x68   : > { %448 = vadd.xlane.f32.xlu1 %v369_v48  ;;  %446 = vadd.xlane.f32.xlu0 %v368_v49  ;;  %v4219_v48 = vld [vmem:[%s6896_s0 + $0x158] sm:$0xff] }
  0x69   : > { %7043 = vst [vmem:[#allocation50_spill] sm:$0xff] %v4219_v48  ;;  %v333_v49 = vld [vmem:[%s3914_s18 + $0x158] sm:$0xff] }
  0x6c   : > { %452 = vadd.xlane.f32.xlu1 %v371_v57  ;;  %450 = vadd.xlane.f32.xlu0 %v370_v59  ;;  %v381_v57 = vmul.f32 %v333_v49, %v4219_v48  ;;  %v380_v59 = vmul.f32 %v332_v55, %v4225_v53  ;;  %v3273_v49 = vld [vmem:[%s3914_s18 + $0x198] sm:$0xff]  ;;  %v3272_v55 = vld [vmem:[%s3914_s18 + $0x190] sm:$0xff] }
  0x6d   : > { %v3341_v48 = vld [vmem:[%s3914_s18 + $0x3b8] sm:$0xff] }
  0x70   : > { %456 = vadd.xlane.f32.xlu1 %v373_v3  ;;  %454 = vadd.xlane.f32.xlu0 %v372_v5  ;;  %v4239_v3 = vld [vmem:[%s6896_s0 + $0x160] sm:$0xff] }
  0x71   : > { %7046 = vst [vmem:[#allocation53_spill] sm:$0xff] %v4239_v3  ;;  %v334_v5 = vld [vmem:[%s3914_s18 + $0x160] sm:$0xff] }
  0x72   : > { %v382_v13 = vmul.f32 %v334_v5, %v4239_v3  ;;  %v3274_v5 = vld [vmem:[%s3914_s18 + $0x1a0] sm:$0xff] }
  0x74   : > { %460 = vadd.xlane.f32.xlu1 %v375_v17  ;;  %458 = vadd.xlane.f32.xlu0 %v374_v19  ;;  %v4247_v17 = vld [vmem:[%s6896_s0 + $0x178] sm:$0xff] }
  0x75   : > { %7047 = vst [vmem:[#allocation54_spill] sm:$0xff] %v4247_v17  ;;  %v337_v19 = vld [vmem:[%s3914_s18 + $0x178] sm:$0xff] }
  0x78   : > { %464 = vadd.xlane.f32.xlu1 %v377_v30  ;;  %462 = vadd.xlane.f32.xlu0 %v376_v31  ;;  %v385_v30 = vmul.f32 %v337_v19, %v4247_v17  ;;  %v384_v31 = vmul.f32 %v336_v29, %v4253_v23  ;;  %v3277_v19 = vld [vmem:[%s3914_s18 + $0x1b8] sm:$0xff]  ;;  %v3276_v29 = vld [vmem:[%s3914_s18 + $0x1b0] sm:$0xff] }
  0x7c   : > { %468 = vadd.xlane.f32.xlu1 %v379_v43  ;;  %466 = vadd.xlane.f32.xlu0 %v378_v47  ;;  %v585_v43 = vmul.f32 %v3271_v37, %v3945_v10  ;;  %v584_v47 = vmul.f32 %v3270_v41, %v3931_v4  ;;  %v3318_v37 = vld [vmem:[%s3914_s18 + $0x300] sm:$0xff] }
  0x7d   : > { %v3278_v41 = vld [vmem:[%s3914_s18 + $0x1c0] sm:$0xff] }
  0x80   : > { %472 = vadd.xlane.f32.xlu1 %v381_v57  ;;  %470 = vadd.xlane.f32.xlu0 %v380_v59  ;;  %v587_v57 = vmul.f32 %v3273_v49, %v3938_v7  ;;  %v586_v59 = vmul.f32 %v3272_v55, %v3925_v2  ;;  %v3366_v49 = vld [vmem:[%s3914_s18 + $0x480] sm:$0xff]  ;;  %v3319_v55 = vld [vmem:[%s3914_s18 + $0x308] sm:$0xff] }
  0x84   : > { %476 = vadd.xlane.f32.xlu1 %v383_v11  ;;  %474 = vadd.xlane.f32.xlu0 %v382_v13  ;;  %v589_v11 = vmul.f32 %v3275_v1, %v3953_v14  ;;  %v588_v13 = vmul.f32 %v3274_v5, %v3959_v16  ;;  %v3320_v1 = vld [vmem:[%s3914_s18 + $0x310] sm:$0xff]  ;;  %v3367_v5 = vld [vmem:[%s3914_s18 + $0x488] sm:$0xff] }
  0x88   : > { %480 = vadd.xlane.f32.xlu1 %v385_v30  ;;  %478 = vadd.xlane.f32.xlu0 %v384_v31  ;;  %v591_v30 = vmul.f32 %v3277_v19, %v3967_v20  ;;  %v590_v31 = vmul.f32 %v3276_v29, %v3973_v22  ;;  %v3415_v19 = vld [vmem:[%s3914_s18 + $0x608] sm:$0xff]  ;;  %v3414_v29 = vld [vmem:[%s3914_s18 + $0x600] sm:$0xff] }
  0x8c   : > { %634 = vadd.xlane.f32.xlu1 %v585_v43  ;;  %632 = vadd.xlane.f32.xlu0 %v584_v47  ;;  %v830_v43 = vmul.f32 %v3318_v37, %v3931_v4  ;;  %v592_v47 = vmul.f32 %v3278_v41, %v3987_v28  ;;  %v3321_v37 = vld [vmem:[%s3914_s18 + $0x318] sm:$0xff]  ;;  %v3368_v41 = vld [vmem:[%s3914_s18 + $0x490] sm:$0xff] }
  0x90   : > { %638 = vadd.xlane.f32.xlu1 %v587_v57  ;;  %636 = vadd.xlane.f32.xlu0 %v586_v59  ;;  %v1076_v57 = vmul.f32 %v3366_v49, %v3931_v4  ;;  %v831_v59 = vmul.f32 %v3319_v55, %v3945_v10  ;;  %v3369_v49 = vld [vmem:[%s3914_s18 + $0x498] sm:$0xff]  ;;  %v3416_v55 = vld [vmem:[%s3914_s18 + $0x610] sm:$0xff] }
  0x94   : > { %642 = vadd.xlane.f32.xlu1 %v589_v11  ;;  %640 = vadd.xlane.f32.xlu0 %v588_v13  ;;  %v832_v11 = vmul.f32 %v3320_v1, %v3925_v2  ;;  %v1077_v13 = vmul.f32 %v3367_v5, %v3945_v10  ;;  %v3417_v1 = vld [vmem:[%s3914_s18 + $0x618] sm:$0xff]  ;;  %v3322_v5 = vld [vmem:[%s3914_s18 + $0x320] sm:$0xff] }
  0x98   : > { %646 = vadd.xlane.f32.xlu1 %v591_v30  ;;  %644 = vadd.xlane.f32.xlu0 %v590_v31  ;;  %v1323_v30 = vmul.f32 %v3415_v19, %v3945_v10  ;;  %v1322_v31 = vmul.f32 %v3414_v29, %v3931_v4  ;;  %v3323_v19 = vld [vmem:[%s3914_s18 + $0x328] sm:$0xff]  ;;  %v3370_v29 = vld [vmem:[%s3914_s18 + $0x4a0] sm:$0xff]  ;;  %v2257_v4 = vld [vmem:[#allocation4 + $0x30] sm:$0xff] }
  0x9c   : > { %878 = vadd.xlane.f32.xlu1 %v830_v43  ;;  %648 = vadd.xlane.f32.xlu0 %v592_v47  ;;  %v833_v43 = vmul.f32 %v3321_v37, %v3938_v7  ;;  %v1078_v47 = vmul.f32 %v3368_v41, %v3925_v2  ;;  %v3371_v37 = vld [vmem:[%s3914_s18 + $0x4a8] sm:$0xff]  ;;  %v3418_v41 = vld [vmem:[%s3914_s18 + $0x620] sm:$0xff] }
  0xa0   : > { %1124 = vadd.xlane.f32.xlu1 %v1076_v57  ;;  %880 = vadd.xlane.f32.xlu0 %v831_v59  ;;  %v1079_v57 = vmul.f32 %v3369_v49, %v3938_v7  ;;  %v1324_v59 = vmul.f32 %v3416_v55, %v3925_v2  ;;  %v1326_v49 = vmul.f32 %v3418_v41, %v3959_v16  ;;  %v3419_v55 = vld [vmem:[%s3914_s18 + $0x628] sm:$0xff] }
  0xa1   : > { %v2255_v2 = vld [vmem:[#allocation4 + $0x20] sm:$0xff] }
  0xa4   : > { %882 = vadd.xlane.f32.xlu1 %v832_v11  ;;  %1126 = vadd.xlane.f32.xlu0 %v1077_v13  ;;  %v1325_v11 = vmul.f32 %v3417_v1, %v3938_v7  ;;  %v834_v13 = vmul.f32 %v3322_v5, %v3959_v16  ;;  %v1327_v1 = vmul.f32 %v3419_v55, %v3953_v14  ;;  %v3373_v55 = vld [vmem:[%s3914_s18 + $0x4b8] sm:$0xff] }
  0xa5   : > { %v2253_v7 = vld [vmem:[#allocation4 + $0x10] sm:$0xff] }
  0xa8   : > { %1372 = vadd.xlane.f32.xlu1 %v1323_v30  ;;  %1370 = vadd.xlane.f32.xlu0 %v1322_v31  ;;  %v835_v30 = vmul.f32 %v3323_v19, %v3953_v14  ;;  %v1080_v31 = vmul.f32 %v3370_v29, %v3959_v16  ;;  %v3372_v29 = vld [vmem:[%s3914_s18 + $0x4b0] sm:$0xff] }
  0xac   : > { %884 = vadd.xlane.f32.xlu1 %v833_v43  ;;  %1128 = vadd.xlane.f32.xlu0 %v1078_v47  ;;  %v1081_v43 = vmul.f32 %v3371_v37, %v3953_v14 }
  0xb0   : > { %1130 = vadd.xlane.f32.xlu1 %v1079_v57  ;;  %1374 = vadd.xlane.f32.xlu0 %v1324_v59  ;;  %v3324_v59 = vld [vmem:[%s3914_s18 + $0x330] sm:$0xff] }
  0xb4   : > { %1376 = vadd.xlane.f32.xlu1 %v1325_v11  ;;  %886 = vadd.xlane.f32.xlu0 %v834_v13  ;;  %v836_v11 = vmul.f32 %v3324_v59, %v3973_v22  ;;  %v3325_v13 = vld [vmem:[%s3914_s18 + $0x338] sm:$0xff]  ;;  %v1083_v59 = vmul.f32 %v3373_v55, %v3967_v20 }
  0xb8   : > { %888 = vadd.xlane.f32.xlu1 %v835_v30  ;;  %1132 = vadd.xlane.f32.xlu0 %v1080_v31  ;;  %v837_v31 = vmul.f32 %v3325_v13, %v3967_v20 }
  0xb9   : > { %v391_v47 = vpop.xlane.xlu1 %390  ;;  %v387_v57 = vpop.xlane.xlu0 %386 }
  0xbc   : > { %1134 = vadd.xlane.f32.xlu1 %v1081_v43  ;;  %1378 = vadd.xlane.f32.xlu0 %v1326_v49  ;;  %v1082_v43 = vmul.f32 %v3372_v29, %v3973_v22  ;;  %v3420_v49 = vld [vmem:[%s3914_s18 + $0x630] sm:$0xff] }
  0xbd   : > { %v393_v5 = vpop.xlane.xlu1 %392  ;;  %v389_v19 = vpop.xlane.xlu0 %388 }
  0xbe   : > { %v482_v30 = vadd.f32 %v389_v19, %v387_v57 }
  0xc0   : > { %1380 = vadd.xlane.f32.xlu1 %v1327_v1  ;;  %v483_v37 = vadd.f32 %v482_v30, %v391_v47  ;;  %890 = vadd.xlane.f32.xlu0 %v836_v11  ;;  %v1328_v1 = vmul.f32 %v3420_v49, %v3973_v22  ;;  %v3421_v47 = vld [vmem:[%s3914_s18 + $0x638] sm:$0xff]  ;;  %v3326_v11 = vld [vmem:[%s3914_s18 + $0x340] sm:$0xff] }
  0xc1   : > { %v397_v41 = vpop.xlane.xlu1 %396  ;;  %v395_v17 = vpop.xlane.xlu0 %394  ;;  %v1329_v29 = vmul.f32 %v3421_v47, %v3967_v20 }
  0xc2   : > { %v484_v23 = vadd.f32 %v483_v37, %v393_v5  ;;  %v3279_v37 = vld [vmem:[%s3914_s18 + $0x1c8] sm:$0xff] }
  0xc4   : > { %892 = vadd.xlane.f32.xlu1 %v837_v31  ;;  %v485_v61 = vadd.f32 %v484_v23, %v395_v17  ;;  %1136 = vadd.xlane.f32.xlu0 %v1082_v43  ;;  %v838_v31 = vmul.f32 %v3326_v11, %v3987_v28  ;;  %v3374_v17 = vld [vmem:[%s3914_s18 + $0x4c0] sm:$0xff] }
  0xc5   : > { %v401_v57 = vpop.xlane.xlu1 %400  ;;  %v399_v13 = vpop.xlane.xlu0 %398  ;;  %v1084_v55 = vmul.f32 %v3374_v17, %v3987_v28 }
  0xc6   : > { %v486_v19 = vadd.f32 %v485_v61, %v397_v41  ;;  %v593_v41 = vmul.f32 %v3279_v37, %v3981_v26 }
  0xc8   : > { %1138 = vadd.xlane.f32.xlu1 %v1083_v59  ;;  %v487_v30 = vadd.f32 %v486_v19, %v399_v13  ;;  %1382 = vadd.xlane.f32.xlu0 %v1328_v1  ;;  %v3422_v59 = vld [vmem:[%s3914_s18 + $0x640] sm:$0xff]  ;;  %v3327_v1 = vld [vmem:[%s3914_s18 + $0x348] sm:$0xff] }
  0xc9   : > { %v405_v5 = vpop.xlane.xlu1 %404  ;;  %v403_v23 = vpop.xlane.xlu0 %402  ;;  %v1330_v11 = vmul.f32 %v3422_v59, %v3987_v28  ;;  %v1583_v28 = vld [vmem:[%s3919_s21 + $0x170] sm:$0xff] }
  0xca   : > { %v488_v43 = vadd.f32 %v487_v30, %v401_v57  ;;  %v3375_v30 = vld [vmem:[%s3914_s18 + $0x4c8] sm:$0xff] }
  0xcb   : > { %v1085_v37 = vmul.f32 %v3375_v30, %v3981_v26 }
  0xcc   : > { %1384 = vadd.xlane.f32.xlu1 %v1329_v29  ;;  %v489_v49 = vadd.f32 %v488_v43, %v403_v23  ;;  %894 = vadd.xlane.f32.xlu0 %v838_v31  ;;  %v839_v29 = vmul.f32 %v3327_v1, %v3981_v26  ;;  %v3280_v31 = vld [vmem:[%s3914_s18 + $0x1d0] sm:$0xff] }
  0xcd   : > { %v409_v61 = vpop.xlane.xlu1 %408  ;;  %v407_v47 = vpop.xlane.xlu0 %406 }
  0xce   : > { %v490_v13 = vadd.f32 %v489_v49, %v405_v5  ;;  %v3423_v49 = vld [vmem:[%s3914_s18 + $0x648] sm:$0xff] }
  0xcf   : > { %v1331_v1 = vmul.f32 %v3423_v49, %v3981_v26 }
  0xd0   : > { %1140 = vadd.xlane.f32.xlu1 %v1084_v55  ;;  %v491_v19 = vadd.f32 %v490_v13, %v407_v47  ;;  %650 = vadd.xlane.f32.xlu0 %v593_v41  ;;  %v594_v55 = vmul.f32 %v3280_v31, %v4001_v34  ;;  %v3328_v41 = vld [vmem:[%s3914_s18 + $0x350] sm:$0xff] }
  0xd1   : > { %v413_v57 = vpop.xlane.xlu1 %412  ;;  %v411_v17 = vpop.xlane.xlu0 %410 }
  0xd2   : > { %v492_v23 = vadd.f32 %v491_v19, %v409_v61  ;;  %v3376_v19 = vld [vmem:[%s3914_s18 + $0x4d0] sm:$0xff] }
  0xd3   : > { %v1086_v31 = vmul.f32 %v3376_v19, %v4001_v34 }
  0xd4   : > { %1386 = vadd.xlane.f32.xlu1 %v1330_v11  ;;  %v493_v43 = vadd.f32 %v492_v23, %v411_v17  ;;  %896 = vadd.xlane.f32.xlu0 %v839_v29  ;;  %v840_v11 = vmul.f32 %v3328_v41, %v4001_v34  ;;  %v3281_v29 = vld [vmem:[%s3914_s18 + $0x1d8] sm:$0xff] }
  0xd5   : > { %v417_v5 = vpop.xlane.xlu1 %416  ;;  %v415_v59 = vpop.xlane.xlu0 %414 }
  0xd6   : > { %v494_v47 = vadd.f32 %v493_v43, %v413_v57  ;;  %v3424_v43 = vld [vmem:[%s3914_s18 + $0x650] sm:$0xff] }
  0xd7   : > { %v1332_v41 = vmul.f32 %v3424_v43, %v4001_v34 }
  0xd8   : > { %1142 = vadd.xlane.f32.xlu1 %v1085_v37  ;;  %v495_v13 = vadd.f32 %v494_v47, %v415_v59  ;;  %652 = vadd.xlane.f32.xlu0 %v594_v55  ;;  %v595_v37 = vmul.f32 %v3281_v29, %v3995_v32  ;;  %v3329_v55 = vld [vmem:[%s3914_s18 + $0x358] sm:$0xff] }
  0xd9   : > { %v421_v61 = vpop.xlane.xlu1 %420  ;;  %v419_v30 = vpop.xlane.xlu0 %418 }
  0xda   : > { %v496_v17 = vadd.f32 %v495_v13, %v417_v5  ;;  %v3377_v13 = vld [vmem:[%s3914_s18 + $0x4d8] sm:$0xff] }
  0xdb   : > { %v1087_v29 = vmul.f32 %v3377_v13, %v3995_v32 }
  0xdc   : > { %1388 = vadd.xlane.f32.xlu1 %v1331_v1  ;;  %v497_v23 = vadd.f32 %v496_v17, %v419_v30  ;;  %898 = vadd.xlane.f32.xlu0 %v840_v11  ;;  %v841_v1 = vmul.f32 %v3329_v55, %v3995_v32  ;;  %v3282_v11 = vld [vmem:[%s3914_s18 + $0x1e0] sm:$0xff] }
  0xdd   : > { %v425_v57 = vpop.xlane.xlu1 %424  ;;  %v423_v49 = vpop.xlane.xlu0 %422 }
  0xde   : > { %v498_v59 = vadd.f32 %v497_v23, %v421_v61  ;;  %v3425_v23 = vld [vmem:[%s3914_s18 + $0x658] sm:$0xff] }
  0xdf   : > { %v1333_v55 = vmul.f32 %v3425_v23, %v3995_v32 }
  0xe0   : > { %1144 = vadd.xlane.f32.xlu1 %v1086_v31  ;;  %v499_v47 = vadd.f32 %v498_v59, %v423_v49  ;;  %654 = vadd.xlane.f32.xlu0 %v595_v37  ;;  %v596_v31 = vmul.f32 %v3282_v11, %v4015_v40  ;;  %v3330_v37 = vld [vmem:[%s3914_s18 + $0x360] sm:$0xff] }
  0xe1   : > { %v429_v5 = vpop.xlane.xlu1 %428  ;;  %v427_v19 = vpop.xlane.xlu0 %426 }
  0xe2   : > { %v500_v30 = vadd.f32 %v499_v47, %v425_v57  ;;  %v3378_v47 = vld [vmem:[%s3914_s18 + $0x4e0] sm:$0xff] }
  0xe3   : > { %v1088_v11 = vmul.f32 %v3378_v47, %v4015_v40 }
  0xe4   : > { %1390 = vadd.xlane.f32.xlu1 %v1332_v41  ;;  %v501_v17 = vadd.f32 %v500_v30, %v427_v19  ;;  %900 = vadd.xlane.f32.xlu0 %v841_v1  ;;  %v842_v41 = vmul.f32 %v3330_v37, %v4015_v40  ;;  %v3283_v1 = vld [vmem:[%s3914_s18 + $0x1e8] sm:$0xff] }
  0xe5   : > { %v433_v61 = vpop.xlane.xlu1 %432  ;;  %v431_v43 = vpop.xlane.xlu0 %430 }
  0xe6   : > { %v502_v49 = vadd.f32 %v501_v17, %v429_v5  ;;  %v3426_v17 = vld [vmem:[%s3914_s18 + $0x660] sm:$0xff] }
  0xe7   : > { %v1334_v37 = vmul.f32 %v3426_v17, %v4015_v40 }
  0xe8   : > { %1146 = vadd.xlane.f32.xlu1 %v1087_v29  ;;  %v503_v59 = vadd.f32 %v502_v49, %v431_v43  ;;  %656 = vadd.xlane.f32.xlu0 %v596_v31  ;;  %v597_v29 = vmul.f32 %v3283_v1, %v4009_v38  ;;  %v3331_v31 = vld [vmem:[%s3914_s18 + $0x368] sm:$0xff] }
  0xe9   : > { %v437_v57 = vpop.xlane.xlu1 %436  ;;  %v435_v13 = vpop.xlane.xlu0 %434 }
  0xea   : > { %v504_v19 = vadd.f32 %v503_v59, %v433_v61  ;;  %v3379_v59 = vld [vmem:[%s3914_s18 + $0x4e8] sm:$0xff] }
  0xeb   : > { %v1089_v1 = vmul.f32 %v3379_v59, %v4009_v38 }
  0xec   : > { %1392 = vadd.xlane.f32.xlu1 %v1333_v55  ;;  %v505_v30 = vadd.f32 %v504_v19, %v435_v13  ;;  %902 = vadd.xlane.f32.xlu0 %v842_v41  ;;  %v843_v55 = vmul.f32 %v3331_v31, %v4009_v38  ;;  %v3284_v41 = vld [vmem:[%s3914_s18 + $0x1f0] sm:$0xff] }
  0xed   : > { %v441_v5 = vpop.xlane.xlu1 %440  ;;  %v439_v23 = vpop.xlane.xlu0 %438 }
  0xee   : > { %v506_v43 = vadd.f32 %v505_v30, %v437_v57  ;;  %v3427_v30 = vld [vmem:[%s3914_s18 + $0x668] sm:$0xff] }
  0xef   : > { %v1335_v31 = vmul.f32 %v3427_v30, %v4009_v38 }
  0xf0   : > { %1148 = vadd.xlane.f32.xlu1 %v1088_v11  ;;  %v507_v49 = vadd.f32 %v506_v43, %v439_v23  ;;  %658 = vadd.xlane.f32.xlu0 %v597_v29  ;;  %v598_v11 = vmul.f32 %v3284_v41, %v4029_v46  ;;  %v3332_v29 = vld [vmem:[%s3914_s18 + $0x370] sm:$0xff] }
  0xf1   : > { %v445_v61 = vpop.xlane.xlu1 %444  ;;  %v443_v47 = vpop.xlane.xlu0 %442 }
  0xf2   : > { %v508_v13 = vadd.f32 %v507_v49, %v441_v5  ;;  %v3380_v49 = vld [vmem:[%s3914_s18 + $0x4f0] sm:$0xff] }
  0xf3   : > { %v1090_v41 = vmul.f32 %v3380_v49, %v4029_v46 }
  0xf4   : > { %1394 = vadd.xlane.f32.xlu1 %v1334_v37  ;;  %v509_v19 = vadd.f32 %v508_v13, %v443_v47  ;;  %904 = vadd.xlane.f32.xlu0 %v843_v55  ;;  %v844_v37 = vmul.f32 %v3332_v29, %v4029_v46  ;;  %v3285_v55 = vld [vmem:[%s3914_s18 + $0x1f8] sm:$0xff] }
  0xf5   : > { %v449_v57 = vpop.xlane.xlu1 %448  ;;  %v447_v17 = vpop.xlane.xlu0 %446 }
  0xf6   : > { %v510_v23 = vadd.f32 %v509_v19, %v445_v61  ;;  %v3428_v19 = vld [vmem:[%s3914_s18 + $0x670] sm:$0xff] }
  0xf7   : > { %v1336_v29 = vmul.f32 %v3428_v19, %v4029_v46 }
  0xf8   : > { %1150 = vadd.xlane.f32.xlu1 %v1089_v1  ;;  %v511_v43 = vadd.f32 %v510_v23, %v447_v17  ;;  %660 = vadd.xlane.f32.xlu0 %v598_v11  ;;  %v599_v1 = vmul.f32 %v3285_v55, %v4023_v44  ;;  %v3333_v11 = vld [vmem:[%s3914_s18 + $0x378] sm:$0xff] }
  0xf9   : > { %v453_v5 = vpop.xlane.xlu1 %452  ;;  %v451_v59 = vpop.xlane.xlu0 %450 }
  0xfa   : > { %v512_v47 = vadd.f32 %v511_v43, %v449_v57  ;;  %v3381_v43 = vld [vmem:[%s3914_s18 + $0x4f8] sm:$0xff] }
  0xfb   : > { %v1091_v55 = vmul.f32 %v3381_v43, %v4023_v44 }
  0xfc   : > { %1396 = vadd.xlane.f32.xlu1 %v1335_v31  ;;  %v513_v13 = vadd.f32 %v512_v47, %v451_v59  ;;  %906 = vadd.xlane.f32.xlu0 %v844_v37  ;;  %v845_v31 = vmul.f32 %v3333_v11, %v4023_v44  ;;  %v3286_v37 = vld [vmem:[%s3914_s18 + $0x200] sm:$0xff] }
  0xfd   : > { %v457_v61 = vpop.xlane.xlu1 %456  ;;  %v455_v30 = vpop.xlane.xlu0 %454 }
  0xfe   : > { %v514_v17 = vadd.f32 %v513_v13, %v453_v5  ;;  %v3429_v13 = vld [vmem:[%s3914_s18 + $0x678] sm:$0xff] }
  0xff   : > { %v1337_v11 = vmul.f32 %v3429_v13, %v4023_v44 }
 0x100   : > { %1152 = vadd.xlane.f32.xlu1 %v1090_v41  ;;  %v515_v23 = vadd.f32 %v514_v17, %v455_v30  ;;  %662 = vadd.xlane.f32.xlu0 %v599_v1  ;;  %v600_v41 = vmul.f32 %v3286_v37, %v4043_v52  ;;  %v3334_v1 = vld [vmem:[%s3914_s18 + $0x380] sm:$0xff] }
 0x101   : > { %v461_v57 = vpop.xlane.xlu1 %460  ;;  %v459_v49 = vpop.xlane.xlu0 %458 }
 0x102   : > { %v516_v59 = vadd.f32 %v515_v23, %v457_v61  ;;  %v3382_v23 = vld [vmem:[%s3914_s18 + $0x500] sm:$0xff] }
 0x103   : > { %v1092_v37 = vmul.f32 %v3382_v23, %v4043_v52 }
 0x104   : > { %1398 = vadd.xlane.f32.xlu1 %v1336_v29  ;;  %v517_v47 = vadd.f32 %v516_v59, %v459_v49  ;;  %908 = vadd.xlane.f32.xlu0 %v845_v31  ;;  %v846_v29 = vmul.f32 %v3334_v1, %v4043_v52  ;;  %v3287_v31 = vld [vmem:[%s3914_s18 + $0x208] sm:$0xff] }
 0x105   : > { %v465_v5 = vpop.xlane.xlu1 %464  ;;  %v463_v19 = vpop.xlane.xlu0 %462 }
 0x106   : > { %v518_v30 = vadd.f32 %v517_v47, %v461_v57  ;;  %v3430_v47 = vld [vmem:[%s3914_s18 + $0x680] sm:$0xff] }
 0x107   : > { %v1338_v1 = vmul.f32 %v3430_v47, %v4043_v52 }
 0x108   : > { %1154 = vadd.xlane.f32.xlu1 %v1091_v55  ;;  %v519_v17 = vadd.f32 %v518_v30, %v463_v19  ;;  %664 = vadd.xlane.f32.xlu0 %v600_v41  ;;  %v601_v55 = vmul.f32 %v3287_v31, %v4037_v50  ;;  %v3335_v41 = vld [vmem:[%s3914_s18 + $0x388] sm:$0xff] }
 0x109   : > { %v469_v61 = vpop.xlane.xlu1 %468  ;;  %v467_v43 = vpop.xlane.xlu0 %466 }
 0x10a   : > { %v520_v49 = vadd.f32 %v519_v17, %v465_v5  ;;  %v3383_v17 = vld [vmem:[%s3914_s18 + $0x508] sm:$0xff] }
 0x10b   : > { %v1093_v31 = vmul.f32 %v3383_v17, %v4037_v50 }
 0x10c   : > { %1400 = vadd.xlane.f32.xlu1 %v1337_v11  ;;  %v521_v59 = vadd.f32 %v520_v49, %v467_v43  ;;  %910 = vadd.xlane.f32.xlu0 %v846_v29  ;;  %v847_v11 = vmul.f32 %v3335_v41, %v4037_v50  ;;  %v3288_v29 = vld [vmem:[%s3914_s18 + $0x210] sm:$0xff] }
 0x10d   : > { %v473_v57 = vpop.xlane.xlu1 %472  ;;  %v471_v13 = vpop.xlane.xlu0 %470 }
 0x10e   : > { %v522_v19 = vadd.f32 %v521_v59, %v469_v61  ;;  %v3431_v59 = vld [vmem:[%s3914_s18 + $0x688] sm:$0xff] }
 0x10f   : > { %v1339_v41 = vmul.f32 %v3431_v59, %v4037_v50  ;;  %v3337_v59 = vld [vmem:[%s3914_s18 + $0x398] sm:$0xff] }
 0x110   : > { %1156 = vadd.xlane.f32.xlu1 %v1092_v37  ;;  %v523_v30 = vadd.f32 %v522_v19, %v471_v13  ;;  %666 = vadd.xlane.f32.xlu0 %v601_v55  ;;  %v602_v37 = vmul.f32 %v3288_v29, %v4057_v58  ;;  %v3336_v55 = vld [vmem:[%s3914_s18 + $0x390] sm:$0xff] }
 0x111   : > { %v477_v5 = vpop.xlane.xlu1 %476  ;;  %v475_v23 = vpop.xlane.xlu0 %474 }
 0x112   : > { %v524_v43 = vadd.f32 %v523_v30, %v473_v57  ;;  %v3384_v30 = vld [vmem:[%s3914_s18 + $0x510] sm:$0xff] }
 0x114   : > { %1402 = vadd.xlane.f32.xlu1 %v1338_v1  ;;  %v525_v49 = vadd.f32 %v524_v43, %v475_v23  ;;  %912 = vadd.xlane.f32.xlu0 %v847_v11  ;;  %v848_v1 = vmul.f32 %v3336_v55, %v4057_v58  ;;  %v3289_v11 = vld [vmem:[%s3914_s18 + $0x218] sm:$0xff] }
 0x115   : > { %v481_v61 = vpop.xlane.xlu1 %480  ;;  %v479_v47 = vpop.xlane.xlu0 %478 }
 0x116   : > { %v526_v13 = vadd.f32 %v525_v49, %v477_v5  ;;  %v1094_v5 = vmul.f32 %v3384_v30, %v4057_v58  ;;  %v3432_v49 = vld [vmem:[%s3914_s18 + $0x690] sm:$0xff] }
 0x117   : > { %v1340_v55 = vmul.f32 %v3432_v49, %v4057_v58 }
 0x118   : > { %1158 = vadd.xlane.f32.xlu1 %v1093_v31  ;;  %v527_v19 = vadd.f32 %v526_v13, %v479_v47  ;;  %668 = vadd.xlane.f32.xlu0 %v602_v37  ;;  %v603_v31 = vmul.f32 %v3289_v11, %v4051_v56 }
 0x119   : > { %v635_v57 = vpop.xlane.xlu1 %634  ;;  %v633_v17 = vpop.xlane.xlu0 %632 }
 0x11a   : > { %v4408_v23 = vadd.f32 %v527_v19, %v481_v61  ;;  %v728_v29 = vadd.f32 %v635_v57, %v633_v17  ;;  %v3385_v19 = vld [vmem:[%s3914_s18 + $0x518] sm:$0xff] }
 0x11b   : > { %v1095_v17 = vmul.f32 %v3385_v19, %v4051_v56 }
 0x11c   : > { %1404 = vadd.xlane.f32.xlu1 %v1339_v41  ;;  %914 = vadd.xlane.f32.xlu0 %v848_v1  ;;  %v849_v41 = vmul.f32 %v3337_v59, %v4051_v56  ;;  %v3290_v1 = vld [vmem:[%s3914_s18 + $0x220] sm:$0xff] }
 0x11d   : > { %v639_v43 = vpop.xlane.xlu1 %638  ;;  %v637_v37 = vpop.xlane.xlu0 %636 }
 0x11e   : > { %v729_v47 = vadd.f32 %v728_v29, %v637_v37 }
 0x120   : > { %1160 = vadd.xlane.f32.xlu1 %v1094_v5  ;;  %v730_v61 = vadd.f32 %v729_v47, %v639_v43  ;;  %670 = vadd.xlane.f32.xlu0 %v603_v31  ;;  %v604_v5 = vmul.f32 %v3290_v1, %v4071_v0  ;;  %v3433_v43 = vld [vmem:[%s3914_s18 + $0x698] sm:$0xff]  ;;  %v3338_v31 = vld [vmem:[%s3914_s18 + $0x3a0] sm:$0xff] }
 0x121   : > { %v643_v13 = vpop.xlane.xlu1 %642  ;;  %v641_v57 = vpop.xlane.xlu0 %640  ;;  %v1341_v59 = vmul.f32 %v3433_v43, %v4051_v56 }
 0x122   : > { %v731_v30 = vadd.f32 %v730_v61, %v641_v57  ;;  %v850_v61 = vmul.f32 %v3338_v31, %v4071_v0 }
 0x124   : > { %1406 = vadd.xlane.f32.xlu1 %v1340_v55  ;;  %v732_v11 = vadd.f32 %v731_v30, %v643_v13  ;;  %916 = vadd.xlane.f32.xlu0 %v849_v41  ;;  %v3386_v13 = vld [vmem:[%s3914_s18 + $0x520] sm:$0xff]  ;;  %v3291_v41 = vld [vmem:[%s3914_s18 + $0x228] sm:$0xff] }
 0x125   : > { %v647_v29 = vpop.xlane.xlu1 %646  ;;  %v645_v49 = vpop.xlane.xlu0 %644  ;;  %v1096_v1 = vmul.f32 %v3386_v13, %v4071_v0 }
 0x126   : > { %v733_v37 = vadd.f32 %v732_v11, %v645_v49  ;;  %v3434_v11 = vld [vmem:[%s3914_s18 + $0x6a0] sm:$0xff] }
 0x127   : > { %v1342_v49 = vmul.f32 %v3434_v11, %v4071_v0  ;;  %v3435_v11 = vld [vmem:[%s3914_s18 + $0x6a8] sm:$0xff] }
 0x128   : > { %1162 = vadd.xlane.f32.xlu1 %v1095_v17  ;;  %v734_v47 = vadd.f32 %v733_v37, %v647_v29  ;;  %672 = vadd.xlane.f32.xlu0 %v604_v5  ;;  %v605_v17 = vmul.f32 %v3291_v41, %v4065_v62  ;;  %v3339_v5 = vld [vmem:[%s3914_s18 + $0x3a8] sm:$0xff] }
 0x129   : > { %v879_v55 = vpop.xlane.xlu1 %878  ;;  %v649_v19 = vpop.xlane.xlu0 %648  ;;  %v851_v37 = vmul.f32 %v3339_v5, %v4065_v62  ;;  %v1343_v5 = vmul.f32 %v3435_v11, %v4065_v62  ;;  %v3436_v11 = vld [vmem:[%s3914_s18 + $0x6b0] sm:$0xff] }
 0x12a   : > { %v4426_v57 = vadd.f32 %v734_v47, %v649_v19 }
 0x12c   : > { %1408 = vadd.xlane.f32.xlu1 %v1341_v59  ;;  %918 = vadd.xlane.f32.xlu0 %v850_v61  ;;  %v3387_v59 = vld [vmem:[%s3914_s18 + $0x528] sm:$0xff]  ;;  %v3292_v61 = vld [vmem:[%s3914_s18 + $0x230] sm:$0xff] }
 0x12d   : > { %v1125_v30 = vpop.xlane.xlu1 %1124  ;;  %v881_v29 = vpop.xlane.xlu0 %880  ;;  %v1097_v41 = vmul.f32 %v3387_v59, %v4065_v62 }
 0x12e   : > { %v974_v43 = vadd.f32 %v881_v29, %v879_v55 }
 0x130   : > { %1164 = vadd.xlane.f32.xlu1 %v1096_v1  ;;  %674 = vadd.xlane.f32.xlu0 %v605_v17  ;;  %v606_v1 = vmul.f32 %v3292_v61, %v4085_v9  ;;  %v3340_v17 = vld [vmem:[%s3914_s18 + $0x3b0] sm:$0xff] }
 0x131   : > { %v883_v31 = vpop.xlane.xlu1 %882  ;;  %v1127_v13 = vpop.xlane.xlu0 %1126 }
 0x132   : > { %v975_v47 = vadd.f32 %v974_v43, %v883_v31  ;;  %v1220_v19 = vadd.f32 %v1127_v13, %v1125_v30  ;;  %v852_v30 = vmul.f32 %v3340_v17, %v4085_v9 }
 0x134   : > { %1410 = vadd.xlane.f32.xlu1 %v1342_v49  ;;  %920 = vadd.xlane.f32.xlu0 %v851_v37  ;;  %v3388_v49 = vld [vmem:[%s3914_s18 + $0x530] sm:$0xff]  ;;  %v3293_v37 = vld [vmem:[%s3914_s18 + $0x238] sm:$0xff] }
 0x135   : > { %v1373_v55 = vpop.xlane.xlu1 %1372  ;;  %v1371_v29 = vpop.xlane.xlu0 %1370  ;;  %v1098_v61 = vmul.f32 %v3388_v49, %v4085_v9 }
 0x136   : > { %v1466_v3 = vadd.f32 %v1373_v55, %v1371_v29 }
 0x138   : > { %1166 = vadd.xlane.f32.xlu1 %v1097_v41  ;;  %676 = vadd.xlane.f32.xlu0 %v606_v1  ;;  %v607_v41 = vmul.f32 %v3293_v37, %v4079_v6  ;;  %v3294_v37 = vld [vmem:[%s3914_s18 + $0x240] sm:$0xff] }
 0x139   : > { %v885_v43 = vpop.xlane.xlu1 %884  ;;  %v1129_v59 = vpop.xlane.xlu0 %1128 }
 0x13a   : > { %v976_v31 = vadd.f32 %v975_v47, %v885_v43  ;;  %v1221_v13 = vadd.f32 %v1220_v19, %v1129_v59  ;;  %v3704_v47 = vld [vmem:[%s6896_s0 + $0xb0] sm:$0xff] }
 0x13b   : > { %v1344_v19 = vmul.f32 %v3704_v47, %v3436_v11  ;;  %v3437_v11 = vld [vmem:[%s3914_s18 + $0x6b8] sm:$0xff] }
 0x13c   : > { %1412 = vadd.xlane.f32.xlu1 %v1343_v5  ;;  %922 = vadd.xlane.f32.xlu0 %v852_v30  ;;  %v3705_v5 = vld [vmem:[%s6896_s0 + $0xb8] sm:$0xff] }
 0x13d   : > { %v1131_v55 = vpop.xlane.xlu1 %1130  ;;  %v1375_v29 = vpop.xlane.xlu0 %1374  ;;  %v853_v43 = vmul.f32 %v3705_v5, %v3341_v48  ;;  %v3389_v30 = vld [vmem:[%s3914_s18 + $0x538] sm:$0xff]  ;;  %v3342_v48 = vld [vmem:[%s3914_s18 + $0x3c0] sm:$0xff] }
 0x13e   : > { %v1222_v1 = vadd.f32 %v1221_v13, %v1131_v55  ;;  %v1467_v53 = vadd.f32 %v1466_v3, %v1375_v29  ;;  %v1099_v13 = vmul.f32 %v3705_v5, %v3389_v30  ;;  %v3706_v55 = vld [vmem:[%s6896_s0 + $0xc0] sm:$0xff] }
 0x140   : > { %1168 = vadd.xlane.f32.xlu1 %v1098_v61  ;;  %678 = vadd.xlane.f32.xlu0 %v607_v41  ;;  %v608_v41 = vmul.f32 %v3706_v55, %v3294_v37 }
 0x141   : > { %v1377_v17 = vpop.xlane.xlu1 %1376  ;;  %v887_v59 = vpop.xlane.xlu0 %886 }
 0x142   : > { %v1468_v49 = vadd.f32 %v1467_v53, %v1377_v17  ;;  %v977_v3 = vadd.f32 %v976_v31, %v887_v59  ;;  %v1345_v53 = vmul.f32 %v3705_v5, %v3437_v11  ;;  %v3390_v17 = vld [vmem:[%s3914_s18 + $0x540] sm:$0xff]  ;;  %v3295_v59 = vld [vmem:[%s3914_s18 + $0x248] sm:$0xff] }
 0x143   : > { %v1100_v37 = vmul.f32 %v3706_v55, %v3390_v17  ;;  %v3343_v11 = vld [vmem:[%s3914_s18 + $0x3c8] sm:$0xff]  ;;  %v3296_v17 = vld [vmem:[%s3914_s18 + $0x250] sm:$0xff] }
 0x144   : > { %1414 = vadd.xlane.f32.xlu1 %v1344_v19  ;;  %924 = vadd.xlane.f32.xlu0 %v853_v43  ;;  %v854_v19 = vmul.f32 %v3706_v55, %v3342_v48 }
 0x145   : > { %v889_v61 = vpop.xlane.xlu1 %888  ;;  %v1133_v47 = vpop.xlane.xlu0 %1132 }
 0x146   : > { %v978_v29 = vadd.f32 %v977_v3, %v889_v61  ;;  %v1223_v35 = vadd.f32 %v1222_v1, %v1133_v47  ;;  %v3707_v1 = vld [vmem:[%s6896_s0 + $0xc8] sm:$0xff] }
 0x147   : > { %v609_v5 = vmul.f32 %v3707_v1, %v3295_v59  ;;  %v855_v48 = vmul.f32 %v3707_v1, %v3343_v11 }
 0x148   : > { %1170 = vadd.xlane.f32.xlu1 %v1099_v13  ;;  %680 = vadd.xlane.f32.xlu0 %v608_v41  ;;  %v3438_v13 = vld [vmem:[%s3914_s18 + $0x6c0] sm:$0xff] }
 0x149   : > { %v1135_v31 = vpop.xlane.xlu1 %1134  ;;  %v1379_v30 = vpop.xlane.xlu0 %1378 }
 0x14a   : > { %v1224_v43 = vadd.f32 %v1223_v35, %v1135_v31  ;;  %v1469_v39 = vadd.f32 %v1468_v49, %v1379_v30  ;;  %v1346_v35 = vmul.f32 %v3706_v55, %v3438_v13  ;;  %v3344_v13 = vld [vmem:[%s3914_s18 + $0x3d0] sm:$0xff] }
 0x14c   : > { %1416 = vadd.xlane.f32.xlu1 %v1345_v53  ;;  %926 = vadd.xlane.f32.xlu0 %v854_v19  ;;  %v3391_v53 = vld [vmem:[%s3914_s18 + $0x548] sm:$0xff] }
 0x14d   : > { %v1381_v3 = vpop.xlane.xlu1 %1380  ;;  %v891_v41 = vpop.xlane.xlu0 %890  ;;  %v1101_v59 = vmul.f32 %v3707_v1, %v3391_v53  ;;  %v3297_v53 = vld [vmem:[%s3914_s18 + $0x258] sm:$0xff] }
 0x14e   : > { %v1470_v61 = vadd.f32 %v1469_v39, %v1381_v3  ;;  %v979_v47 = vadd.f32 %v978_v29, %v891_v41  ;;  %v3708_v29 = vld [vmem:[%s6896_s0 + $0xd0] sm:$0xff] }
 0x14f   : > { %v610_v55 = vmul.f32 %v3708_v29, %v3296_v17 }
 0x150   : > { %1172 = vadd.xlane.f32.xlu1 %v1100_v37  ;;  %682 = vadd.xlane.f32.xlu0 %v609_v5  ;;  %v3439_v37 = vld [vmem:[%s3914_s18 + $0x6c8] sm:$0xff] }
 0x151   : > { %v893_v49 = vpop.xlane.xlu1 %892  ;;  %v1137_v19 = vpop.xlane.xlu0 %1136  ;;  %v1347_v11 = vmul.f32 %v3707_v1, %v3439_v37  ;;  %v3345_v37 = vld [vmem:[%s3914_s18 + $0x3d8] sm:$0xff] }
 0x152   : > { %v980_v31 = vadd.f32 %v979_v47, %v893_v49  ;;  %v1225_v30 = vadd.f32 %v1224_v43, %v1137_v19  ;;  %v856_v47 = vmul.f32 %v3708_v29, %v3344_v13 }
 0x154   : > { %1418 = vadd.xlane.f32.xlu1 %v1346_v35  ;;  %928 = vadd.xlane.f32.xlu0 %v855_v48  ;;  %v3392_v35 = vld [vmem:[%s3914_s18 + $0x550] sm:$0xff] }
 0x155   : > { %v1139_v39 = vpop.xlane.xlu1 %1138  ;;  %v1383_v5 = vpop.xlane.xlu0 %1382  ;;  %v1102_v17 = vmul.f32 %v3708_v29, %v3392_v35  ;;  %v3298_v35 = vld [vmem:[%s3914_s18 + $0x260] sm:$0xff] }
 0x156   : > { %v1226_v3 = vadd.f32 %v1225_v30, %v1139_v39  ;;  %v1471_v41 = vadd.f32 %v1470_v61, %v1383_v5  ;;  %v3709_v61 = vld [vmem:[%s6896_s0 + $0xd8] sm:$0xff] }
 0x157   : > { %v611_v1 = vmul.f32 %v3709_v61, %v3297_v53 }
 0x158   : > { %1174 = vadd.xlane.f32.xlu1 %v1101_v59  ;;  %684 = vadd.xlane.f32.xlu0 %v610_v55  ;;  %v3440_v59 = vld [vmem:[%s3914_s18 + $0x6d0] sm:$0xff] }
 0x159   : > { %v1385_v43 = vpop.xlane.xlu1 %1384  ;;  %v895_v48 = vpop.xlane.xlu0 %894 }
 0x15a   : > { %v1472_v49 = vadd.f32 %v1471_v41, %v1385_v43  ;;  %v981_v19 = vadd.f32 %v980_v31, %v895_v48  ;;  %v1348_v31 = vmul.f32 %v3708_v29, %v3440_v59  ;;  %v857_v41 = vmul.f32 %v3709_v61, %v3345_v37  ;;  %v3346_v59 = vld [vmem:[%s3914_s18 + $0x3e0] sm:$0xff] }
 0x15c   : > { %1420 = vadd.xlane.f32.xlu1 %v1347_v11  ;;  %930 = vadd.xlane.f32.xlu0 %v856_v47  ;;  %v3393_v11 = vld [vmem:[%s3914_s18 + $0x558] sm:$0xff] }
 0x15d   : > { %v1141_v30 = vpop.xlane.xlu1 %1140  ;;  %v651_v55 = vpop.xlane.xlu0 %650  ;;  %v1103_v53 = vmul.f32 %v3709_v61, %v3393_v11  ;;  %v3299_v11 = vld [vmem:[%s3914_s18 + $0x268] sm:$0xff] }
 0x15e   : > { %v1227_v39 = vadd.f32 %v1226_v3, %v1141_v30  ;;  %v736_v5 = vadd.f32 %v4426_v57, %v651_v55  ;;  %v3710_v57 = vld [vmem:[%s6896_s0 + $0xe0] sm:$0xff] }
 0x15f   : > { %v612_v29 = vmul.f32 %v3710_v57, %v3298_v35  ;;  %v858_v37 = vmul.f32 %v3710_v57, %v3346_v59 }
 0x160   : > { %1176 = vadd.xlane.f32.xlu1 %v1102_v17  ;;  %686 = vadd.xlane.f32.xlu0 %v611_v1  ;;  %v3441_v17 = vld [vmem:[%s3914_s18 + $0x6d8] sm:$0xff] }
 0x161   : > { %v1387_v13 = vpop.xlane.xlu1 %1386  ;;  %v897_v47 = vpop.xlane.xlu0 %896 }
 0x162   : > { %v1473_v43 = vadd.f32 %v1472_v49, %v1387_v13  ;;  %v982_v48 = vadd.f32 %v981_v19, %v897_v47  ;;  %v1349_v49 = vmul.f32 %v3709_v61, %v3441_v17  ;;  %v3347_v17 = vld [vmem:[%s3914_s18 + $0x3e8] sm:$0xff] }
 0x164   : > { %1422 = vadd.xlane.f32.xlu1 %v1348_v31  ;;  %932 = vadd.xlane.f32.xlu0 %v857_v41  ;;  %v3394_v31 = vld [vmem:[%s3914_s18 + $0x560] sm:$0xff] }
 0x165   : > { %v1143_v3 = vpop.xlane.xlu1 %1142  ;;  %v653_v1 = vpop.xlane.xlu0 %652  ;;  %v1104_v35 = vmul.f32 %v3710_v57, %v3394_v31  ;;  %v3300_v31 = vld [vmem:[%s3914_s18 + $0x270] sm:$0xff] }
 0x166   : > { %v1228_v30 = vadd.f32 %v1227_v39, %v1143_v3  ;;  %v737_v55 = vadd.f32 %v736_v5, %v653_v1  ;;  %v3711_v5 = vld [vmem:[%s6896_s0 + $0xe8] sm:$0xff] }
 0x167   : > { %v613_v61 = vmul.f32 %v3711_v5, %v3299_v11  ;;  %v859_v59 = vmul.f32 %v3711_v5, %v3347_v17 }
 0x168   : > { %1178 = vadd.xlane.f32.xlu1 %v1103_v53  ;;  %688 = vadd.xlane.f32.xlu0 %v612_v29  ;;  %v3442_v53 = vld [vmem:[%s3914_s18 + $0x6e0] sm:$0xff] }
 0x169   : > { %v1389_v19 = vpop.xlane.xlu1 %1388  ;;  %v899_v41 = vpop.xlane.xlu0 %898 }
 0x16a   : > { %v1474_v13 = vadd.f32 %v1473_v43, %v1389_v19  ;;  %v983_v47 = vadd.f32 %v982_v48, %v899_v41  ;;  %v1350_v43 = vmul.f32 %v3710_v57, %v3442_v53  ;;  %v3348_v53 = vld [vmem:[%s3914_s18 + $0x3f0] sm:$0xff] }
 0x16c   : > { %1424 = vadd.xlane.f32.xlu1 %v1349_v49  ;;  %934 = vadd.xlane.f32.xlu0 %v858_v37  ;;  %v3395_v49 = vld [vmem:[%s3914_s18 + $0x568] sm:$0xff] }
 0x16d   : > { %v1145_v39 = vpop.xlane.xlu1 %1144  ;;  %v655_v29 = vpop.xlane.xlu0 %654  ;;  %v1105_v11 = vmul.f32 %v3711_v5, %v3395_v49  ;;  %v3301_v49 = vld [vmem:[%s3914_s18 + $0x278] sm:$0xff] }
 0x16e   : > { %v1229_v3 = vadd.f32 %v1228_v30, %v1145_v39  ;;  %v738_v1 = vadd.f32 %v737_v55, %v655_v29  ;;  %v3712_v55 = vld [vmem:[%s6896_s0 + $0xf0] sm:$0xff] }
 0x16f   : > { %v614_v57 = vmul.f32 %v3712_v55, %v3300_v31  ;;  %v860_v17 = vmul.f32 %v3712_v55, %v3348_v53 }
 0x170   : > { %1180 = vadd.xlane.f32.xlu1 %v1104_v35  ;;  %690 = vadd.xlane.f32.xlu0 %v613_v61  ;;  %v3443_v35 = vld [vmem:[%s3914_s18 + $0x6e8] sm:$0xff] }
 0x171   : > { %v1391_v48 = vpop.xlane.xlu1 %1390  ;;  %v901_v37 = vpop.xlane.xlu0 %900 }
 0x172   : > { %v1475_v19 = vadd.f32 %v1474_v13, %v1391_v48  ;;  %v984_v41 = vadd.f32 %v983_v47, %v901_v37  ;;  %v1351_v13 = vmul.f32 %v3711_v5, %v3443_v35  ;;  %v3349_v35 = vld [vmem:[%s3914_s18 + $0x3f8] sm:$0xff] }
 0x174   : > { %1426 = vadd.xlane.f32.xlu1 %v1350_v43  ;;  %936 = vadd.xlane.f32.xlu0 %v859_v59  ;;  %v3396_v43 = vld [vmem:[%s3914_s18 + $0x570] sm:$0xff] }
 0x175   : > { %v1147_v30 = vpop.xlane.xlu1 %1146  ;;  %v657_v61 = vpop.xlane.xlu0 %656  ;;  %v1106_v31 = vmul.f32 %v3712_v55, %v3396_v43  ;;  %v3302_v43 = vld [vmem:[%s3914_s18 + $0x280] sm:$0xff] }
 0x176   : > { %v1230_v39 = vadd.f32 %v1229_v3, %v1147_v30  ;;  %v739_v29 = vadd.f32 %v738_v1, %v657_v61  ;;  %v3713_v1 = vld [vmem:[%s6896_s0 + $0xf8] sm:$0xff] }
 0x177   : > { %v615_v5 = vmul.f32 %v3713_v1, %v3301_v49  ;;  %v861_v53 = vmul.f32 %v3713_v1, %v3349_v35 }
 0x178   : > { %1182 = vadd.xlane.f32.xlu1 %v1105_v11  ;;  %692 = vadd.xlane.f32.xlu0 %v614_v57  ;;  %v3444_v11 = vld [vmem:[%s3914_s18 + $0x6f0] sm:$0xff] }
 0x179   : > { %v1393_v47 = vpop.xlane.xlu1 %1392  ;;  %v903_v59 = vpop.xlane.xlu0 %902 }
 0x17a   : > { %v1476_v48 = vadd.f32 %v1475_v19, %v1393_v47  ;;  %v985_v37 = vadd.f32 %v984_v41, %v903_v59  ;;  %v1352_v19 = vmul.f32 %v3712_v55, %v3444_v11  ;;  %v3350_v11 = vld [vmem:[%s3914_s18 + $0x400] sm:$0xff] }
 0x17c   : > { %1428 = vadd.xlane.f32.xlu1 %v1351_v13  ;;  %938 = vadd.xlane.f32.xlu0 %v860_v17  ;;  %v3397_v13 = vld [vmem:[%s3914_s18 + $0x578] sm:$0xff] }
 0x17d   : > { %v1149_v3 = vpop.xlane.xlu1 %1148  ;;  %v659_v57 = vpop.xlane.xlu0 %658  ;;  %v1107_v49 = vmul.f32 %v3713_v1, %v3397_v13  ;;  %v3303_v13 = vld [vmem:[%s3914_s18 + $0x288] sm:$0xff] }
 0x17e   : > { %v1231_v30 = vadd.f32 %v1230_v39, %v1149_v3  ;;  %v740_v61 = vadd.f32 %v739_v29, %v659_v57  ;;  %v3714_v29 = vld [vmem:[%s6896_s0 + $0x100] sm:$0xff] }
 0x17f   : > { %v616_v55 = vmul.f32 %v3714_v29, %v3302_v43  ;;  %v862_v35 = vmul.f32 %v3714_v29, %v3350_v11 }
 0x180   : > { %1184 = vadd.xlane.f32.xlu1 %v1106_v31  ;;  %694 = vadd.xlane.f32.xlu0 %v615_v5  ;;  %v3445_v31 = vld [vmem:[%s3914_s18 + $0x6f8] sm:$0xff] }
 0x181   : > { %v1395_v41 = vpop.xlane.xlu1 %1394  ;;  %v905_v17 = vpop.xlane.xlu0 %904 }
 0x182   : > { %v1477_v47 = vadd.f32 %v1476_v48, %v1395_v41  ;;  %v986_v59 = vadd.f32 %v985_v37, %v905_v17  ;;  %v1353_v48 = vmul.f32 %v3713_v1, %v3445_v31  ;;  %v3351_v31 = vld [vmem:[%s3914_s18 + $0x408] sm:$0xff] }
 0x184   : > { %1430 = vadd.xlane.f32.xlu1 %v1352_v19  ;;  %940 = vadd.xlane.f32.xlu0 %v861_v53  ;;  %v3398_v19 = vld [vmem:[%s3914_s18 + $0x580] sm:$0xff] }
 0x185   : > { %v1151_v39 = vpop.xlane.xlu1 %1150  ;;  %v661_v5 = vpop.xlane.xlu0 %660  ;;  %v1108_v43 = vmul.f32 %v3714_v29, %v3398_v19  ;;  %v3304_v19 = vld [vmem:[%s3914_s18 + $0x290] sm:$0xff] }
 0x186   : > { %v1232_v3 = vadd.f32 %v1231_v30, %v1151_v39  ;;  %v741_v57 = vadd.f32 %v740_v61, %v661_v5  ;;  %v3715_v61 = vld [vmem:[%s6896_s0 + $0x108] sm:$0xff] }
 0x187   : > { %v617_v1 = vmul.f32 %v3715_v61, %v3303_v13  ;;  %v863_v11 = vmul.f32 %v3715_v61, %v3351_v31 }
 0x188   : > { %1186 = vadd.xlane.f32.xlu1 %v1107_v49  ;;  %696 = vadd.xlane.f32.xlu0 %v616_v55  ;;  %v3446_v49 = vld [vmem:[%s3914_s18 + $0x700] sm:$0xff] }
 0x189   : > { %v1397_v37 = vpop.xlane.xlu1 %1396  ;;  %v907_v53 = vpop.xlane.xlu0 %906 }
 0x18a   : > { %v1478_v41 = vadd.f32 %v1477_v47, %v1397_v37  ;;  %v987_v17 = vadd.f32 %v986_v59, %v907_v53  ;;  %v1354_v47 = vmul.f32 %v3714_v29, %v3446_v49  ;;  %v3352_v49 = vld [vmem:[%s3914_s18 + $0x410] sm:$0xff] }
 0x18c   : > { %1432 = vadd.xlane.f32.xlu1 %v1353_v48  ;;  %942 = vadd.xlane.f32.xlu0 %v862_v35  ;;  %v3399_v48 = vld [vmem:[%s3914_s18 + $0x588] sm:$0xff] }
 0x18d   : > { %v1153_v30 = vpop.xlane.xlu1 %1152  ;;  %v663_v55 = vpop.xlane.xlu0 %662  ;;  %v1109_v13 = vmul.f32 %v3715_v61, %v3399_v48  ;;  %v3305_v48 = vld [vmem:[%s3914_s18 + $0x298] sm:$0xff] }
 0x18e   : > { %v1233_v39 = vadd.f32 %v1232_v3, %v1153_v30  ;;  %v742_v5 = vadd.f32 %v741_v57, %v663_v55  ;;  %v3716_v57 = vld [vmem:[%s6896_s0 + $0x110] sm:$0xff] }
 0x18f   : > { %v618_v29 = vmul.f32 %v3716_v57, %v3304_v19  ;;  %v864_v31 = vmul.f32 %v3716_v57, %v3352_v49 }
 0x190   : > { %1188 = vadd.xlane.f32.xlu1 %v1108_v43  ;;  %698 = vadd.xlane.f32.xlu0 %v617_v1  ;;  %v3447_v43 = vld [vmem:[%s3914_s18 + $0x708] sm:$0xff] }
 0x191   : > { %v1399_v59 = vpop.xlane.xlu1 %1398  ;;  %v909_v35 = vpop.xlane.xlu0 %908 }
 0x192   : > { %v1479_v37 = vadd.f32 %v1478_v41, %v1399_v59  ;;  %v988_v53 = vadd.f32 %v987_v17, %v909_v35  ;;  %v1355_v41 = vmul.f32 %v3715_v61, %v3447_v43  ;;  %v3353_v43 = vld [vmem:[%s3914_s18 + $0x418] sm:$0xff] }
 0x194   : > { %1434 = vadd.xlane.f32.xlu1 %v1354_v47  ;;  %944 = vadd.xlane.f32.xlu0 %v863_v11  ;;  %v3400_v47 = vld [vmem:[%s3914_s18 + $0x590] sm:$0xff] }
 0x195   : > { %v1155_v3 = vpop.xlane.xlu1 %1154  ;;  %v665_v1 = vpop.xlane.xlu0 %664  ;;  %v1110_v19 = vmul.f32 %v3716_v57, %v3400_v47  ;;  %v3306_v47 = vld [vmem:[%s3914_s18 + $0x2a0] sm:$0xff] }
 0x196   : > { %v1234_v30 = vadd.f32 %v1233_v39, %v1155_v3  ;;  %v743_v55 = vadd.f32 %v742_v5, %v665_v1  ;;  %v3717_v5 = vld [vmem:[%s6896_s0 + $0x118] sm:$0xff] }
 0x197   : > { %v619_v61 = vmul.f32 %v3717_v5, %v3305_v48  ;;  %v865_v49 = vmul.f32 %v3717_v5, %v3353_v43 }
 0x198   : > { %1190 = vadd.xlane.f32.xlu1 %v1109_v13  ;;  %700 = vadd.xlane.f32.xlu0 %v618_v29  ;;  %v3448_v13 = vld [vmem:[%s3914_s18 + $0x710] sm:$0xff] }
 0x199   : > { %v1401_v17 = vpop.xlane.xlu1 %1400  ;;  %v911_v11 = vpop.xlane.xlu0 %910 }
 0x19a   : > { %v1480_v59 = vadd.f32 %v1479_v37, %v1401_v17  ;;  %v989_v35 = vadd.f32 %v988_v53, %v911_v11  ;;  %v1356_v37 = vmul.f32 %v3716_v57, %v3448_v13  ;;  %v3354_v13 = vld [vmem:[%s3914_s18 + $0x420] sm:$0xff] }
 0x19c   : > { %1436 = vadd.xlane.f32.xlu1 %v1355_v41  ;;  %946 = vadd.xlane.f32.xlu0 %v864_v31  ;;  %v3401_v41 = vld [vmem:[%s3914_s18 + $0x598] sm:$0xff] }
 0x19d   : > { %v1157_v39 = vpop.xlane.xlu1 %1156  ;;  %v667_v29 = vpop.xlane.xlu0 %666  ;;  %v1111_v48 = vmul.f32 %v3717_v5, %v3401_v41  ;;  %v3307_v41 = vld [vmem:[%s3914_s18 + $0x2a8] sm:$0xff] }
 0x19e   : > { %v1235_v3 = vadd.f32 %v1234_v30, %v1157_v39  ;;  %v744_v1 = vadd.f32 %v743_v55, %v667_v29  ;;  %v3718_v55 = vld [vmem:[%s6896_s0 + $0x120] sm:$0xff] }
 0x19f   : > { %v620_v57 = vmul.f32 %v3718_v55, %v3306_v47  ;;  %v866_v43 = vmul.f32 %v3718_v55, %v3354_v13 }
 0x1a0   : > { %1192 = vadd.xlane.f32.xlu1 %v1110_v19  ;;  %702 = vadd.xlane.f32.xlu0 %v619_v61  ;;  %v3449_v19 = vld [vmem:[%s3914_s18 + $0x718] sm:$0xff] }
 0x1a1   : > { %v1403_v53 = vpop.xlane.xlu1 %1402  ;;  %v913_v31 = vpop.xlane.xlu0 %912 }
 0x1a2   : > { %v1481_v17 = vadd.f32 %v1480_v59, %v1403_v53  ;;  %v990_v11 = vadd.f32 %v989_v35, %v913_v31  ;;  %v1357_v59 = vmul.f32 %v3717_v5, %v3449_v19  ;;  %v3355_v19 = vld [vmem:[%s3914_s18 + $0x428] sm:$0xff] }
 0x1a4   : > { %1438 = vadd.xlane.f32.xlu1 %v1356_v37  ;;  %948 = vadd.xlane.f32.xlu0 %v865_v49  ;;  %v3402_v37 = vld [vmem:[%s3914_s18 + $0x5a0] sm:$0xff] }
 0x1a5   : > { %v1159_v30 = vpop.xlane.xlu1 %1158  ;;  %v669_v61 = vpop.xlane.xlu0 %668  ;;  %v1112_v47 = vmul.f32 %v3718_v55, %v3402_v37  ;;  %v3308_v37 = vld [vmem:[%s3914_s18 + $0x2b0] sm:$0xff] }
 0x1a6   : > { %v1236_v39 = vadd.f32 %v1235_v3, %v1159_v30  ;;  %v745_v29 = vadd.f32 %v744_v1, %v669_v61  ;;  %v3719_v1 = vld [vmem:[%s6896_s0 + $0x128] sm:$0xff] }
 0x1a7   : > { %v621_v5 = vmul.f32 %v3719_v1, %v3307_v41  ;;  %v867_v13 = vmul.f32 %v3719_v1, %v3355_v19 }
 0x1a8   : > { %1194 = vadd.xlane.f32.xlu1 %v1111_v48  ;;  %704 = vadd.xlane.f32.xlu0 %v620_v57  ;;  %v3450_v48 = vld [vmem:[%s3914_s18 + $0x720] sm:$0xff] }
 0x1a9   : > { %v1405_v35 = vpop.xlane.xlu1 %1404  ;;  %v915_v49 = vpop.xlane.xlu0 %914 }
 0x1aa   : > { %v1482_v53 = vadd.f32 %v1481_v17, %v1405_v35  ;;  %v991_v31 = vadd.f32 %v990_v11, %v915_v49  ;;  %v1358_v17 = vmul.f32 %v3718_v55, %v3450_v48  ;;  %v3356_v48 = vld [vmem:[%s3914_s18 + $0x430] sm:$0xff] }
 0x1ac   : > { %1440 = vadd.xlane.f32.xlu1 %v1357_v59  ;;  %950 = vadd.xlane.f32.xlu0 %v866_v43  ;;  %v3403_v59 = vld [vmem:[%s3914_s18 + $0x5a8] sm:$0xff] }
 0x1ad   : > { %v1161_v3 = vpop.xlane.xlu1 %1160  ;;  %v671_v57 = vpop.xlane.xlu0 %670  ;;  %v1113_v41 = vmul.f32 %v3719_v1, %v3403_v59  ;;  %v3309_v59 = vld [vmem:[%s3914_s18 + $0x2b8] sm:$0xff] }
 0x1ae   : > { %v1237_v30 = vadd.f32 %v1236_v39, %v1161_v3  ;;  %v746_v61 = vadd.f32 %v745_v29, %v671_v57  ;;  %v3720_v29 = vld [vmem:[%s6896_s0 + $0x130] sm:$0xff] }
 0x1af   : > { %v622_v55 = vmul.f32 %v3720_v29, %v3308_v37  ;;  %v868_v19 = vmul.f32 %v3720_v29, %v3356_v48 }
 0x1b0   : > { %1196 = vadd.xlane.f32.xlu1 %v1112_v47  ;;  %706 = vadd.xlane.f32.xlu0 %v621_v5  ;;  %v3451_v47 = vld [vmem:[%s3914_s18 + $0x728] sm:$0xff] }
 0x1b1   : > { %v1407_v11 = vpop.xlane.xlu1 %1406  ;;  %v917_v43 = vpop.xlane.xlu0 %916 }
 0x1b2   : > { %v1483_v35 = vadd.f32 %v1482_v53, %v1407_v11  ;;  %v992_v49 = vadd.f32 %v991_v31, %v917_v43  ;;  %v1359_v53 = vmul.f32 %v3719_v1, %v3451_v47  ;;  %v3357_v47 = vld [vmem:[%s3914_s18 + $0x438] sm:$0xff] }
 0x1b4   : > { %1442 = vadd.xlane.f32.xlu1 %v1358_v17  ;;  %952 = vadd.xlane.f32.xlu0 %v867_v13  ;;  %v3404_v17 = vld [vmem:[%s3914_s18 + $0x5b0] sm:$0xff] }
 0x1b5   : > { %v1163_v39 = vpop.xlane.xlu1 %1162  ;;  %v673_v5 = vpop.xlane.xlu0 %672  ;;  %v1114_v37 = vmul.f32 %v3720_v29, %v3404_v17  ;;  %v3310_v17 = vld [vmem:[%s3914_s18 + $0x2c0] sm:$0xff] }
 0x1b6   : > { %v1238_v3 = vadd.f32 %v1237_v30, %v1163_v39  ;;  %v747_v57 = vadd.f32 %v746_v61, %v673_v5  ;;  %v3721_v61 = vld [vmem:[%s6896_s0 + $0x138] sm:$0xff] }
 0x1b7   : > { %v623_v1 = vmul.f32 %v3721_v61, %v3309_v59  ;;  %v869_v48 = vmul.f32 %v3721_v61, %v3357_v47 }
 0x1b8   : > { %1198 = vadd.xlane.f32.xlu1 %v1113_v41  ;;  %708 = vadd.xlane.f32.xlu0 %v622_v55  ;;  %v3452_v41 = vld [vmem:[%s3914_s18 + $0x730] sm:$0xff] }
 0x1b9   : > { %v1409_v31 = vpop.xlane.xlu1 %1408  ;;  %v919_v13 = vpop.xlane.xlu0 %918 }
 0x1ba   : > { %v1484_v11 = vadd.f32 %v1483_v35, %v1409_v31  ;;  %v993_v43 = vadd.f32 %v992_v49, %v919_v13  ;;  %v1360_v35 = vmul.f32 %v3720_v29, %v3452_v41  ;;  %v3358_v41 = vld [vmem:[%s3914_s18 + $0x440] sm:$0xff] }
 0x1bc   : > { %1444 = vadd.xlane.f32.xlu1 %v1359_v53  ;;  %954 = vadd.xlane.f32.xlu0 %v868_v19  ;;  %v3405_v53 = vld [vmem:[%s3914_s18 + $0x5b8] sm:$0xff] }
 0x1bd   : > { %v1165_v30 = vpop.xlane.xlu1 %1164  ;;  %v675_v55 = vpop.xlane.xlu0 %674  ;;  %v1115_v59 = vmul.f32 %v3721_v61, %v3405_v53  ;;  %v3311_v53 = vld [vmem:[%s3914_s18 + $0x2c8] sm:$0xff] }
 0x1be   : > { %v1239_v39 = vadd.f32 %v1238_v3, %v1165_v30  ;;  %v748_v5 = vadd.f32 %v747_v57, %v675_v55  ;;  %v3722_v57 = vld [vmem:[%s6896_s0 + $0x140] sm:$0xff] }
 0x1bf   : > { %v624_v29 = vmul.f32 %v3722_v57, %v3310_v17  ;;  %v870_v47 = vmul.f32 %v3722_v57, %v3358_v41 }
 0x1c0   : > { %1200 = vadd.xlane.f32.xlu1 %v1114_v37  ;;  %710 = vadd.xlane.f32.xlu0 %v623_v1  ;;  %v3453_v37 = vld [vmem:[%s3914_s18 + $0x738] sm:$0xff] }
 0x1c1   : > { %v1411_v49 = vpop.xlane.xlu1 %1410  ;;  %v921_v19 = vpop.xlane.xlu0 %920 }
 0x1c2   : > { %v1485_v31 = vadd.f32 %v1484_v11, %v1411_v49  ;;  %v994_v13 = vadd.f32 %v993_v43, %v921_v19  ;;  %v1361_v11 = vmul.f32 %v3721_v61, %v3453_v37  ;;  %v3359_v37 = vld [vmem:[%s3914_s18 + $0x448] sm:$0xff] }
 0x1c4   : > { %1446 = vadd.xlane.f32.xlu1 %v1360_v35  ;;  %956 = vadd.xlane.f32.xlu0 %v869_v48  ;;  %v3406_v35 = vld [vmem:[%s3914_s18 + $0x5c0] sm:$0xff] }
 0x1c5   : > { %v1167_v3 = vpop.xlane.xlu1 %1166  ;;  %v677_v1 = vpop.xlane.xlu0 %676  ;;  %v1116_v17 = vmul.f32 %v3722_v57, %v3406_v35  ;;  %v3312_v35 = vld [vmem:[%s3914_s18 + $0x2d0] sm:$0xff] }
 0x1c6   : > { %v1240_v30 = vadd.f32 %v1239_v39, %v1167_v3  ;;  %v749_v55 = vadd.f32 %v748_v5, %v677_v1  ;;  %v3723_v5 = vld [vmem:[%s6896_s0 + $0x148] sm:$0xff] }
 0x1c7   : > { %v625_v61 = vmul.f32 %v3723_v5, %v3311_v53  ;;  %v871_v41 = vmul.f32 %v3723_v5, %v3359_v37 }
 0x1c8   : > { %1202 = vadd.xlane.f32.xlu1 %v1115_v59  ;;  %712 = vadd.xlane.f32.xlu0 %v624_v29  ;;  %v3454_v59 = vld [vmem:[%s3914_s18 + $0x740] sm:$0xff] }
 0x1c9   : > { %v1413_v43 = vpop.xlane.xlu1 %1412  ;;  %v923_v48 = vpop.xlane.xlu0 %922 }
 0x1ca   : > { %v1486_v49 = vadd.f32 %v1485_v31, %v1413_v43  ;;  %v995_v19 = vadd.f32 %v994_v13, %v923_v48  ;;  %v1362_v31 = vmul.f32 %v3722_v57, %v3454_v59 }
 0x1cc   : > { %1448 = vadd.xlane.f32.xlu1 %v1361_v11  ;;  %958 = vadd.xlane.f32.xlu0 %v870_v47  ;;  %v3407_v11 = vld [vmem:[%s3914_s18 + $0x5c8] sm:$0xff] }
 0x1cd   : > { %v1169_v39 = vpop.xlane.xlu1 %1168  ;;  %v679_v29 = vpop.xlane.xlu0 %678  ;;  %v1117_v53 = vmul.f32 %v3723_v5, %v3407_v11  ;;  %v3725_v11 = vld [vmem:[%s6896_s0 + $0x158] sm:$0xff] }
 0x1ce   : > { %v1241_v3 = vadd.f32 %v1240_v30, %v1169_v39  ;;  %v750_v1 = vadd.f32 %v749_v55, %v679_v29  ;;  %v3724_v55 = vld [vmem:[%s6896_s0 + $0x150] sm:$0xff] }
 0x1cf   : > { %v626_v57 = vmul.f32 %v3724_v55, %v3312_v35  ;;  %v3408_v29 = vld [vmem:[%s3914_s18 + $0x5d0] sm:$0xff] }
 0x1d0   : > { %1204 = vadd.xlane.f32.xlu1 %v1116_v17  ;;  %714 = vadd.xlane.f32.xlu0 %v625_v61  ;;  %v3455_v17 = vld [vmem:[%s3914_s18 + $0x748] sm:$0xff]  ;;  %v3360_v61 = vld [vmem:[%s3914_s18 + $0x450] sm:$0xff] }
 0x1d1   : > { %v1415_v13 = vpop.xlane.xlu1 %1414  ;;  %v925_v47 = vpop.xlane.xlu0 %924  ;;  %v3456_v35 = vld [vmem:[%s3914_s18 + $0x750] sm:$0xff] }
 0x1d2   : > { %v1487_v43 = vadd.f32 %v1486_v49, %v1415_v13  ;;  %v996_v48 = vadd.f32 %v995_v19, %v925_v47  ;;  %v1363_v49 = vmul.f32 %v3723_v5, %v3455_v17  ;;  %v872_v19 = vmul.f32 %v3724_v55, %v3360_v61  ;;  %v3361_v5 = vld [vmem:[%s3914_s18 + $0x458] sm:$0xff] }
 0x1d3   : > { %v1118_v13 = vmul.f32 %v3724_v55, %v3408_v29  ;;  %v873_v21 = vmul.f32 %v3725_v11, %v3361_v5 }
 0x1d4   : > { %1450 = vadd.xlane.f32.xlu1 %v1362_v31  ;;  %960 = vadd.xlane.f32.xlu0 %v871_v41  ;;  %v3313_v31 = vld [vmem:[%s3914_s18 + $0x2d8] sm:$0xff] }
 0x1d5   : > { %v1171_v30 = vpop.xlane.xlu1 %1170  ;;  %v681_v39 = vpop.xlane.xlu0 %680  ;;  %v627_v47 = vmul.f32 %v3725_v11, %v3313_v31 }
 0x1d6   : > { %v1242_v29 = vadd.f32 %v1241_v3, %v1171_v30  ;;  %v751_v8 = vadd.f32 %v750_v1, %v681_v39 }
 0x1d8   : > { %1206 = vadd.xlane.f32.xlu1 %v1117_v53  ;;  %716 = vadd.xlane.f32.xlu0 %v626_v57  ;;  %v1364_v57 = vmul.f32 %v3724_v55, %v3456_v35  ;;  %v3362_v35 = vld [vmem:[%s3914_s18 + $0x460] sm:$0xff] }
 0x1d9   : > { %v1417_v59 = vpop.xlane.xlu1 %1416  ;;  %v927_v37 = vpop.xlane.xlu0 %926 }
 0x1da   : > { %v997_v17 = vadd.f32 %v996_v48, %v927_v37  ;;  %v3726_v48 = vld [vmem:[%s6896_s0 + $0x160] sm:$0xff]  ;;  %v3457_v37 = vld [vmem:[%s3914_s18 + $0x758] sm:$0xff]  ;;  %v1488_v3 = vadd.f32 %v1487_v43, %v1417_v59 }
 0x1db   : > { %v628_v55 = vmul.f32 %v3726_v48, %v3314_v25 }
 0x1dc   : > { %1452 = vadd.xlane.f32.xlu1 %v1363_v49  ;;  %962 = vadd.xlane.f32.xlu0 %v872_v19  ;;  %v3409_v49 = vld [vmem:[%s3914_s18 + $0x5d8] sm:$0xff] }
 0x1dd   : > { %v1173_v41 = vpop.xlane.xlu1 %1172  ;;  %v683_v53 = vpop.xlane.xlu0 %682  ;;  %v1119_v31 = vmul.f32 %v3725_v11, %v3409_v49 }
 0x1de   : > { %v1243_v60 = vadd.f32 %v1242_v29, %v1173_v41  ;;  %v752_v63 = vadd.f32 %v751_v8, %v683_v53  ;;  %v1365_v41 = vmul.f32 %v3725_v11, %v3457_v37  ;;  %v3410_v53 = vld [vmem:[%s3914_s18 + $0x5e0] sm:$0xff]  ;;  %v3363_v29 = vld [vmem:[%s3914_s18 + $0x468] sm:$0xff] }
 0x1df   : > { %v1120_v43 = vmul.f32 %v3726_v48, %v3410_v53  ;;  %v3458_v11 = vld [vmem:[%s3914_s18 + $0x760] sm:$0xff]  ;;  %v3364_v53 = vld [vmem:[%s3914_s18 + $0x470] sm:$0xff] }
 0x1e0   : > { %1208 = vadd.xlane.f32.xlu1 %v1118_v13  ;;  %718 = vadd.xlane.f32.xlu0 %v627_v47 }
 0x1e1   : > { %v1419_v61 = vpop.xlane.xlu1 %1418  ;;  %v929_v19 = vpop.xlane.xlu0 %928 }
 0x1e2   : > { %v998_v12 = vadd.f32 %v997_v17, %v929_v19  ;;  %v1489_v39 = vadd.f32 %v1488_v3, %v1419_v61  ;;  %v3315_v17 = vld [vmem:[%s3914_s18 + $0x2e8] sm:$0xff] }
 0x1e4   : > { %1454 = vadd.xlane.f32.xlu1 %v1364_v57  ;;  %964 = vadd.xlane.f32.xlu0 %v873_v21  ;;  %v874_v21 = vmul.f32 %v3726_v48, %v3362_v35 }
 0x1e5   : > { %v1175_v13 = vpop.xlane.xlu1 %1174  ;;  %v685_v47 = vpop.xlane.xlu0 %684 }
 0x1e6   : > { %v1244_v30 = vadd.f32 %v1243_v60, %v1175_v13  ;;  %v753_v1 = vadd.f32 %v752_v63, %v685_v47  ;;  %v3727_v63 = vld [vmem:[%s6896_s0 + $0x168] sm:$0xff]  ;;  %v3316_v47 = vld [vmem:[%s3914_s18 + $0x2f0] sm:$0xff] }
 0x1e7   : > { %v629_v59 = vmul.f32 %v3727_v63, %v3315_v17  ;;  %v875_v13 = vmul.f32 %v3727_v63, %v3363_v29 }
 0x1e8   : > { %1210 = vadd.xlane.f32.xlu1 %v1119_v31  ;;  %720 = vadd.xlane.f32.xlu0 %v628_v55  ;;  %v1366_v31 = vmul.f32 %v3726_v48, %v3458_v11  ;;  %v3411_v55 = vld [vmem:[%s3914_s18 + $0x5e8] sm:$0xff]  ;;  %v3317_v11 = vld [vmem:[%s3914_s18 + $0x2f8] sm:$0xff] }
 0x1e9   : > { %v1421_v8 = vpop.xlane.xlu1 %1420  ;;  %v931_v57 = vpop.xlane.xlu0 %930 }
 0x1ea   : > { %v1490_v5 = vadd.f32 %v1489_v39, %v1421_v8  ;;  %v999_v25 = vadd.f32 %v998_v12, %v931_v57  ;;  %v1121_v39 = vmul.f32 %v3727_v63, %v3411_v55  ;;  %v3365_v55 = vld [vmem:[%s3914_s18 + $0x478] sm:$0xff] }
 0x1ec   : > { %1456 = vadd.xlane.f32.xlu1 %v1365_v41  ;;  %966 = vadd.xlane.f32.xlu0 %v874_v21  ;;  %v3459_v41 = vld [vmem:[%s3914_s18 + $0x768] sm:$0xff] }
 0x1ed   : > { %v1177_v60 = vpop.xlane.xlu1 %1176  ;;  %v687_v49 = vpop.xlane.xlu0 %686 }
 0x1ee   : > { %v1245_v61 = vadd.f32 %v1244_v30, %v1177_v60  ;;  %v754_v19 = vadd.f32 %v753_v1, %v687_v49  ;;  %v3728_v1 = vld [vmem:[%s6896_s0 + $0x170] sm:$0xff] }
 0x1ef   : > { %v630_v48 = vmul.f32 %v3728_v1, %v3316_v47 }
 0x1f0   : > { %1212 = vadd.xlane.f32.xlu1 %v1120_v43  ;;  %722 = vadd.xlane.f32.xlu0 %v629_v59  ;;  %v3412_v43 = vld [vmem:[%s3914_s18 + $0x5f0] sm:$0xff] }
 0x1f1   : > { %v1423_v12 = vpop.xlane.xlu1 %1422  ;;  %v933_v3 = vpop.xlane.xlu0 %932  ;;  %v1122_v29 = vmul.f32 %v3728_v1, %v3412_v43 }
 0x1f2   : > { %v1491_v37 = vadd.f32 %v1490_v5, %v1423_v12  ;;  %v1000_v35 = vadd.f32 %v999_v25, %v933_v3  ;;  %v1367_v5 = vmul.f32 %v3727_v63, %v3459_v41  ;;  %v876_v25 = vmul.f32 %v3728_v1, %v3364_v53  ;;  %v3413_v41 = vld [vmem:[%s3914_s18 + $0x5f8] sm:$0xff] }
 0x1f4   : > { %1458 = vadd.xlane.f32.xlu1 %v1366_v31  ;;  %968 = vadd.xlane.f32.xlu0 %v875_v13  ;;  %v3460_v31 = vld [vmem:[%s3914_s18 + $0x770] sm:$0xff] }
 0x1f5   : > { %v1179_v30 = vpop.xlane.xlu1 %1178  ;;  %v689_v21 = vpop.xlane.xlu0 %688 }
 0x1f6   : > { %v1246_v8 = vadd.f32 %v1245_v61, %v1179_v30  ;;  %v755_v57 = vadd.f32 %v754_v19, %v689_v21  ;;  %v3729_v19 = vld [vmem:[%s6896_s0 + $0x178] sm:$0xff] }
 0x1f7   : > { %v631_v63 = vmul.f32 %v3729_v19, %v3317_v11 }
 0x1f8   : > { %1214 = vadd.xlane.f32.xlu1 %v1121_v39  ;;  %724 = vadd.xlane.f32.xlu0 %v630_v48  ;;  %v3461_v39 = vld [vmem:[%s3914_s18 + $0x778] sm:$0xff]  ;;  %s3872_s18 = smov 126  }
 0x1f9   : > { %v1425_v17 = vpop.xlane.xlu1 %1424  ;;  %v935_v59 = vpop.xlane.xlu0 %934  ;;  %v1369_v53 = vmul.f32 %v3729_v19, %v3461_v39 }
 0x1fa   : > { %v1492_v60 = vadd.f32 %v1491_v37, %v1425_v17  ;;  %v1001_v49 = vadd.f32 %v1000_v35, %v935_v59  ;;  %v1368_v37 = vmul.f32 %v3728_v1, %v3460_v31  ;;  %v877_v35 = vmul.f32 %v3729_v19, %v3365_v55 }
 0x1fb   : > { %v1123_v17 = vmul.f32 %v3729_v19, %v3413_v41 }
 0x1fc   : > { %1460 = vadd.xlane.f32.xlu1 %v1367_v5  ;;  %970 = vadd.xlane.f32.xlu0 %v876_v25 }
 0x1fd   : > { %v1181_v61 = vpop.xlane.xlu1 %1180  ;;  %v691_v13 = vpop.xlane.xlu0 %690 }
 0x1fe   : > { %v1247_v12 = vadd.f32 %v1246_v8, %v1181_v61  ;;  %v756_v3 = vadd.f32 %v755_v57, %v691_v13 }
 0x200   : > { %1216 = vadd.xlane.f32.xlu1 %v1122_v29  ;;  %726 = vadd.xlane.f32.xlu0 %v631_v63 }
 0x201   : > { %v1427_v47 = vpop.xlane.xlu1 %1426  ;;  %v937_v48 = vpop.xlane.xlu0 %936 }
 0x202   : > { %v1493_v30 = vadd.f32 %v1492_v60, %v1427_v47  ;;  %v1002_v21 = vadd.f32 %v1001_v49, %v937_v48 }
 0x204   : > { %1462 = vadd.xlane.f32.xlu1 %v1368_v37  ;;  %972 = vadd.xlane.f32.xlu0 %v877_v35 }
 0x205   : > { %v1183_v5 = vpop.xlane.xlu1 %1182  ;;  %v693_v8 = vpop.xlane.xlu0 %692 }
 0x206   : > { %v1248_v25 = vadd.f32 %v1247_v12, %v1183_v5  ;;  %v757_v43 = vadd.f32 %v756_v3, %v693_v8 }
 0x208   : > { %1464 = vadd.xlane.f32.xlu1 %v1369_v53  ;;  %1218 = vadd.xlane.f32.xlu0 %v1123_v17 }
 0x209   : > { %v1429_v57 = vpop.xlane.xlu1 %1428  ;;  %v939_v59 = vpop.xlane.xlu0 %938 }
 0x20a   : > { %v1494_v1 = vadd.f32 %v1493_v30, %v1429_v57  ;;  %v1003_v11 = vadd.f32 %v1002_v21, %v939_v59 }
 0x20d   : > { %v1185_v29 = vpop.xlane.xlu1 %1184  ;;  %v695_v60 = vpop.xlane.xlu0 %694 }
 0x20e   : > { %v1249_v61 = vadd.f32 %v1248_v25, %v1185_v29  ;;  %v758_v63 = vadd.f32 %v757_v43, %v695_v60 }
 0x211   : > { %v1431_v31 = vpop.xlane.xlu1 %1430  ;;  %v941_v13 = vpop.xlane.xlu0 %940 }
 0x212   : > { %v1495_v49 = vadd.f32 %v1494_v1, %v1431_v31  ;;  %v1004_v55 = vadd.f32 %v1003_v11, %v941_v13 }
 0x215   : > { %v1187_v37 = vpop.xlane.xlu1 %1186  ;;  %v697_v19 = vpop.xlane.xlu0 %696 }
 0x216   : > { %v1250_v47 = vadd.f32 %v1249_v61, %v1187_v37  ;;  %v759_v12 = vadd.f32 %v758_v63, %v697_v19 }
 0x219   : > { %v1433_v35 = vpop.xlane.xlu1 %1432  ;;  %v943_v39 = vpop.xlane.xlu0 %942 }
 0x21a   : > { %v1496_v3 = vadd.f32 %v1495_v49, %v1433_v35  ;;  %v1005_v48 = vadd.f32 %v1004_v55, %v943_v39 }
 0x21d   : > { %v1189_v41 = vpop.xlane.xlu1 %1188  ;;  %v699_v53 = vpop.xlane.xlu0 %698 }
 0x21e   : > { %v1251_v30 = vadd.f32 %v1250_v47, %v1189_v41  ;;  %v760_v21 = vadd.f32 %v759_v12, %v699_v53 }
 0x221   : > { %v1435_v5 = vpop.xlane.xlu1 %1434  ;;  %v945_v25 = vpop.xlane.xlu0 %944 }
 0x222   : > { %v1497_v17 = vadd.f32 %v1496_v3, %v1435_v5  ;;  %v1006_v8 = vadd.f32 %v1005_v48, %v945_v25 }
 0x225   : > { %v1191_v43 = vpop.xlane.xlu1 %1190  ;;  %v701_v1 = vpop.xlane.xlu0 %700 }
 0x226   : > { %v1252_v57 = vadd.f32 %v1251_v30, %v1191_v43  ;;  %v761_v59 = vadd.f32 %v760_v21, %v701_v1 }
 0x229   : > { %v1437_v11 = vpop.xlane.xlu1 %1436  ;;  %v947_v61 = vpop.xlane.xlu0 %946 }
 0x22a   : > { %v1498_v29 = vadd.f32 %v1497_v17, %v1437_v11  ;;  %v1007_v60 = vadd.f32 %v1006_v8, %v947_v61 }
 0x22d   : > { %v1193_v63 = vpop.xlane.xlu1 %1192  ;;  %v703_v49 = vpop.xlane.xlu0 %702 }
 0x22e   : > { %v1253_v31 = vadd.f32 %v1252_v57, %v1193_v63  ;;  %v762_v13 = vadd.f32 %v761_v59, %v703_v49 }
 0x231   : > { %v1439_v55 = vpop.xlane.xlu1 %1438  ;;  %v949_v47 = vpop.xlane.xlu0 %948 }
 0x232   : > { %v1499_v37 = vadd.f32 %v1498_v29, %v1439_v55  ;;  %v1008_v19 = vadd.f32 %v1007_v60, %v949_v47 }
 0x235   : > { %v1195_v12 = vpop.xlane.xlu1 %1194  ;;  %v705_v3 = vpop.xlane.xlu0 %704 }
 0x236   : > { %v1254_v35 = vadd.f32 %v1253_v31, %v1195_v12  ;;  %v763_v39 = vadd.f32 %v762_v13, %v705_v3 }
 0x239   : > { %v1441_v48 = vpop.xlane.xlu1 %1440  ;;  %v951_v30 = vpop.xlane.xlu0 %950 }
 0x23a   : > { %v1500_v41 = vadd.f32 %v1499_v37, %v1441_v48  ;;  %v1009_v53 = vadd.f32 %v1008_v19, %v951_v30 }
 0x23d   : > { %v1197_v21 = vpop.xlane.xlu1 %1196  ;;  %v707_v17 = vpop.xlane.xlu0 %706 }
 0x23e   : > { %v1255_v5 = vadd.f32 %v1254_v35, %v1197_v21  ;;  %v764_v25 = vadd.f32 %v763_v39, %v707_v17 }
 0x241   : > { %v1443_v8 = vpop.xlane.xlu1 %1442  ;;  %v953_v43 = vpop.xlane.xlu0 %952 }
 0x242   : > { %v1010_v15 = vadd.f32 %v1009_v53, %v953_v43  ;;  %v1501_v6 = vadd.f32 %v1500_v41, %v1443_v8 }
 0x245   : > { %v1199_v57 = vpop.xlane.xlu1 %1198  ;;  %v709_v1 = vpop.xlane.xlu0 %708 }
 0x246   : > { %v765_v36 = vadd.f32 %v764_v25, %v709_v1  ;;  %v1256_v50 = vadd.f32 %v1255_v5, %v1199_v57  ;;  %v529_v1 = vrot.slane %v4408_v23, 4 }
 0x249   : > { %v1445_v59 = vpop.xlane.xlu1 %1444  ;;  %v955_v11 = vpop.xlane.xlu0 %954 }
 0x24a   : > { %v1011_v9 = vadd.f32 %v1010_v15, %v955_v11  ;;  %v1502_v56 = vadd.f32 %v1501_v6, %v1445_v59 }
 0x24d   : > { %v1201_v29 = vpop.xlane.xlu1 %1200  ;;  %v711_v61 = vpop.xlane.xlu0 %710 }
 0x24e   : > { %v766_v18 = vadd.f32 %v765_v36, %v711_v61  ;;  %v1257_v38 = vadd.f32 %v1256_v50, %v1201_v29 }
 0x251   : > { %v1447_v60 = vpop.xlane.xlu1 %1446  ;;  %v957_v63 = vpop.xlane.xlu0 %956 }
 0x252   : > { %v1012_v52 = vadd.f32 %v1011_v9, %v957_v63  ;;  %v1503_v46 = vadd.f32 %v1502_v56, %v1447_v60  ;;  %v530_v56 = vadd.f32 %v529_v1, %v4408_v23 }
 0x255   : > { %v1203_v31 = vpop.xlane.xlu1 %1202  ;;  %v713_v49 = vpop.xlane.xlu0 %712 }
 0x256   : > { %v767_v62 = vadd.f32 %v766_v18, %v713_v49  ;;  %v1258_v53 = vadd.f32 %v1257_v38, %v1203_v31 }
 0x259   : > { %v1449_v13 = vpop.xlane.xlu1 %1448  ;;  %v959_v55 = vpop.xlane.xlu0 %958 }
 0x25a   : > { %v1013_v40 = vadd.f32 %v1012_v52, %v959_v55  ;;  %v1504_v26 = vadd.f32 %v1503_v46, %v1449_v13 }
 0x25d   : > { %v1205_v37 = vpop.xlane.xlu1 %1204  ;;  %v715_v47 = vpop.xlane.xlu0 %714 }
 0x25e   : > { %v768_v44 = vadd.f32 %v767_v62, %v715_v47  ;;  %v1259_v18 = vadd.f32 %v1258_v53, %v1205_v37 }
 0x261   : > { %v1451_v19 = vpop.xlane.xlu1 %1450  ;;  %v961_v12 = vpop.xlane.xlu0 %960 }
 0x262   : > { %v1014_v36 = vadd.f32 %v1013_v40, %v961_v12  ;;  %v1505_v15 = vadd.f32 %v1504_v26, %v1451_v19 }
 0x265   : > { %v1207_v35 = vpop.xlane.xlu1 %1206  ;;  %v717_v3 = vpop.xlane.xlu0 %716 }
 0x266   : > { %v769_v32 = vadd.f32 %v768_v44, %v717_v3  ;;  %v1260_v50 = vadd.f32 %v1259_v18, %v1207_v35 }
 0x269   : > { %v1453_v39 = vpop.xlane.xlu1 %1452  ;;  %v963_v48 = vpop.xlane.xlu0 %962 }
 0x26a   : > { %v1015_v8 = vadd.f32 %v1014_v36, %v963_v48  ;;  %v1506_v5 = vadd.f32 %v1505_v15, %v1453_v39 }
 0x26d   : > { %v1209_v30 = vpop.xlane.xlu1 %1208  ;;  %v719_v21 = vpop.xlane.xlu0 %718 }
 0x26e   : > { %v770_v41 = vadd.f32 %v769_v32, %v719_v21  ;;  %v1261_v46 = vadd.f32 %v1260_v50, %v1209_v30  ;;  %v531_v32 = vrot.slane %v530_v56, 2 }
 0x271   : > { %v1455_v17 = vpop.xlane.xlu1 %1454  ;;  %v965_v51 = vpop.xlane.xlu0 %964 }
 0x272   : > { %v1016_v52 = vadd.f32 %v1015_v8, %v965_v51  ;;  %v1507_v62 = vadd.f32 %v1506_v5, %v1455_v17  ;;  %v532_v51 = vadd.f32 %v531_v32, %v530_v56 }
 0x275   : > { %v1211_v54 = vpop.xlane.xlu1 %1210  ;;  %v721_v42 = vpop.xlane.xlu0 %720 }
 0x276   : > { %v771_v6 = vadd.f32 %v770_v41, %v721_v42  ;;  %v1262_v26 = vadd.f32 %v1261_v46, %v1211_v54 }
 0x279   : > { %v1457_v45 = vpop.xlane.xlu1 %1456  ;;  %v967_v33 = vpop.xlane.xlu0 %966 }
 0x27a   : > { %v1017_v57 = vadd.f32 %v1016_v52, %v967_v33  ;;  %v1508_v38 = vadd.f32 %v1507_v62, %v1457_v45 }
 0x27d   : > { %v1213_v24 = vpop.xlane.xlu1 %1212  ;;  %v723_v27 = vpop.xlane.xlu0 %722 }
 0x27e   : > { %v772_v44 = vadd.f32 %v771_v6, %v723_v27  ;;  %v1263_v60 = vadd.f32 %v1262_v26, %v1213_v24 }
 0x281   : > { %v1459_v0 = vpop.xlane.xlu1 %1458  ;;  %v969_v58 = vpop.xlane.xlu0 %968 }
 0x282   : > { %v1018_v29 = vadd.f32 %v1017_v57, %v969_v58  ;;  %v1509_v42 = vadd.f32 %v1508_v38, %v1459_v0  ;;  %v533_v58 = vrot.slane %v532_v51, 1  ;;  %v3871_v57 = vmov 0  }
 0x283   : > { %3697 = vset.pattern.permute.xlu0 %v3871_v57  ;;  %v1564_v57 = vld [vmem:[%s3919_s21 + $0xd8] sm:$0xff] }
 0x285   : > { %v1215_v34 = vpop.xlane.xlu1 %1214  ;;  %v725_v25 = vpop.xlane.xlu0 %724 }
 0x286   : > { %v773_v59 = vadd.f32 %v772_v44, %v725_v25  ;;  %v1264_v27 = vadd.f32 %v1263_v60, %v1215_v34  ;;  %v534_v34 = vadd.f32 %v533_v58, %v532_v51  ;;  %v1542_v58 = vld [vmem:[%s3919_s21 + $0x28] sm:$0xff] }
 0x289   : > { %v1461_v43 = vpop.xlane.xlu1 %1460  ;;  %v971_v9 = vpop.xlane.xlu0 %970 }
 0x28a   : > { %v1019_v63 = vadd.f32 %v1018_v29, %v971_v9  ;;  %v1510_v23 = vadd.f32 %v1509_v42, %v1461_v43 }
 0x28d   : > { %v1217_v11 = vpop.xlane.xlu1 %1216  ;;  %v727_v40 = vpop.xlane.xlu0 %726 }
 0x28e   : > { %v774_v61 = vadd.f32 %v773_v59, %v727_v40  ;;  %v1265_v47 = vadd.f32 %v1264_v27, %v1217_v11  ;;  %v2237_v59 = vld [vmem:[#allocation2] sm:$0x1] }
 0x290   : > { %v775_v31 = vrot.slane %v774_v61, 4 }
 0x291   : > { %v1463_v49 = vpop.xlane.xlu1 %1462  ;;  %v973_v13 = vpop.xlane.xlu0 %972 }
 0x292   : > { %v776_v55 = vadd.f32 %v775_v31, %v774_v61  ;;  %v1020_v37 = vadd.f32 %v1019_v63, %v973_v13  ;;  %v1511_v33 = vadd.f32 %v1510_v23, %v1463_v49  ;;  %v2300_v61 = vlaneseq }
 0x294   : > { %v777_v19 = vrot.slane %v776_v55, 2  ;;  %v1021_v45 = vrot.slane %v1020_v37, 4  ;;  %v4629_v42 = vshrl.u32 %v2300_v61, 7  ;;  %v1568_v61 = vld [vmem:[%s3919_s21 + $0xf8] sm:$0xff] }
 0x295   : > { %v1465_v12 = vpop.xlane.xlu1 %1464  ;;  %v1219_v54 = vpop.xlane.xlu0 %1218 }
 0x296   : > { %v1512_v35 = vadd.f32 %v1511_v33, %v1465_v12  ;;  %v778_v3 = vadd.f32 %v777_v19, %v776_v55  ;;  %v1022_v0 = vadd.f32 %v1021_v45, %v1020_v37  ;;  %v1266_v24 = vadd.f32 %v1265_v47, %v1219_v54  ;;  %7049 = vst [vmem:[#allocation56_spill] sm:$0xff] %v4629_v42  ;;  %v1537_v19 = vld [vmem:[%s3919_s21] sm:$0xff]  ;;  %v1538_v45 = vld [vmem:[%s3919_s21 + $0x8] sm:$0xff]  ;;  %v1539_v12 = vld [vmem:[%s3919_s21 + $0x10] sm:$0xff] }
 0x297   : > { %v6939_v60 = vsub.s32 0, %v4629_v42  ;;  %v1541_v54 = vld [vmem:[%s3919_s21 + $0x20] sm:$0xff] }
 0x298   : > { %v1513_v39 = vrot.slane %v1512_v35, 4  ;;  %v779_v48 = vrot.slane %v778_v3, 1  ;;  %v1023_v30 = vrot.slane %v1022_v0, 2  ;;  %v1267_v21 = vrot.slane %v1266_v24, 4  ;;  %v2259_v42 = vld [vmem:[#allocation4 + $0x40] sm:$0xff] }
 0x29a   : > { %v1514_v17 = vadd.f32 %v1513_v39, %v1512_v35  ;;  %v780_v25 = vadd.f32 %v779_v48, %v778_v3  ;;  %v1024_v1 = vadd.f32 %v1023_v30, %v1022_v0  ;;  %v1268_v53 = vadd.f32 %v1267_v21, %v1266_v24  ;;  %v1540_v35 = vld [vmem:[%s3919_s21 + $0x18] sm:$0xff]  ;;  %v1543_v3 = vld [vmem:[%s3919_s21 + $0x30] sm:$0xff]  ;;  %v1545_v24 = vld [vmem:[%s3919_s21 + $0x40] sm:$0xff] }
 0x29b   : > { %v1544_v0 = vld [vmem:[%s3919_s21 + $0x38] sm:$0xff]  ;;  %v1546_v48 = vld [vmem:[%s3919_s21 + $0x48] sm:$0xff]  ;;  %v1547_v30 = vld [vmem:[%s3919_s21 + $0x50] sm:$0xff] }
 0x29c   : > { %v1515_v36 = vrot.slane %v1514_v17, 2  ;;  %v1025_v41 = vrot.slane %v1024_v1, 1  ;;  %v1269_v15 = vrot.slane %v1268_v53, 2  ;;  %v1520_v18 = vsel %vm1519_vm1, %v534_v34, %v780_v25  ;;  %v1548_v21 = vld [vmem:[%s3919_s21 + $0x58] sm:$0xff]  ;;  %v1550_v34 = vld [vmem:[%s3919_s21 + $0x68] sm:$0xff]  ;;  %v1551_v25 = vld [vmem:[%s3919_s21 + $0x70] sm:$0xff] }
 0x29e   : > { %v1516_v8 = vadd.f32 %v1515_v36, %v1514_v17  ;;  %v1026_v6 = vadd.f32 %v1025_v41, %v1024_v1  ;;  %v1270_v43 = vadd.f32 %v1269_v15, %v1268_v53  ;;  %v1549_v17 = vld [vmem:[%s3919_s21 + $0x60] sm:$0xff]  ;;  %v1552_v1 = vld [vmem:[%s3919_s21 + $0x78] sm:$0xff]  ;;  %v1554_v36 = vld [vmem:[%s3919_s21 + $0x88] sm:$0xff] }
 0x29f   : > { %v1553_v53 = vld [vmem:[%s3919_s21 + $0x80] sm:$0xff]  ;;  %v1555_v41 = vld [vmem:[%s3919_s21 + $0x90] sm:$0xff]  ;;  %v1556_v15 = vld [vmem:[%s3919_s21 + $0x98] sm:$0xff] }
 0x2a0   : > { %v1517_v5 = vrot.slane %v1516_v8, 1  ;;  %v1271_v9 = vrot.slane %v1270_v43, 1  ;;  %v1522_v56 = vsel %vm1521_vm2, %v1520_v18, %v1026_v6  ;;  %v1557_v18 = vld [vmem:[%s3919_s21 + $0xa0] sm:$0xff]  ;;  %v1558_v6 = vld [vmem:[%s3919_s21 + $0xa8] sm:$0xff] }
 0x2a2   : > { %v1518_v50 = vadd.f32 %v1517_v5, %v1516_v8  ;;  %v1272_v52 = vadd.f32 %v1271_v9, %v1270_v43  ;;  %v1559_v43 = vld [vmem:[%s3919_s21 + $0xb0] sm:$0xff]  ;;  %v1560_v5 = vld [vmem:[%s3919_s21 + $0xb8] sm:$0xff]  ;;  %v1561_v9 = vld [vmem:[%s3919_s21 + $0xc0] sm:$0xff] }
 0x2a4   : > { %v1524_v44 = vsel %vm1523_vm3, %v1522_v56, %v1272_v52 }
 0x2a5   : > { %v1526_v62 = vsel %vm1525_vm4, %v1524_v44, %v1518_v50 }
 0x2a6   : > { %v1528_v46 = vsel %vm1527_vm5, %v1526_v62, -inf }
 0x2a7   : > { %1529 = vmax.xlane.f32.xlu0 %v1528_v46  ;;  %v1563_v46 = vld [vmem:[%s3919_s21 + $0xd0] sm:$0xff] }
 0x334   : > { %v1530_v11 = vpop.xlane.xlu0 %1529 }
 0x335   : > { %v1531_v38 = vsub.f32 %v1526_v62, %v1530_v11  ;;  %v2238_v40 = vmax.f32 %v2237_v59, %v1530_v11  ;;  %v1562_v62 = vld [vmem:[%s3919_s21 + $0xc8] sm:$0xff] }
 0x337   : > { %v1532_v32 = vmul.f32 1.442695, %v1531_v38  ;;  %v2239_v26 = vsub.f32 %v2237_v59, %v2238_v40  ;;  %2504 = vst.msk [vmem:[#allocation2] sm:$0x1] %vm2249_vm6, %v2238_v40  ;;  %v2242_v13 = vsub.f32 %v1530_v11, %v2238_v40  ;;  %v1565_v59 = vld [vmem:[%s3919_s21 + $0xe0] sm:$0xff] }
 0x339   : > { %3698 = vpow2.f32 %v1532_v32  ;;  %v2240_v29 = vmul.f32 1.442695, %v2239_v26  ;;  %v2243_v51 = vmul.f32 1.442695, %v2242_v13  ;;  %v1566_v26 = vld [vmem:[%s3919_s21 + $0xe8] sm:$0xff] }
 0x33b   : > { %3700 = vpow2.f32 %v2240_v29  ;;  %v1567_v29 = vld [vmem:[%s3919_s21 + $0xf0] sm:$0xff] }
 0x33c   : > { %3702 = vpow2.f32 %v2243_v51 }
 0x343   : > { %v3699_v63 = vpop.eup %3698 }
 0x344   : > { %1836 = vrot.lane.b32.xlu0 %v3699_v63, %s3872_s18  ;;  %1686 = vrot.lane.b32.xlu1 %v3699_v63, %s3873_s5  ;;  %3660 = vpush %v3699_v63  ;;  %v1534_v23 = vsel %vm1527_vm5, %v3699_v63, 0.0 }
 0x345   : > { %v4632_v31 = vpop.eup %3700 }
 0x346   : > { %7050 = vst [vmem:[#allocation57_spill] sm:$0xff] %v4632_v31  ;;  %v2303_v49 = vrot.slane %v4632_v31, %v6939_v60  ;;  %v4638_v47 = vpop.eup %3702 }
 0x347   : > { %7051 = vst [vmem:[#allocation58_spill] sm:$0xff] %v4638_v47 }
 0x348   : > { %2305 = vperm.xlu0 %3697, %v2303_v49   ;;  %1986 = vrot.lane.b32.xlu1 %v3699_v63, %s3874_s6 }
 0x34c   : > { %2136 = vrot.lane.b32.xlu1 %v3699_v63, %s3875_s7  ;;  %v1569_v63 = vld [vmem:[%s3919_s21 + $0x100] sm:$0xff] }
 0x370   : > { %1535 = vadd.xlane.f32.xlu1 %v1534_v23 }
 0x375   : > { %s3661_s8 = spop %3660 }
 0x376   : > { %v4650_v39 = vstv %s3661_s8 }
 0x377   : > { %v4665_v8 = vmul.f32 %v4650_v39, %v1537_v19  ;;  %v4672_v56 = vmul.f32 %v4650_v39, %v1538_v45  ;;  %v4675_v50 = vmul.f32 %v4650_v39, %v1539_v12  ;;  %v4678_v52 = vmul.f32 %v4650_v39, %v1540_v35 }
 0x378   : > { %v4681_v44 = vmul.f32 %v4650_v39, %v1541_v54  ;;  %v4688_v11 = vmul.f32 %v4650_v39, %v1542_v58  ;;  %v4691_v38 = vmul.f32 %v4650_v39, %v1543_v3  ;;  %v4694_v40 = vmul.f32 %v4650_v39, %v1544_v0  ;;  %v1574_v54 = vld [vmem:[%s3919_s21 + $0x128] sm:$0xff]  ;;  %v1575_v58 = vld [vmem:[%s3919_s21 + $0x130] sm:$0xff]  ;;  %v1576_v3 = vld [vmem:[%s3919_s21 + $0x138] sm:$0xff] }
 0x379   : > { %v4697_v32 = vmul.f32 %v4650_v39, %v1545_v24  ;;  %v4704_v49 = vmul.f32 %v4650_v39, %v1546_v48  ;;  %v4707_v23 = vmul.f32 %v4650_v39, %v1547_v30  ;;  %v4710_v13 = vmul.f32 %v4650_v39, %v1548_v21  ;;  %v1577_v0 = vld [vmem:[%s3919_s21 + $0x140] sm:$0xff] }
 0x37a   : > { %v4713_v51 = vmul.f32 %v4650_v39, %v1549_v17  ;;  %v4720_v19 = vmul.f32 %v4650_v39, %v1550_v34  ;;  %v4723_v45 = vmul.f32 %v4650_v39, %v1551_v25  ;;  %v4726_v12 = vmul.f32 %v4650_v39, %v1552_v1  ;;  %v1578_v17 = vld [vmem:[%s3919_s21 + $0x148] sm:$0xff]  ;;  %v1579_v34 = vld [vmem:[%s3919_s21 + $0x150] sm:$0xff]  ;;  %v1580_v25 = vld [vmem:[%s3919_s21 + $0x158] sm:$0xff] }
 0x37b   : > { %7052 = vst [vmem:[#allocation59_spill] sm:$0xff] %v4710_v13  ;;  %v4729_v35 = vmul.f32 %v4650_v39, %v1553_v53  ;;  %v4736_v24 = vmul.f32 %v4650_v39, %v1554_v36  ;;  %v4739_v48 = vmul.f32 %v4650_v39, %v1555_v41  ;;  %v4742_v30 = vmul.f32 %v4650_v39, %v1556_v15  ;;  %v1581_v1 = vld [vmem:[%s3919_s21 + $0x160] sm:$0xff]  ;;  %v1582_v15 = vld [vmem:[%s3919_s21 + $0x168] sm:$0xff] }
 0x37c   : > { %7053 = vst [vmem:[#allocation60_spill] sm:$0xff] %v4713_v51  ;;  %7054 = vst [vmem:[#allocation61_spill] sm:$0xff] %v4720_v19  ;;  %v4745_v21 = vmul.f32 %v4650_v39, %v1557_v18  ;;  %v4752_v53 = vmul.f32 %v4650_v39, %v1558_v6  ;;  %v4755_v60 = vmul.f32 %v4650_v39, %v1559_v43  ;;  %v1584_v18 = vld [vmem:[%s3919_s21 + $0x178] sm:$0xff]  ;;  %v3508_v51 = vld [vmem:[%s3919_s21 + $0x2f0] sm:$0xff] }
 0x37d   : > { %7055 = vst [vmem:[#allocation62_spill] sm:$0xff] %v4723_v45  ;;  %7056 = vst [vmem:[#allocation63_spill] sm:$0xff] %v4726_v12  ;;  %v4758_v36 = vmul.f32 %v4650_v39, %v1560_v5  ;;  %v4761_v41 = vmul.f32 %v4650_v39, %v1561_v9  ;;  %v4767_v20 = vmul.f32 %v4650_v39, %v1562_v62  ;;  %v2251_v5 = vld [vmem:[#allocation4] sm:$0xff] }
 0x37e   : > { %7057 = vst [vmem:[#allocation64_spill] sm:$0xff] %v4729_v35  ;;  %7058 = vst [vmem:[#allocation65_spill] sm:$0xff] %v4736_v24  ;;  %v4770_v22 = vmul.f32 %v4650_v39, %v1563_v46  ;;  %v4773_v6 = vmul.f32 %v4650_v39, %v1564_v57  ;;  %v4776_v43 = vmul.f32 %v4650_v39, %v1565_v59  ;;  %v2252_v46 = vld [vmem:[#allocation4 + $0x8] sm:$0xff]  ;;  %v2254_v57 = vld [vmem:[#allocation4 + $0x18] sm:$0xff] }
 0x37f   : > { %7059 = vst [vmem:[#allocation66_spill] sm:$0xff] %v4739_v48  ;;  %7060 = vst [vmem:[#allocation67_spill] sm:$0xff] %v4742_v30  ;;  %v4779_v14 = vmul.f32 %v4650_v39, %v1566_v26  ;;  %v4782_v9 = vmul.f32 %v4650_v39, %v1567_v29  ;;  %v4785_v16 = vmul.f32 %v4650_v39, %v1568_v61  ;;  %v2256_v61 = vld [vmem:[#allocation4 + $0x28] sm:$0xff]  ;;  %v3506_v45 = vld [vmem:[%s3919_s21 + $0x2e0] sm:$0xff] }
 0x380   : > { %7061 = vst [vmem:[#allocation68_spill] sm:$0xff] %v4745_v21  ;;  %7062 = vst [vmem:[#allocation69_spill] sm:$0xff] %v4752_v53  ;;  %v4788_v62 = vmul.f32 %v4650_v39, %v1569_v63  ;;  %v2258_v63 = vld [vmem:[#allocation4 + $0x38] sm:$0xff]  ;;  %v4805_v31 = vmul.f32 %v4650_v39, %v1574_v54  ;;  %v4823_v54 = vmul.f32 %v4650_v39, %v1580_v25  ;;  %v3499_v21 = vld [vmem:[%s3919_s21 + $0x2a8] sm:$0xff] }
 0x381   : > { %7063 = vst [vmem:[#allocation70_spill] sm:$0xff] %v4755_v60  ;;  %7064 = vst [vmem:[#allocation71_spill] sm:$0xff] %v4758_v36  ;;  %v2270_v25 = vld [vmem:[#allocation4 + $0x98] sm:$0xff]  ;;  %v3503_v35 = vld [vmem:[%s3919_s21 + $0x2c8] sm:$0xff] }
 0x382   : > { %7065 = vst [vmem:[#allocation72_spill] sm:$0xff] %v4761_v41  ;;  %7066 = vst [vmem:[#allocation73_spill] sm:$0xff] %v4767_v20  ;;  %v3496_v41 = vld [vmem:[%s3919_s21 + $0x290] sm:$0xff]  ;;  %v3497_v36 = vld [vmem:[%s3919_s21 + $0x298] sm:$0xff] }
 0x383   : > { %7067 = vst [vmem:[#allocation74_spill] sm:$0xff] %v4770_v22  ;;  %7068 = vst [vmem:[#allocation75_spill] sm:$0xff] %v4773_v6  ;;  %v3493_v6 = vld [vmem:[%s3919_s21 + $0x278] sm:$0xff]  ;;  %v3494_v22 = vld [vmem:[%s3919_s21 + $0x280] sm:$0xff] }
 0x384   : > { %7069 = vst [vmem:[#allocation76_spill] sm:$0xff] %v4776_v43  ;;  %7070 = vst [vmem:[#allocation77_spill] sm:$0xff] %v4779_v14 }
 0x385   : > { %7071 = vst [vmem:[#allocation78_spill] sm:$0xff] %v4782_v9  ;;  %7072 = vst [vmem:[#allocation79_spill] sm:$0xff] %v4785_v16  ;;  %v2274_v16 = vld [vmem:[#allocation4 + $0xb8] sm:$0xff]  ;;  %v2275_v9 = vld [vmem:[#allocation4 + $0xc0] sm:$0xff] }
 0x386   : > { %7073 = vst [vmem:[#allocation80_spill] sm:$0xff] %v4788_v62  ;;  %7078 = vst [vmem:[#allocation85_spill] sm:$0xff] %v4805_v31  ;;  %v4820_v62 = vmul.f32 %v4650_v39, %v1579_v34  ;;  %v4832_v31 = vmul.f32 %v4650_v39, %v1583_v28  ;;  %v2268_v34 = vld [vmem:[#allocation4 + $0x88] sm:$0xff] }
 0x387   : > { %7084 = vst [vmem:[#allocation91_spill] sm:$0xff] %v4823_v54  ;;  %v2271_v54 = vld [vmem:[#allocation4 + $0xa0] sm:$0xff] }
 0x388   : > { %7083 = vst [vmem:[#allocation90_spill] sm:$0xff] %v4820_v62  ;;  %7087 = vst [vmem:[#allocation94_spill] sm:$0xff] %v4832_v31  ;;  %v2269_v62 = vld [vmem:[#allocation4 + $0x90] sm:$0xff] }
 0x389   : > { %v2277_v31 = vld [vmem:[#allocation4 + $0xd0] sm:$0xff] }
 0x3b6   : > { %v1837_v27 = vpop.permute.xlu0 %1836  ;;  %v1687_v55 = vpop.permute.xlu1 %1686 }
 0x3b7   : > { %3662 = vpush %v1687_v55  ;;  %v1571_v55 = vld [vmem:[%s3919_s21 + $0x110] sm:$0xff] }
 0x3b8   : > { %3664 = vpush %v1837_v27  ;;  %v1570_v27 = vld [vmem:[%s3919_s21 + $0x108] sm:$0xff]  ;;  %v4794_v10 = vmul.f32 %v4650_v39, %v1571_v55  ;;  %v4811_v55 = vmul.f32 %v4650_v39, %v1576_v3 }
 0x3b9   : > { %v4791_v59 = vmul.f32 %v4650_v39, %v1570_v27  ;;  %v4808_v27 = vmul.f32 %v4650_v39, %v1575_v58  ;;  %v4826_v58 = vmul.f32 %v4650_v39, %v1581_v1  ;;  %v2264_v3 = vld [vmem:[#allocation4 + $0x68] sm:$0xff] }
 0x3ba   : > { %v1987_v37 = vpop.permute.xlu1 %1986  ;;  %7075 = vst [vmem:[#allocation82_spill] sm:$0xff] %v4794_v10  ;;  %7080 = vst [vmem:[#allocation87_spill] sm:$0xff] %v4811_v55  ;;  %v2263_v10 = vld [vmem:[#allocation4 + $0x60] sm:$0xff]  ;;  %v2265_v55 = vld [vmem:[#allocation4 + $0x70] sm:$0xff] }
 0x3bb   : > { %3666 = vpush %v1987_v37  ;;  %v1572_v37 = vld [vmem:[%s3919_s21 + $0x118] sm:$0xff]  ;;  %7074 = vst [vmem:[#allocation81_spill] sm:$0xff] %v4791_v59  ;;  %v4817_v59 = vmul.f32 %v4650_v39, %v1578_v17  ;;  %v4835_v17 = vmul.f32 %v4650_v39, %v1584_v18 }
 0x3bc   : > { %v4797_v26 = vmul.f32 %v4650_v39, %v1572_v37  ;;  %7079 = vst [vmem:[#allocation86_spill] sm:$0xff] %v4808_v27  ;;  %v4814_v37 = vmul.f32 %v4650_v39, %v1577_v0  ;;  %7085 = vst [vmem:[#allocation92_spill] sm:$0xff] %v4826_v58  ;;  %v2266_v0 = vld [vmem:[#allocation4 + $0x78] sm:$0xff]  ;;  %v4829_v27 = vmul.f32 %v4650_v39, %v1582_v15  ;;  %v2272_v58 = vld [vmem:[#allocation4 + $0xa8] sm:$0xff] }
 0x3bd   : > { %7082 = vst [vmem:[#allocation89_spill] sm:$0xff] %v4817_v59  ;;  %7088 = vst [vmem:[#allocation95_spill] sm:$0xff] %v4835_v17  ;;  %v2273_v59 = vld [vmem:[#allocation4 + $0xb0] sm:$0xff]  ;;  %v2276_v17 = vld [vmem:[#allocation4 + $0xc8] sm:$0xff] }
 0x3be   : > { %v2137_v33 = vpop.permute.xlu1 %2136  ;;  %7076 = vst [vmem:[#allocation83_spill] sm:$0xff] %v4797_v26  ;;  %7081 = vst [vmem:[#allocation88_spill] sm:$0xff] %v4814_v37  ;;  %v2262_v26 = vld [vmem:[#allocation4 + $0x58] sm:$0xff]  ;;  %v2267_v37 = vld [vmem:[#allocation4 + $0x80] sm:$0xff] }
 0x3bf   : > { %3668 = vpush %v2137_v33  ;;  %v1573_v33 = vld [vmem:[%s3919_s21 + $0x120] sm:$0xff]  ;;  %7086 = vst [vmem:[#allocation93_spill] sm:$0xff] %v4829_v27 }
 0x3c0   : > { %3670 = vpush %v4638_v47  ;;  %v4800_v29 = vmul.f32 %v4650_v39, %v1573_v33  ;;  %v2260_v33 = vld [vmem:[#allocation4 + $0x48] sm:$0xff] }
 0x3c2   : > { %7077 = vst [vmem:[#allocation84_spill] sm:$0xff] %v4800_v29  ;;  %v2261_v29 = vld [vmem:[#allocation4 + $0x50] sm:$0xff] }
 0x3c7   : > { %v4802_v47 = vpop.permute.xlu0 %2305 }
 0x3c8   : > { %v4838_v1 = vmul.f32 %v4802_v47, %v2251_v5  ;;  %v4841_v15 = vmul.f32 %v4802_v47, %v2252_v46  ;;  %v4844_v28 = vmul.f32 %v4802_v47, %v2253_v7  ;;  %v4847_v39 = vmul.f32 %v4802_v47, %v2254_v57  ;;  %v2278_v5 = vld [vmem:[#allocation4 + $0xd8] sm:$0xff]  ;;  %v2280_v57 = vld [vmem:[#allocation4 + $0xe8] sm:$0xff] }
 0x3c9   : > { %v4850_v18 = vmul.f32 %v4802_v47, %v2255_v2  ;;  %v4853_v27 = vmul.f32 %v4802_v47, %v2256_v61  ;;  %v4856_v14 = vmul.f32 %v4802_v47, %v2257_v4  ;;  %v4859_v46 = vmul.f32 %v4802_v47, %v2258_v63  ;;  %v2282_v2 = vld [vmem:[#allocation4 + $0xf8] sm:$0xff]  ;;  %v2284_v63 = vld [vmem:[#allocation4 + $0x108] sm:$0xff] }
 0x3ca   : > { %7089 = vst [vmem:[#allocation96_spill] sm:$0xff] %v4838_v1  ;;  %7090 = vst [vmem:[#allocation97_spill] sm:$0xff] %v4841_v15  ;;  %v2279_v1 = vld [vmem:[#allocation4 + $0xe0] sm:$0xff]  ;;  %v4862_v7 = vmul.f32 %v4802_v47, %v2259_v42  ;;  %v4868_v15 = vmul.f32 %v4802_v47, %v2261_v29  ;;  %v4871_v61 = vmul.f32 %v4802_v47, %v2262_v26  ;;  %v2286_v42 = vld [vmem:[#allocation4 + $0x118] sm:$0xff] }
 0x3cb   : > { %7091 = vst [vmem:[#allocation98_spill] sm:$0xff] %v4844_v28  ;;  %7092 = vst [vmem:[#allocation99_spill] sm:$0xff] %v4847_v39  ;;  %v2281_v39 = vld [vmem:[#allocation4 + $0xf0] sm:$0xff]  ;;  %v4865_v28 = vmul.f32 %v4802_v47, %v2260_v33  ;;  %v4874_v4 = vmul.f32 %v4802_v47, %v2263_v10  ;;  %v4883_v33 = vmul.f32 %v4802_v47, %v2266_v0  ;;  %v2288_v26 = vld [vmem:[#allocation4 + $0x128] sm:$0xff] }
 0x3cc   : > { %7093 = vst [vmem:[#allocation100_spill] sm:$0xff] %v4850_v18  ;;  %7094 = vst [vmem:[#allocation101_spill] sm:$0xff] %v4853_v27  ;;  %v2283_v18 = vld [vmem:[#allocation4 + $0x100] sm:$0xff]  ;;  %v4880_v27 = vmul.f32 %v4802_v47, %v2265_v55  ;;  %v4886_v29 = vmul.f32 %v4802_v47, %v2267_v37  ;;  %v2290_v10 = vld [vmem:[#allocation4 + $0x138] sm:$0xff]  ;;  %v4898_v55 = vmul.f32 %v4802_v47, %v2271_v54 }
 0x3cd   : > { %7095 = vst [vmem:[#allocation102_spill] sm:$0xff] %v4856_v14  ;;  %7096 = vst [vmem:[#allocation103_spill] sm:$0xff] %v4859_v46  ;;  %v2285_v46 = vld [vmem:[#allocation4 + $0x110] sm:$0xff]  ;;  %v4877_v14 = vmul.f32 %v4802_v47, %v2264_v3  ;;  %v4895_v3 = vmul.f32 %v4802_v47, %v2270_v25  ;;  %v2292_v0 = vld [vmem:[#allocation4 + $0x148] sm:$0xff]  ;;  %v4910_v54 = vmul.f32 %v4802_v47, %v2275_v9 }
 0x3ce   : > { %7097 = vst [vmem:[#allocation104_spill] sm:$0xff] %v4862_v7  ;;  %7098 = vst [vmem:[#allocation105_spill] sm:$0xff] %v4865_v28  ;;  %v2287_v7 = vld [vmem:[#allocation4 + $0x120] sm:$0xff]  ;;  %v4892_v28 = vmul.f32 %v4802_v47, %v2269_v62  ;;  %v2294_v37 = vld [vmem:[#allocation4 + $0x158] sm:$0xff]  ;;  %v4907_v62 = vmul.f32 %v4802_v47, %v2274_v16  ;;  %v4922_v16 = vmul.f32 %v4802_v47, %v2279_v1 }
 0x3cf   : > { %7099 = vst [vmem:[#allocation106_spill] sm:$0xff] %v4868_v15  ;;  %7100 = vst [vmem:[#allocation107_spill] sm:$0xff] %v4871_v61  ;;  %v2289_v61 = vld [vmem:[#allocation4 + $0x130] sm:$0xff]  ;;  %v4889_v15 = vmul.f32 %v4802_v47, %v2268_v34  ;;  %v4904_v34 = vmul.f32 %v4802_v47, %v2273_v59  ;;  %v2296_v25 = vld [vmem:[#allocation4 + $0x168] sm:$0xff]  ;;  %v4919_v59 = vmul.f32 %v4802_v47, %v2278_v5 }
 0x3d0   : > { %7101 = vst [vmem:[#allocation108_spill] sm:$0xff] %v4874_v4  ;;  %7102 = vst [vmem:[#allocation109_spill] sm:$0xff] %v4877_v14  ;;  %v2291_v4 = vld [vmem:[#allocation4 + $0x140] sm:$0xff]  ;;  %v4925_v9 = vmul.f32 %v4802_v47, %v2280_v57  ;;  %v3465_v1 = vld [vmem:[%s3919_s21 + $0x198] sm:$0xff]  ;;  %v4941_v57 = vmul.f32 %v4802_v47, %v2284_v63  ;;  %v4957_v63 = vmul.f32 %v4802_v47, %v2288_v26 }
 0x3d1   : > { %7103 = vst [vmem:[#allocation110_spill] sm:$0xff] %v4880_v27  ;;  %7104 = vst [vmem:[#allocation111_spill] sm:$0xff] %v4883_v33  ;;  %v2293_v33 = vld [vmem:[#allocation4 + $0x150] sm:$0xff]  ;;  %v4901_v27 = vmul.f32 %v4802_v47, %v2272_v58  ;;  %v4916_v58 = vmul.f32 %v4802_v47, %v2277_v31  ;;  %v4934_v31 = vmul.f32 %v4802_v47, %v2283_v18  ;;  %v3463_v5 = vld [vmem:[%s3919_s21 + $0x188] sm:$0xff] }
 0x3d2   : > { %7105 = vst [vmem:[#allocation112_spill] sm:$0xff] %v4886_v29  ;;  %7106 = vst [vmem:[#allocation113_spill] sm:$0xff] %v4889_v15  ;;  %v2295_v29 = vld [vmem:[#allocation4 + $0x160] sm:$0xff]  ;;  %v4950_v18 = vmul.f32 %v4802_v47, %v2287_v7  ;;  %v4966_v7 = vmul.f32 %v4802_v47, %v2291_v4  ;;  %v4973_v26 = vmul.f32 %v4802_v47, %v2292_v0 }
 0x3d3   : > { %7107 = vst [vmem:[#allocation114_spill] sm:$0xff] %v4892_v28  ;;  %7108 = vst [vmem:[#allocation115_spill] sm:$0xff] %v4895_v3  ;;  %v2298_v3 = vld [vmem:[#allocation4 + $0x178] sm:$0xff]  ;;  %v4913_v28 = vmul.f32 %v4802_v47, %v2276_v17  ;;  %v4931_v17 = vmul.f32 %v4802_v47, %v2282_v2  ;;  %v4947_v2 = vmul.f32 %v4802_v47, %v2286_v42  ;;  %v3491_v14 = vld [vmem:[%s3919_s21 + $0x268] sm:$0xff] }
 0x3d4   : > { %7109 = vst [vmem:[#allocation116_spill] sm:$0xff] %v4898_v55  ;;  %7110 = vst [vmem:[#allocation117_spill] sm:$0xff] %v4901_v27  ;;  %v2297_v55 = vld [vmem:[#allocation4 + $0x170] sm:$0xff]  ;;  %v4963_v42 = vmul.f32 %v4802_v47, %v2290_v10  ;;  %v4979_v10 = vmul.f32 %v4802_v47, %v2294_v37  ;;  %v4982_v4 = vmul.f32 %v4802_v47, %v2295_v29  ;;  %v3478_v29 = vld [vmem:[%s3919_s21 + $0x200] sm:$0xff] }
 0x3d5   : > { %7111 = vst [vmem:[#allocation118_spill] sm:$0xff] %v4904_v34  ;;  %7112 = vst [vmem:[#allocation119_spill] sm:$0xff] %v4907_v62  ;;  %v4989_v0 = vmul.f32 %v4802_v47, %v2296_v25  ;;  %v4995_v37 = vmul.f32 %v4802_v47, %v2298_v3  ;;  %v3483_v25 = vld [vmem:[%s3919_s21 + $0x228] sm:$0xff]  ;;  %v3488_v34 = vld [vmem:[%s3919_s21 + $0x250] sm:$0xff] }
 0x3d6   : > { %7113 = vst [vmem:[#allocation120_spill] sm:$0xff] %v4910_v54  ;;  %7114 = vst [vmem:[#allocation121_spill] sm:$0xff] %v4913_v28  ;;  %v4928_v54 = vmul.f32 %v4802_v47, %v2281_v39  ;;  %v4944_v39 = vmul.f32 %v4802_v47, %v2285_v46  ;;  %v4960_v46 = vmul.f32 %v4802_v47, %v2289_v61  ;;  %v3485_v28 = vld [vmem:[%s3919_s21 + $0x238] sm:$0xff]  ;;  %v3487_v62 = vld [vmem:[%s3919_s21 + $0x248] sm:$0xff] }
 0x3d7   : > { %7115 = vst [vmem:[#allocation122_spill] sm:$0xff] %v4916_v58  ;;  %7116 = vst [vmem:[#allocation123_spill] sm:$0xff] %v4919_v59  ;;  %v3462_v58 = vld [vmem:[%s3919_s21 + $0x180] sm:$0xff]  ;;  %v3464_v59 = vld [vmem:[%s3919_s21 + $0x190] sm:$0xff]  ;;  %v4976_v61 = vmul.f32 %v4802_v47, %v2293_v33  ;;  %v4992_v33 = vmul.f32 %v4802_v47, %v2297_v55 }
 0x3d8   : > { %7117 = vst [vmem:[#allocation124_spill] sm:$0xff] %v4922_v16  ;;  %7118 = vst [vmem:[#allocation125_spill] sm:$0xff] %v4925_v9  ;;  %v3469_v9 = vld [vmem:[%s3919_s21 + $0x1b8] sm:$0xff]  ;;  %v3482_v16 = vld [vmem:[%s3919_s21 + $0x220] sm:$0xff] }
 0x3d9   : > { %7119 = vst [vmem:[#allocation126_spill] sm:$0xff] %v4928_v54  ;;  %7120 = vst [vmem:[#allocation127_spill] sm:$0xff] %v4931_v17  ;;  %v3467_v17 = vld [vmem:[%s3919_s21 + $0x1a8] sm:$0xff]  ;;  %v3468_v54 = vld [vmem:[%s3919_s21 + $0x1b0] sm:$0xff] }
 0x3da   : > { %7121 = vst [vmem:[#allocation128_spill] sm:$0xff] %v4934_v31  ;;  %7122 = vst [vmem:[#allocation129_spill] sm:$0xff] %v4941_v57  ;;  %v3466_v31 = vld [vmem:[%s3919_s21 + $0x1a0] sm:$0xff]  ;;  %v3473_v57 = vld [vmem:[%s3919_s21 + $0x1d8] sm:$0xff] }
 0x3db   : > { %7123 = vst [vmem:[#allocation130_spill] sm:$0xff] %v4944_v39  ;;  %7124 = vst [vmem:[#allocation131_spill] sm:$0xff] %v4947_v2  ;;  %v3471_v2 = vld [vmem:[%s3919_s21 + $0x1c8] sm:$0xff]  ;;  %v3472_v39 = vld [vmem:[%s3919_s21 + $0x1d0] sm:$0xff] }
 0x3dc   : > { %7125 = vst [vmem:[#allocation132_spill] sm:$0xff] %v4950_v18  ;;  %7126 = vst [vmem:[#allocation133_spill] sm:$0xff] %v4957_v63  ;;  %v3470_v18 = vld [vmem:[%s3919_s21 + $0x1c0] sm:$0xff]  ;;  %v3477_v63 = vld [vmem:[%s3919_s21 + $0x1f8] sm:$0xff] }
 0x3dd   : > { %7127 = vst [vmem:[#allocation134_spill] sm:$0xff] %v4960_v46  ;;  %7128 = vst [vmem:[#allocation135_spill] sm:$0xff] %v4963_v42  ;;  %v3475_v42 = vld [vmem:[%s3919_s21 + $0x1e8] sm:$0xff]  ;;  %v3476_v46 = vld [vmem:[%s3919_s21 + $0x1f0] sm:$0xff] }
 0x3de   : > { %7129 = vst [vmem:[#allocation136_spill] sm:$0xff] %v4966_v7  ;;  %7130 = vst [vmem:[#allocation137_spill] sm:$0xff] %v4973_v26  ;;  %v3474_v7 = vld [vmem:[%s3919_s21 + $0x1e0] sm:$0xff] }
 0x3df   : > { %7131 = vst [vmem:[#allocation138_spill] sm:$0xff] %v4976_v61  ;;  %7132 = vst [vmem:[#allocation139_spill] sm:$0xff] %v4979_v10  ;;  %v3480_v10 = vld [vmem:[%s3919_s21 + $0x210] sm:$0xff]  ;;  %v3481_v61 = vld [vmem:[%s3919_s21 + $0x218] sm:$0xff] }
 0x3e0   : > { %7133 = vst [vmem:[#allocation140_spill] sm:$0xff] %v4982_v4  ;;  %7134 = vst [vmem:[#allocation141_spill] sm:$0xff] %v4989_v0  ;;  %v3479_v4 = vld [vmem:[%s3919_s21 + $0x208] sm:$0xff]  ;;  %v3484_v0 = vld [vmem:[%s3919_s21 + $0x230] sm:$0xff] }
 0x3e1   : > { %7135 = vst [vmem:[#allocation142_spill] sm:$0xff] %v4992_v33  ;;  %7136 = vst [vmem:[#allocation143_spill] sm:$0xff] %v4995_v37  ;;  %v3486_v33 = vld [vmem:[%s3919_s21 + $0x240] sm:$0xff] }
 0x3e2   : > { %v3490_v15 = vld [vmem:[%s3919_s21 + $0x260] sm:$0xff] }
 0x3e8   : > { %s3663_s9 = spop %3662 }
 0x3e9   : > { %v5001_v26 = vstv %s3663_s9  ;;  %s5207_s10 = spop %3664 }
 0x3ea   : > { %v5008_v55 = vmul.f32 %v3462_v58, %v5001_v26  ;;  %v5011_v47 = vmul.f32 %v3463_v5, %v5001_v26  ;;  %v5014_v3 = vmul.f32 %v3464_v59, %v5001_v26  ;;  %v5017_v37 = vmul.f32 %v3465_v1, %v5001_v26  ;;  %v3489_v1 = vld [vmem:[%s3919_s21 + $0x258] sm:$0xff] }
 0x3eb   : > { %v5023_v27 = vmul.f32 %v3466_v31, %v5001_v26  ;;  %v5026_v58 = vmul.f32 %v3467_v17, %v5001_v26  ;;  %v5029_v5 = vmul.f32 %v3468_v54, %v5001_v26  ;;  %v5032_v59 = vmul.f32 %v3469_v9, %v5001_v26  ;;  %v3492_v9 = vld [vmem:[%s3919_s21 + $0x270] sm:$0xff] }
 0x3ec   : > { %v5038_v43 = vmul.f32 %v3470_v18, %v5001_v26  ;;  %v5041_v31 = vmul.f32 %v3471_v2, %v5001_v26  ;;  %v5044_v17 = vmul.f32 %v3472_v39, %v5001_v26  ;;  %v5047_v54 = vmul.f32 %v3473_v57, %v5001_v26  ;;  %v3495_v57 = vld [vmem:[%s3919_s21 + $0x288] sm:$0xff]  ;;  %s5221_s11 = spop %3666 }
 0x3ed   : > { %v5053_v20 = vmul.f32 %v3474_v7, %v5001_v26  ;;  %v5056_v18 = vmul.f32 %v3475_v42, %v5001_v26  ;;  %v5059_v2 = vmul.f32 %v3476_v46, %v5001_v26  ;;  %v5062_v39 = vmul.f32 %v3477_v63, %v5001_v26  ;;  %v3498_v46 = vld [vmem:[%s3919_s21 + $0x2a0] sm:$0xff]  ;;  %v3500_v63 = vld [vmem:[%s3919_s21 + $0x2b0] sm:$0xff] }
 0x3ee   : > { %7137 = vst [vmem:[#allocation144_spill] sm:$0xff] %v5044_v17  ;;  %7138 = vst [vmem:[#allocation145_spill] sm:$0xff] %v5047_v54  ;;  %v1707_v60 = vmul.f32 %v3478_v29, %v5001_v26  ;;  %v1708_v7 = vmul.f32 %v3479_v4, %v5001_v26  ;;  %v1709_v53 = vmul.f32 %v3480_v10, %v5001_v26  ;;  %v3501_v4 = vld [vmem:[%s3919_s21 + $0x2b8] sm:$0xff]  ;;  %v3502_v10 = vld [vmem:[%s3919_s21 + $0x2c0] sm:$0xff] }
 0x3ef   : > { %7139 = vst [vmem:[#allocation146_spill] sm:$0xff] %v5053_v20  ;;  %7140 = vst [vmem:[#allocation147_spill] sm:$0xff] %v5056_v18  ;;  %v1710_v42 = vmul.f32 %v3481_v61, %v5001_v26  ;;  %v1711_v30 = vmul.f32 %v3482_v16, %v5001_v26  ;;  %v1712_v48 = vmul.f32 %v3483_v25, %v5001_v26  ;;  %v3505_v25 = vld [vmem:[%s3919_s21 + $0x2d8] sm:$0xff]  ;;  %v3507_v20 = vld [vmem:[%s3919_s21 + $0x2e8] sm:$0xff] }
 0x3f0   : > { %7141 = vst [vmem:[#allocation148_spill] sm:$0xff] %v5059_v2  ;;  %7142 = vst [vmem:[#allocation149_spill] sm:$0xff] %v5062_v39  ;;  %v1713_v24 = vmul.f32 %v3484_v0, %v5001_v26  ;;  %v1714_v29 = vmul.f32 %v3485_v28, %v5001_v26  ;;  %v1715_v61 = vmul.f32 %v3486_v33, %v5001_v26  ;;  %v3504_v2 = vld [vmem:[%s3919_s21 + $0x2d0] sm:$0xff]  ;;  %v3509_v33 = vld [vmem:[%s3919_s21 + $0x2f8] sm:$0xff]  ;;  %s5235_s14 = spop %3668 }
 0x3f1   : > { %v1716_v39 = vmul.f32 %v3487_v62, %v5001_v26  ;;  %v1717_v12 = vmul.f32 %v3488_v34, %v5001_v26  ;;  %v1718_v16 = vmul.f32 %v3489_v1, %v5001_v26  ;;  %v1719_v0 = vmul.f32 %v3490_v15, %v5001_v26  ;;  %s3671_s15 = spop %3670 }
 0x3f2   : > { %v1720_v28 = vmul.f32 %v3491_v14, %v5001_v26  ;;  %v1721_v18 = vmul.f32 %v3492_v9, %v5001_v26  ;;  %v1722_v19 = vmul.f32 %v3493_v6, %v5001_v26  ;;  %v1723_v62 = vmul.f32 %v3494_v22, %v5001_v26 }
 0x3f3   : > { %v1724_v34 = vmul.f32 %v3495_v57, %v5001_v26  ;;  %v1725_v1 = vmul.f32 %v3496_v41, %v5001_v26  ;;  %v1726_v54 = vmul.f32 %v3497_v36, %v5001_v26  ;;  %v1727_v13 = vmul.f32 %v3498_v46, %v5001_v26 }
 0x3f4   : > { %v1728_v15 = vmul.f32 %v3499_v21, %v5001_v26  ;;  %v1729_v14 = vmul.f32 %v3500_v63, %v5001_v26  ;;  %v1730_v9 = vmul.f32 %v3501_v4, %v5001_v26  ;;  %v1731_v6 = vmul.f32 %v3502_v10, %v5001_v26  ;;  %v7161_v10 = vld [vmem:[#allocation65_spill] sm:$0xff] }
 0x3f5   : > { %v1732_v17 = vmul.f32 %v3503_v35, %v5001_v26  ;;  %v1733_v22 = vmul.f32 %v3504_v2, %v5001_v26  ;;  %v1734_v57 = vmul.f32 %v3505_v25, %v5001_v26  ;;  %v5108_v41 = vmul.f32 %v3506_v45, %v5001_v26  ;;  %v7159_v2 = vld [vmem:[#allocation64_spill] sm:$0xff] }
 0x3f6   : > { %v5111_v36 = vmul.f32 %v3507_v20, %v5001_v26  ;;  %v5114_v21 = vmul.f32 %v3508_v51, %v5001_v26  ;;  %v5117_v46 = vmul.f32 %v3509_v33, %v5001_v26  ;;  %v5121_v63 = vadd.f32 %v5008_v55, %v4665_v8  ;;  %v7144_v26 = vld [vmem:[#allocation59_spill] sm:$0xff]  ;;  %v7147_v55 = vld [vmem:[#allocation60_spill] sm:$0xff]  ;;  %v7163_v33 = vld [vmem:[#allocation66_spill] sm:$0xff] }
 0x3f7   : > { %v5125_v35 = vadd.f32 %v5011_v47, %v4672_v56  ;;  %v5129_v45 = vadd.f32 %v5014_v3, %v4675_v50  ;;  %v5133_v20 = vadd.f32 %v5017_v37, %v4678_v52  ;;  %v5137_v51 = vadd.f32 %v5023_v27, %v4681_v44  ;;  %v7143_v27 = vld [vmem:[#allocation144_spill] sm:$0xff]  ;;  %v7145_v37 = vld [vmem:[#allocation145_spill] sm:$0xff]  ;;  %v7148_v47 = vld [vmem:[#allocation146_spill] sm:$0xff] }
 0x3f8   : > { %v5141_v8 = vadd.f32 %v5026_v58, %v4688_v11  ;;  %v5145_v56 = vadd.f32 %v5029_v5, %v4691_v38  ;;  %v5149_v50 = vadd.f32 %v5032_v59, %v4694_v40  ;;  %v5153_v52 = vadd.f32 %v5038_v43, %v4697_v32  ;;  %v7150_v3 = vld [vmem:[#allocation61_spill] sm:$0xff]  ;;  %v7151_v58 = vld [vmem:[#allocation147_spill] sm:$0xff]  ;;  %v7153_v43 = vld [vmem:[#allocation62_spill] sm:$0xff] }
 0x3f9   : > { %v5157_v44 = vadd.f32 %v5041_v31, %v4704_v49  ;;  %v5161_v11 = vadd.f32 %v7143_v27, %v4707_v23  ;;  %v5165_v38 = vadd.f32 %v7145_v37, %v7144_v26  ;;  %v5169_v40 = vadd.f32 %v7148_v47, %v7147_v55  ;;  %v7154_v5 = vld [vmem:[#allocation148_spill] sm:$0xff]  ;;  %v7156_v59 = vld [vmem:[#allocation63_spill] sm:$0xff]  ;;  %v7157_v31 = vld [vmem:[#allocation149_spill] sm:$0xff] }
 0x3fa   : > { %v5173_v32 = vadd.f32 %v7151_v58, %v7150_v3  ;;  %v5177_v49 = vadd.f32 %v7154_v5, %v7153_v43  ;;  %v5181_v23 = vadd.f32 %v7157_v31, %v7156_v59  ;;  %v5184_v4 = vadd.f32 %v1707_v60, %v7159_v2  ;;  %v7165_v26 = vld [vmem:[#allocation67_spill] sm:$0xff]  ;;  %v7167_v55 = vld [vmem:[#allocation68_spill] sm:$0xff]  ;;  %v7169_v3 = vld [vmem:[#allocation69_spill] sm:$0xff] }
 0x3fb   : > { %7146 = vst [vmem:[#allocation144_spill] sm:$0xff] %v5165_v38  ;;  %7149 = vst [vmem:[#allocation59_spill] sm:$0xff] %v5169_v40  ;;  %v5187_v25 = vadd.f32 %v1708_v7, %v7161_v10  ;;  %v5190_v27 = vadd.f32 %v1709_v53, %v7163_v33  ;;  %v5193_v37 = vadd.f32 %v1710_v42, %v7165_v26  ;;  %v7171_v43 = vld [vmem:[#allocation70_spill] sm:$0xff]  ;;  %v7173_v60 = vld [vmem:[#allocation71_spill] sm:$0xff] }
 0x3fc   : > { %7152 = vst [vmem:[#allocation145_spill] sm:$0xff] %v5173_v32  ;;  %7155 = vst [vmem:[#allocation60_spill] sm:$0xff] %v5177_v49  ;;  %v5196_v47 = vadd.f32 %v1711_v30, %v7167_v55  ;;  %v5199_v58 = vadd.f32 %v1712_v48, %v7169_v3  ;;  %v5202_v5 = vadd.f32 %v1713_v24, %v7171_v43  ;;  %v7175_v53 = vld [vmem:[#allocation72_spill] sm:$0xff]  ;;  %v7177_v42 = vld [vmem:[#allocation73_spill] sm:$0xff] }
 0x3fd   : > { %7158 = vst [vmem:[#allocation146_spill] sm:$0xff] %v5181_v23  ;;  %7160 = vst [vmem:[#allocation61_spill] sm:$0xff] %v5184_v4  ;;  %v5205_v59 = vadd.f32 %v1714_v29, %v7173_v60  ;;  %v5210_v7 = vadd.f32 %v1715_v61, %v7175_v53  ;;  %v5213_v30 = vadd.f32 %v1716_v39, %v7177_v42  ;;  %v7179_v31 = vld [vmem:[#allocation74_spill] sm:$0xff]  ;;  %v7181_v24 = vld [vmem:[#allocation75_spill] sm:$0xff] }
 0x3fe   : > { %7162 = vst [vmem:[#allocation147_spill] sm:$0xff] %v5187_v25  ;;  %7164 = vst [vmem:[#allocation62_spill] sm:$0xff] %v5190_v27  ;;  %v5216_v48 = vadd.f32 %v1717_v12, %v7179_v31  ;;  %v5219_v2 = vadd.f32 %v1718_v16, %v7181_v24  ;;  %v7183_v29 = vld [vmem:[#allocation76_spill] sm:$0xff]  ;;  %v7185_v33 = vld [vmem:[#allocation77_spill] sm:$0xff] }
 0x3ff   : > { %7166 = vst [vmem:[#allocation148_spill] sm:$0xff] %v5193_v37  ;;  %7168 = vst [vmem:[#allocation63_spill] sm:$0xff] %v5196_v47  ;;  %v5224_v10 = vadd.f32 %v1719_v0, %v7183_v29  ;;  %v5227_v26 = vadd.f32 %v1720_v28, %v7185_v33  ;;  %v7187_v61 = vld [vmem:[#allocation78_spill] sm:$0xff]  ;;  %v7189_v39 = vld [vmem:[#allocation79_spill] sm:$0xff] }
 0x400   : > { %7170 = vst [vmem:[#allocation149_spill] sm:$0xff] %v5199_v58  ;;  %7172 = vst [vmem:[#allocation64_spill] sm:$0xff] %v5202_v5  ;;  %v5230_v55 = vadd.f32 %v1721_v18, %v7187_v61  ;;  %v5233_v3 = vadd.f32 %v1722_v19, %v7189_v39  ;;  %v7191_v12 = vld [vmem:[#allocation80_spill] sm:$0xff]  ;;  %v7193_v0 = vld [vmem:[#allocation81_spill] sm:$0xff] }
 0x401   : > { %7174 = vst [vmem:[#allocation65_spill] sm:$0xff] %v5205_v59  ;;  %7176 = vst [vmem:[#allocation66_spill] sm:$0xff] %v5210_v7  ;;  %v5238_v16 = vadd.f32 %v1723_v62, %v7191_v12  ;;  %v5241_v43 = vadd.f32 %v1724_v34, %v7193_v0  ;;  %v7195_v28 = vld [vmem:[#allocation82_spill] sm:$0xff]  ;;  %v7197_v53 = vld [vmem:[#allocation83_spill] sm:$0xff] }
 0x402   : > { %7178 = vst [vmem:[#allocation67_spill] sm:$0xff] %v5213_v30  ;;  %7180 = vst [vmem:[#allocation68_spill] sm:$0xff] %v5216_v48  ;;  %v5244_v60 = vadd.f32 %v1725_v1, %v7195_v28  ;;  %v5247_v18 = vadd.f32 %v1726_v54, %v7197_v53  ;;  %v3510_v42 = vld [vmem:[%s3919_s21 + $0x300] sm:$0xff]  ;;  %v3511_v31 = vld [vmem:[%s3919_s21 + $0x308] sm:$0xff] }
 0x403   : > { %7182 = vst [vmem:[#allocation69_spill] sm:$0xff] %v5219_v2  ;;  %7184 = vst [vmem:[#allocation70_spill] sm:$0xff] %v5224_v10  ;;  %v3512_v19 = vld [vmem:[%s3919_s21 + $0x310] sm:$0xff]  ;;  %v3513_v24 = vld [vmem:[%s3919_s21 + $0x318] sm:$0xff] }
 0x404   : > { %7186 = vst [vmem:[#allocation71_spill] sm:$0xff] %v5227_v26  ;;  %7188 = vst [vmem:[#allocation72_spill] sm:$0xff] %v5230_v55  ;;  %v7199_v29 = vld [vmem:[#allocation84_spill] sm:$0xff]  ;;  %v7201_v62 = vld [vmem:[#allocation85_spill] sm:$0xff] }
 0x405   : > { %7190 = vst [vmem:[#allocation73_spill] sm:$0xff] %v5233_v3  ;;  %7192 = vst [vmem:[#allocation74_spill] sm:$0xff] %v5238_v16  ;;  %v5254_v33 = vadd.f32 %v1727_v13, %v7199_v29  ;;  %v5257_v34 = vadd.f32 %v1728_v15, %v7201_v62  ;;  %v7203_v61 = vld [vmem:[#allocation86_spill] sm:$0xff]  ;;  %v7205_v39 = vld [vmem:[#allocation87_spill] sm:$0xff] }
 0x406   : > { %7194 = vst [vmem:[#allocation75_spill] sm:$0xff] %v5241_v43  ;;  %7196 = vst [vmem:[#allocation76_spill] sm:$0xff] %v5244_v60  ;;  %v5260_v1 = vadd.f32 %v1729_v14, %v7203_v61  ;;  %v5263_v54 = vadd.f32 %v1730_v9, %v7205_v39  ;;  %v3514_v12 = vld [vmem:[%s3919_s21 + $0x320] sm:$0xff]  ;;  %v3515_v0 = vld [vmem:[%s3919_s21 + $0x328] sm:$0xff] }
 0x407   : > { %7198 = vst [vmem:[#allocation77_spill] sm:$0xff] %v5247_v18  ;;  %7200 = vst [vmem:[#allocation78_spill] sm:$0xff] %v5254_v33  ;;  %v3516_v28 = vld [vmem:[%s3919_s21 + $0x330] sm:$0xff]  ;;  %v3517_v53 = vld [vmem:[%s3919_s21 + $0x338] sm:$0xff] }
 0x408   : > { %7202 = vst [vmem:[#allocation79_spill] sm:$0xff] %v5257_v34  ;;  %7204 = vst [vmem:[#allocation80_spill] sm:$0xff] %v5260_v1  ;;  %v7207_v13 = vld [vmem:[#allocation88_spill] sm:$0xff]  ;;  %v7209_v15 = vld [vmem:[#allocation89_spill] sm:$0xff] }
 0x409   : > { %7206 = vst [vmem:[#allocation81_spill] sm:$0xff] %v5263_v54  ;;  %v5270_v29 = vadd.f32 %v1731_v6, %v7207_v13  ;;  %v5273_v62 = vadd.f32 %v1732_v17, %v7209_v15  ;;  %v7211_v14 = vld [vmem:[#allocation90_spill] sm:$0xff]  ;;  %v7213_v61 = vld [vmem:[#allocation91_spill] sm:$0xff]  ;;  %v3519_v1 = vld [vmem:[%s3919_s21 + $0x348] sm:$0xff] }
 0x40a   : > { %v5276_v9 = vadd.f32 %v1733_v22, %v7211_v14  ;;  %v5279_v39 = vadd.f32 %v1734_v57, %v7213_v61  ;;  %v3518_v54 = vld [vmem:[%s3919_s21 + $0x340] sm:$0xff]  ;;  %v3520_v34 = vld [vmem:[%s3919_s21 + $0x350] sm:$0xff]  ;;  %v3521_v6 = vld [vmem:[%s3919_s21 + $0x358] sm:$0xff] }
 0x40b   : > { %7208 = vst [vmem:[#allocation82_spill] sm:$0xff] %v5270_v29  ;;  %7210 = vst [vmem:[#allocation83_spill] sm:$0xff] %v5273_v62  ;;  %v7215_v13 = vld [vmem:[#allocation92_spill] sm:$0xff]  ;;  %v7217_v15 = vld [vmem:[#allocation93_spill] sm:$0xff] }
 0x40c   : > { %7212 = vst [vmem:[#allocation84_spill] sm:$0xff] %v5276_v9  ;;  %7214 = vst [vmem:[#allocation85_spill] sm:$0xff] %v5279_v39  ;;  %v5287_v17 = vadd.f32 %v5108_v41, %v7215_v13  ;;  %v5291_v22 = vadd.f32 %v5111_v36, %v7217_v15  ;;  %v7219_v14 = vld [vmem:[#allocation94_spill] sm:$0xff]  ;;  %v7221_v61 = vld [vmem:[#allocation95_spill] sm:$0xff] }
 0x40d   : > { %v5295_v57 = vadd.f32 %v5114_v21, %v7219_v14  ;;  %v5299_v39 = vadd.f32 %v5117_v46, %v7221_v61  ;;  %v3522_v9 = vld [vmem:[%s3919_s21 + $0x360] sm:$0xff]  ;;  %v3523_v62 = vld [vmem:[%s3919_s21 + $0x368] sm:$0xff]  ;;  %v3524_v41 = vld [vmem:[%s3919_s21 + $0x370] sm:$0xff]  ;;  %v5313_v21 = vstv %s5221_s11 }
 0x40e   : > { %7216 = vst [vmem:[#allocation86_spill] sm:$0xff] %v5287_v17  ;;  %7218 = vst [vmem:[#allocation87_spill] sm:$0xff] %v5291_v22  ;;  %v3525_v13 = vld [vmem:[%s3919_s21 + $0x378] sm:$0xff]  ;;  %v3526_v17 = vld [vmem:[%s3919_s21 + $0x380] sm:$0xff]  ;;  %v5310_v22 = vstv %s5207_s10  ;;  %v5316_v14 = vstv %s5235_s14 }
 0x40f   : > { %7220 = vst [vmem:[#allocation88_spill] sm:$0xff] %v5295_v57  ;;  %7222 = vst [vmem:[#allocation89_spill] sm:$0xff] %v5299_v39  ;;  %v3527_v29 = vld [vmem:[%s3919_s21 + $0x388] sm:$0xff]  ;;  %v3528_v36 = vld [vmem:[%s3919_s21 + $0x390] sm:$0xff]  ;;  %v5318_v46 = vstv %s3671_s15  ;;  %v5325_v18 = vmul.f32 %v3510_v42, %v5310_v22  ;;  %v5328_v60 = vmul.f32 %v3511_v31, %v5310_v22  ;;  %v5331_v43 = vmul.f32 %v3512_v19, %v5310_v22 }
 0x410   : > { %v3529_v15 = vld [vmem:[%s3919_s21 + $0x398] sm:$0xff]  ;;  %7223 = vst [vmem:[#allocation90_spill] sm:$0xff] %v5313_v21  ;;  %7224 = vst [vmem:[#allocation91_spill] sm:$0xff] %v5316_v14  ;;  %v3530_v61 = vld [vmem:[%s3919_s21 + $0x3a0] sm:$0xff]  ;;  %v5334_v14 = vmul.f32 %v3513_v24, %v5310_v22  ;;  %v5340_v3 = vmul.f32 %v3514_v12, %v5310_v22  ;;  %v5343_v42 = vmul.f32 %v3515_v0, %v5310_v22 }
 0x411   : > { %7225 = vst [vmem:[#allocation92_spill] sm:$0xff] %v5318_v46  ;;  %v3531_v39 = vld [vmem:[%s3919_s21 + $0x3a8] sm:$0xff]  ;;  %v3532_v57 = vld [vmem:[%s3919_s21 + $0x3b0] sm:$0xff]  ;;  %v3533_v33 = vld [vmem:[%s3919_s21 + $0x3b8] sm:$0xff]  ;;  %v5346_v31 = vmul.f32 %v3516_v28, %v5310_v22  ;;  %v5349_v19 = vmul.f32 %v3517_v53, %v5310_v22  ;;  %v5355_v10 = vmul.f32 %v3518_v54, %v5310_v22  ;;  %v5358_v12 = vmul.f32 %v3519_v1, %v5310_v22 }
 0x412   : > { %v3534_v46 = vld [vmem:[%s3919_s21 + $0x3c0] sm:$0xff]  ;;  %v3535_v21 = vld [vmem:[%s3919_s21 + $0x3c8] sm:$0xff]  ;;  %v3536_v16 = vld [vmem:[%s3919_s21 + $0x3d0] sm:$0xff]  ;;  %v5361_v0 = vmul.f32 %v3520_v34, %v5310_v22  ;;  %v5364_v28 = vmul.f32 %v3521_v6, %v5310_v22  ;;  %v5370_v30 = vmul.f32 %v3522_v9, %v5310_v22  ;;  %v5373_v54 = vmul.f32 %v3523_v62, %v5310_v22 }
 0x413   : > { %v3537_v24 = vld [vmem:[%s3919_s21 + $0x3d8] sm:$0xff]  ;;  %v3538_v55 = vld [vmem:[%s3919_s21 + $0x3e0] sm:$0xff]  ;;  %v3539_v26 = vld [vmem:[%s3919_s21 + $0x3e8] sm:$0xff]  ;;  %v5376_v1 = vmul.f32 %v3524_v41, %v5310_v22  ;;  %v5379_v34 = vmul.f32 %v3525_v13, %v5310_v22  ;;  %v1857_v5 = vmul.f32 %v3526_v17, %v5310_v22  ;;  %v1858_v9 = vmul.f32 %v3527_v29, %v5310_v22 }
 0x414   : > { %7226 = vst [vmem:[#allocation93_spill] sm:$0xff] %v5361_v0  ;;  %7227 = vst [vmem:[#allocation94_spill] sm:$0xff] %v5364_v28  ;;  %v3540_v53 = vld [vmem:[%s3919_s21 + $0x3f0] sm:$0xff]  ;;  %v3541_v2 = vld [vmem:[%s3919_s21 + $0x3f8] sm:$0xff]  ;;  %v1859_v58 = vmul.f32 %v3528_v36, %v5310_v22  ;;  %v1860_v62 = vmul.f32 %v3529_v15, %v5310_v22  ;;  %v1861_v37 = vmul.f32 %v3530_v61, %v5310_v22 }
 0x415   : > { %v3542_v48 = vld [vmem:[%s3919_s21 + $0x400] sm:$0xff]  ;;  %7228 = vst [vmem:[#allocation95_spill] sm:$0xff] %v5370_v30  ;;  %7229 = vst [vmem:[#allocation150_spill] sm:$0xff] %v5373_v54  ;;  %v3543_v6 = vld [vmem:[%s3919_s21 + $0x408] sm:$0xff]  ;;  %v1862_v27 = vmul.f32 %v3531_v39, %v5310_v22  ;;  %v1863_v25 = vmul.f32 %v3532_v57, %v5310_v22  ;;  %v1864_v17 = vmul.f32 %v3533_v33, %v5310_v22 }
 0x416   : > { %7230 = vst [vmem:[#allocation151_spill] sm:$0xff] %v5376_v1  ;;  %7231 = vst [vmem:[#allocation152_spill] sm:$0xff] %v5379_v34  ;;  %v3544_v7 = vld [vmem:[%s3919_s21 + $0x410] sm:$0xff]  ;;  %v3545_v59 = vld [vmem:[%s3919_s21 + $0x418] sm:$0xff]  ;;  %v1865_v15 = vmul.f32 %v3534_v46, %v5310_v22  ;;  %v1866_v34 = vmul.f32 %v3535_v21, %v5310_v22  ;;  %v1867_v23 = vmul.f32 %v3536_v16, %v5310_v22 }
 0x417   : > { %v3546_v41 = vld [vmem:[%s3919_s21 + $0x420] sm:$0xff]  ;;  %v3547_v47 = vld [vmem:[%s3919_s21 + $0x428] sm:$0xff]  ;;  %v3548_v13 = vld [vmem:[%s3919_s21 + $0x430] sm:$0xff]  ;;  %v1868_v61 = vmul.f32 %v3537_v24, %v5310_v22  ;;  %v1869_v57 = vmul.f32 %v3538_v55, %v5310_v22  ;;  %v1870_v33 = vmul.f32 %v3539_v26, %v5310_v22  ;;  %v1871_v54 = vmul.f32 %v3540_v53, %v5310_v22 }
 0x418   : > { %v3549_v29 = vld [vmem:[%s3919_s21 + $0x438] sm:$0xff]  ;;  %v3550_v36 = vld [vmem:[%s3919_s21 + $0x440] sm:$0xff]  ;;  %v3551_v4 = vld [vmem:[%s3919_s21 + $0x448] sm:$0xff]  ;;  %v1872_v32 = vmul.f32 %v3541_v2, %v5310_v22  ;;  %v1873_v21 = vmul.f32 %v3542_v48, %v5310_v22  ;;  %v1874_v16 = vmul.f32 %v3543_v6, %v5310_v22  ;;  %v1875_v24 = vmul.f32 %v3544_v7, %v5310_v22 }
 0x419   : > { %v3552_v1 = vld [vmem:[%s3919_s21 + $0x450] sm:$0xff]  ;;  %v3553_v39 = vld [vmem:[%s3919_s21 + $0x458] sm:$0xff]  ;;  %v3554_v49 = vld [vmem:[%s3919_s21 + $0x460] sm:$0xff]  ;;  %v1876_v28 = vmul.f32 %v3545_v59, %v5310_v22  ;;  %v1877_v38 = vmul.f32 %v3546_v41, %v5310_v22  ;;  %v1878_v55 = vmul.f32 %v3547_v47, %v5310_v22  ;;  %v1879_v26 = vmul.f32 %v3548_v13, %v5310_v22 }
 0x41a   : > { %v3555_v30 = vld [vmem:[%s3919_s21 + $0x468] sm:$0xff]  ;;  %v3556_v40 = vld [vmem:[%s3919_s21 + $0x470] sm:$0xff]  ;;  %v3557_v46 = vld [vmem:[%s3919_s21 + $0x478] sm:$0xff]  ;;  %v1880_v53 = vmul.f32 %v3549_v29, %v5310_v22  ;;  %v1881_v2 = vmul.f32 %v3550_v36, %v5310_v22  ;;  %v1882_v0 = vmul.f32 %v3551_v4, %v5310_v22  ;;  %v1883_v48 = vmul.f32 %v3552_v1, %v5310_v22 }
 0x41b   : > { %v1884_v6 = vmul.f32 %v3553_v39, %v5310_v22  ;;  %v5425_v7 = vmul.f32 %v3554_v49, %v5310_v22  ;;  %v5428_v59 = vmul.f32 %v3555_v30, %v5310_v22  ;;  %v5431_v47 = vmul.f32 %v3556_v40, %v5310_v22  ;;  %v7248_v1 = vld [vmem:[#allocation61_spill] sm:$0xff]  ;;  %v7250_v36 = vld [vmem:[#allocation147_spill] sm:$0xff] }
 0x41c   : > { %v5434_v41 = vmul.f32 %v3557_v46, %v5310_v22  ;;  %v5438_v13 = vadd.f32 %v5325_v18, %v5121_v63  ;;  %v5442_v4 = vadd.f32 %v5328_v60, %v5125_v35  ;;  %v5446_v49 = vadd.f32 %v5331_v43, %v5129_v45  ;;  %v7233_v43 = vld [vmem:[#allocation144_spill] sm:$0xff]  ;;  %v7234_v60 = vld [vmem:[#allocation94_spill] sm:$0xff]  ;;  %v7236_v18 = vld [vmem:[#allocation59_spill] sm:$0xff] }
 0x41d   : > { %v5450_v30 = vadd.f32 %v5334_v14, %v5133_v20  ;;  %v5454_v40 = vadd.f32 %v5340_v3, %v5137_v51  ;;  %v5458_v63 = vadd.f32 %v5343_v42, %v5141_v8  ;;  %v5462_v35 = vadd.f32 %v5346_v31, %v5145_v56  ;;  %v7232_v3 = vld [vmem:[#allocation93_spill] sm:$0xff]  ;;  %v7237_v22 = vld [vmem:[#allocation95_spill] sm:$0xff]  ;;  %v7240_v42 = vld [vmem:[#allocation150_spill] sm:$0xff] }
 0x41e   : > { %v5466_v45 = vadd.f32 %v5349_v19, %v5149_v50  ;;  %v5470_v20 = vadd.f32 %v5355_v10, %v5153_v52  ;;  %v5474_v51 = vadd.f32 %v5358_v12, %v5157_v44  ;;  %v5478_v8 = vadd.f32 %v7232_v3, %v5161_v11  ;;  %v7239_v14 = vld [vmem:[#allocation145_spill] sm:$0xff]  ;;  %v7242_v10 = vld [vmem:[#allocation60_spill] sm:$0xff]  ;;  %v7243_v31 = vld [vmem:[#allocation151_spill] sm:$0xff] }
 0x41f   : > { %v5482_v56 = vadd.f32 %v7234_v60, %v7233_v43  ;;  %v5486_v50 = vadd.f32 %v7237_v22, %v7236_v18  ;;  %v5490_v52 = vadd.f32 %v7240_v42, %v7239_v14  ;;  %v5494_v44 = vadd.f32 %v7243_v31, %v7242_v10  ;;  %v7245_v19 = vld [vmem:[#allocation146_spill] sm:$0xff]  ;;  %v7246_v12 = vld [vmem:[#allocation152_spill] sm:$0xff]  ;;  %v7256_v18 = vld [vmem:[#allocation63_spill] sm:$0xff] }
 0x420   : > { %v5498_v11 = vadd.f32 %v7246_v12, %v7245_v19  ;;  %v5501_v29 = vadd.f32 %v1857_v5, %v7248_v1  ;;  %v5504_v39 = vadd.f32 %v1858_v9, %v7250_v36  ;;  %v7252_v46 = vld [vmem:[#allocation62_spill] sm:$0xff]  ;;  %v7254_v43 = vld [vmem:[#allocation148_spill] sm:$0xff]  ;;  %v5513_v22 = vadd.f32 %v1861_v37, %v7256_v18  ;;  %v7258_v14 = vld [vmem:[#allocation149_spill] sm:$0xff] }
 0x421   : > { %7235 = vst [vmem:[#allocation93_spill] sm:$0xff] %v5482_v56  ;;  %7238 = vst [vmem:[#allocation144_spill] sm:$0xff] %v5486_v50  ;;  %v5507_v3 = vadd.f32 %v1859_v58, %v7252_v46  ;;  %v5510_v60 = vadd.f32 %v1860_v62, %v7254_v43  ;;  %v5516_v42 = vadd.f32 %v1862_v27, %v7258_v14  ;;  %v7260_v5 = vld [vmem:[#allocation64_spill] sm:$0xff]  ;;  %v7262_v9 = vld [vmem:[#allocation65_spill] sm:$0xff] }
 0x422   : > { %7241 = vst [vmem:[#allocation94_spill] sm:$0xff] %v5490_v52  ;;  %7244 = vst [vmem:[#allocation59_spill] sm:$0xff] %v5494_v44  ;;  %v5519_v10 = vadd.f32 %v1863_v25, %v7260_v5  ;;  %v5522_v31 = vadd.f32 %v1864_v17, %v7262_v9  ;;  %v7264_v19 = vld [vmem:[#allocation66_spill] sm:$0xff]  ;;  %v7266_v12 = vld [vmem:[#allocation67_spill] sm:$0xff] }
 0x423   : > { %7247 = vst [vmem:[#allocation95_spill] sm:$0xff] %v5498_v11  ;;  %7249 = vst [vmem:[#allocation145_spill] sm:$0xff] %v5501_v29  ;;  %v5525_v58 = vadd.f32 %v1865_v15, %v7264_v19  ;;  %v5528_v62 = vadd.f32 %v1866_v34, %v7266_v12  ;;  %v7268_v1 = vld [vmem:[#allocation68_spill] sm:$0xff]  ;;  %v7270_v36 = vld [vmem:[#allocation69_spill] sm:$0xff] }
 0x424   : > { %7251 = vst [vmem:[#allocation150_spill] sm:$0xff] %v5504_v39  ;;  %7253 = vst [vmem:[#allocation60_spill] sm:$0xff] %v5507_v3  ;;  %v5531_v37 = vadd.f32 %v1867_v23, %v7268_v1  ;;  %v5534_v27 = vadd.f32 %v1868_v61, %v7270_v36  ;;  %v7272_v25 = vld [vmem:[#allocation70_spill] sm:$0xff]  ;;  %v7274_v17 = vld [vmem:[#allocation71_spill] sm:$0xff] }
 0x425   : > { %7255 = vst [vmem:[#allocation151_spill] sm:$0xff] %v5510_v60  ;;  %7257 = vst [vmem:[#allocation146_spill] sm:$0xff] %v5513_v22  ;;  %v5537_v46 = vadd.f32 %v1869_v57, %v7272_v25  ;;  %v5540_v43 = vadd.f32 %v1870_v33, %v7274_v17  ;;  %v7276_v15 = vld [vmem:[#allocation72_spill] sm:$0xff]  ;;  %v7278_v34 = vld [vmem:[#allocation73_spill] sm:$0xff] }
 0x426   : > { %7259 = vst [vmem:[#allocation152_spill] sm:$0xff] %v5516_v42  ;;  %7261 = vst [vmem:[#allocation61_spill] sm:$0xff] %v5519_v10  ;;  %v5543_v18 = vadd.f32 %v1871_v54, %v7276_v15  ;;  %v5546_v14 = vadd.f32 %v1872_v32, %v7278_v34  ;;  %v3558_v5 = vld [vmem:[%s3919_s21 + $0x480] sm:$0xff]  ;;  %v3559_v23 = vld [vmem:[%s3919_s21 + $0x488] sm:$0xff] }
 0x427   : > { %7263 = vst [vmem:[#allocation147_spill] sm:$0xff] %v5522_v31  ;;  %7265 = vst [vmem:[#allocation62_spill] sm:$0xff] %v5525_v58  ;;  %v3560_v9 = vld [vmem:[%s3919_s21 + $0x490] sm:$0xff]  ;;  %v3561_v61 = vld [vmem:[%s3919_s21 + $0x498] sm:$0xff] }
 0x428   : > { %7267 = vst [vmem:[#allocation148_spill] sm:$0xff] %v5528_v62  ;;  %7269 = vst [vmem:[#allocation63_spill] sm:$0xff] %v5531_v37  ;;  %v7280_v19 = vld [vmem:[#allocation74_spill] sm:$0xff]  ;;  %v7282_v12 = vld [vmem:[#allocation75_spill] sm:$0xff] }
 0x429   : > { %7271 = vst [vmem:[#allocation149_spill] sm:$0xff] %v5534_v27  ;;  %7273 = vst [vmem:[#allocation64_spill] sm:$0xff] %v5537_v46  ;;  %v5553_v57 = vadd.f32 %v1873_v21, %v7280_v19  ;;  %v5556_v33 = vadd.f32 %v1874_v16, %v7282_v12  ;;  %v7284_v1 = vld [vmem:[#allocation76_spill] sm:$0xff]  ;;  %v7286_v36 = vld [vmem:[#allocation77_spill] sm:$0xff] }
 0x42a   : > { %7275 = vst [vmem:[#allocation65_spill] sm:$0xff] %v5540_v43  ;;  %7277 = vst [vmem:[#allocation66_spill] sm:$0xff] %v5543_v18  ;;  %v5559_v54 = vadd.f32 %v1875_v24, %v7284_v1  ;;  %v5562_v32 = vadd.f32 %v1876_v28, %v7286_v36  ;;  %v3562_v25 = vld [vmem:[%s3919_s21 + $0x4a0] sm:$0xff]  ;;  %v3563_v17 = vld [vmem:[%s3919_s21 + $0x4a8] sm:$0xff] }
 0x42b   : > { %7279 = vst [vmem:[#allocation67_spill] sm:$0xff] %v5546_v14  ;;  %7281 = vst [vmem:[#allocation68_spill] sm:$0xff] %v5553_v57  ;;  %v3564_v15 = vld [vmem:[%s3919_s21 + $0x4b0] sm:$0xff]  ;;  %v3565_v34 = vld [vmem:[%s3919_s21 + $0x4b8] sm:$0xff] }
 0x42c   : > { %7283 = vst [vmem:[#allocation69_spill] sm:$0xff] %v5556_v33  ;;  %7285 = vst [vmem:[#allocation70_spill] sm:$0xff] %v5559_v54  ;;  %v7288_v14 = vld [vmem:[#allocation78_spill] sm:$0xff]  ;;  %v7290_v19 = vld [vmem:[#allocation79_spill] sm:$0xff] }
 0x42d   : > { %7287 = vst [vmem:[#allocation71_spill] sm:$0xff] %v5562_v32  ;;  %v5569_v21 = vadd.f32 %v1877_v38, %v7288_v14  ;;  %v5572_v16 = vadd.f32 %v1878_v55, %v7290_v19  ;;  %v7292_v12 = vld [vmem:[#allocation80_spill] sm:$0xff]  ;;  %v7294_v1 = vld [vmem:[#allocation81_spill] sm:$0xff]  ;;  %v3569_v33 = vld [vmem:[%s3919_s21 + $0x4d8] sm:$0xff] }
 0x42e   : > { %v5575_v24 = vadd.f32 %v1879_v26, %v7292_v12  ;;  %v5578_v28 = vadd.f32 %v1880_v53, %v7294_v1  ;;  %v3566_v36 = vld [vmem:[%s3919_s21 + $0x4c0] sm:$0xff]  ;;  %v3567_v32 = vld [vmem:[%s3919_s21 + $0x4c8] sm:$0xff]  ;;  %v3568_v54 = vld [vmem:[%s3919_s21 + $0x4d0] sm:$0xff] }
 0x42f   : > { %7289 = vst [vmem:[#allocation72_spill] sm:$0xff] %v5569_v21  ;;  %7291 = vst [vmem:[#allocation73_spill] sm:$0xff] %v5572_v16  ;;  %v7296_v57 = vld [vmem:[#allocation82_spill] sm:$0xff]  ;;  %v7298_v14 = vld [vmem:[#allocation83_spill] sm:$0xff] }
 0x430   : > { %7293 = vst [vmem:[#allocation74_spill] sm:$0xff] %v5575_v24  ;;  %7295 = vst [vmem:[#allocation75_spill] sm:$0xff] %v5578_v28  ;;  %v5585_v38 = vadd.f32 %v1881_v2, %v7296_v57  ;;  %v5588_v55 = vadd.f32 %v1882_v0, %v7298_v14  ;;  %v7300_v26 = vld [vmem:[#allocation84_spill] sm:$0xff]  ;;  %v7302_v53 = vld [vmem:[#allocation85_spill] sm:$0xff] }
 0x431   : > { %v5591_v19 = vadd.f32 %v1883_v48, %v7300_v26  ;;  %v5594_v12 = vadd.f32 %v1884_v6, %v7302_v53  ;;  %v3570_v1 = vld [vmem:[%s3919_s21 + $0x4e0] sm:$0xff]  ;;  %v3571_v28 = vld [vmem:[%s3919_s21 + $0x4e8] sm:$0xff]  ;;  %v3572_v24 = vld [vmem:[%s3919_s21 + $0x4f0] sm:$0xff] }
 0x432   : > { %7297 = vst [vmem:[#allocation76_spill] sm:$0xff] %v5585_v38  ;;  %7299 = vst [vmem:[#allocation77_spill] sm:$0xff] %v5588_v55  ;;  %v3573_v16 = vld [vmem:[%s3919_s21 + $0x4f8] sm:$0xff]  ;;  %v7308_v48 = vld [vmem:[#allocation88_spill] sm:$0xff] }
 0x433   : > { %7301 = vst [vmem:[#allocation78_spill] sm:$0xff] %v5591_v19  ;;  %7303 = vst [vmem:[#allocation79_spill] sm:$0xff] %v5594_v12  ;;  %v7304_v21 = vld [vmem:[#allocation86_spill] sm:$0xff]  ;;  %v7306_v57 = vld [vmem:[#allocation87_spill] sm:$0xff]  ;;  %v5610_v14 = vadd.f32 %v5431_v47, %v7308_v48 }
 0x434   : > { %v5602_v2 = vadd.f32 %v5425_v7, %v7304_v21  ;;  %v5606_v0 = vadd.f32 %v5428_v59, %v7306_v57  ;;  %v7310_v6 = vld [vmem:[#allocation89_spill] sm:$0xff]  ;;  %v3574_v53 = vld [vmem:[%s3919_s21 + $0x500] sm:$0xff]  ;;  %v3577_v7 = vld [vmem:[%s3919_s21 + $0x518] sm:$0xff] }
 0x435   : > { %7309 = vst [vmem:[#allocation82_spill] sm:$0xff] %v5610_v14  ;;  %v5614_v26 = vadd.f32 %v5434_v41, %v7310_v6  ;;  %v3575_v12 = vld [vmem:[%s3919_s21 + $0x508] sm:$0xff]  ;;  %v3576_v19 = vld [vmem:[%s3919_s21 + $0x510] sm:$0xff]  ;;  %v3578_v21 = vld [vmem:[%s3919_s21 + $0x520] sm:$0xff] }
 0x436   : > { %7305 = vst [vmem:[#allocation80_spill] sm:$0xff] %v5602_v2  ;;  %7307 = vst [vmem:[#allocation81_spill] sm:$0xff] %v5606_v0  ;;  %v3579_v2 = vld [vmem:[%s3919_s21 + $0x528] sm:$0xff]  ;;  %v3580_v59 = vld [vmem:[%s3919_s21 + $0x530] sm:$0xff] }
 0x437   : > { %7311 = vst [vmem:[#allocation83_spill] sm:$0xff] %v5614_v26  ;;  %v3581_v57 = vld [vmem:[%s3919_s21 + $0x538] sm:$0xff]  ;;  %v3582_v6 = vld [vmem:[%s3919_s21 + $0x540] sm:$0xff]  ;;  %v3583_v26 = vld [vmem:[%s3919_s21 + $0x548] sm:$0xff] }
 0x438   : > { %v7312_v0 = vld [vmem:[#allocation90_spill] sm:$0xff]  ;;  %v3586_v18 = vld [vmem:[%s3919_s21 + $0x560] sm:$0xff]  ;;  %v3587_v43 = vld [vmem:[%s3919_s21 + $0x568] sm:$0xff] }
 0x439   : > { %v5625_v55 = vmul.f32 %v3558_v5, %v7312_v0  ;;  %v5628_v47 = vmul.f32 %v3559_v23, %v7312_v0  ;;  %v5631_v41 = vmul.f32 %v3560_v9, %v7312_v0  ;;  %v5634_v48 = vmul.f32 %v3561_v61, %v7312_v0  ;;  %v3584_v14 = vld [vmem:[%s3919_s21 + $0x550] sm:$0xff]  ;;  %v3585_v61 = vld [vmem:[%s3919_s21 + $0x558] sm:$0xff]  ;;  %v3590_v37 = vld [vmem:[%s3919_s21 + $0x580] sm:$0xff] }
 0x43a   : > { %v5640_v38 = vmul.f32 %v3562_v25, %v7312_v0  ;;  %v5643_v5 = vmul.f32 %v3563_v17, %v7312_v0  ;;  %v5646_v23 = vmul.f32 %v3564_v15, %v7312_v0  ;;  %v5649_v9 = vmul.f32 %v3565_v34, %v7312_v0  ;;  %v3588_v34 = vld [vmem:[%s3919_s21 + $0x570] sm:$0xff]  ;;  %v3589_v27 = vld [vmem:[%s3919_s21 + $0x578] sm:$0xff]  ;;  %v3595_v22 = vld [vmem:[%s3919_s21 + $0x5a8] sm:$0xff] }
 0x43b   : > { %v5655_v46 = vmul.f32 %v3566_v36, %v7312_v0  ;;  %v5658_v25 = vmul.f32 %v3567_v32, %v7312_v0  ;;  %v5661_v17 = vmul.f32 %v3568_v54, %v7312_v0  ;;  %v5664_v15 = vmul.f32 %v3569_v33, %v7312_v0  ;;  %v3591_v33 = vld [vmem:[%s3919_s21 + $0x588] sm:$0xff]  ;;  %v3592_v58 = vld [vmem:[%s3919_s21 + $0x590] sm:$0xff]  ;;  %v3593_v31 = vld [vmem:[%s3919_s21 + $0x598] sm:$0xff] }
 0x43c   : > { %v5670_v62 = vmul.f32 %v3570_v1, %v7312_v0  ;;  %v5673_v36 = vmul.f32 %v3571_v28, %v7312_v0  ;;  %v5676_v32 = vmul.f32 %v3572_v24, %v7312_v0  ;;  %v5679_v54 = vmul.f32 %v3573_v16, %v7312_v0  ;;  %v3594_v24 = vld [vmem:[%s3919_s21 + $0x5a0] sm:$0xff]  ;;  %v3596_v16 = vld [vmem:[%s3919_s21 + $0x5b0] sm:$0xff]  ;;  %v3599_v29 = vld [vmem:[%s3919_s21 + $0x5c8] sm:$0xff] }
 0x43d   : > { %7313 = vst [vmem:[#allocation84_spill] sm:$0xff] %v5661_v17  ;;  %7314 = vst [vmem:[#allocation85_spill] sm:$0xff] %v5664_v15  ;;  %v2007_v10 = vmul.f32 %v3574_v53, %v7312_v0  ;;  %v2008_v1 = vmul.f32 %v3575_v12, %v7312_v0  ;;  %v2009_v42 = vmul.f32 %v3576_v19, %v7312_v0  ;;  %v3597_v12 = vld [vmem:[%s3919_s21 + $0x5b8] sm:$0xff]  ;;  %v3598_v19 = vld [vmem:[%s3919_s21 + $0x5c0] sm:$0xff] }
 0x43e   : > { %7315 = vst [vmem:[#allocation86_spill] sm:$0xff] %v5670_v62  ;;  %7316 = vst [vmem:[#allocation87_spill] sm:$0xff] %v5673_v36  ;;  %v2010_v28 = vmul.f32 %v3577_v7, %v7312_v0  ;;  %v2011_v60 = vmul.f32 %v3578_v21, %v7312_v0  ;;  %v2012_v3 = vmul.f32 %v3579_v2, %v7312_v0  ;;  %v3601_v2 = vld [vmem:[%s3919_s21 + $0x5d8] sm:$0xff]  ;;  %v3602_v44 = vld [vmem:[%s3919_s21 + $0x5e0] sm:$0xff] }
 0x43f   : > { %7317 = vst [vmem:[#allocation88_spill] sm:$0xff] %v5676_v32  ;;  %7318 = vst [vmem:[#allocation89_spill] sm:$0xff] %v5679_v54  ;;  %v2013_v39 = vmul.f32 %v3580_v59, %v7312_v0  ;;  %v2014_v53 = vmul.f32 %v3581_v57, %v7312_v0  ;;  %v2015_v7 = vmul.f32 %v3582_v6, %v7312_v0  ;;  %v3600_v32 = vld [vmem:[%s3919_s21 + $0x5d0] sm:$0xff]  ;;  %v3603_v62 = vld [vmem:[%s3919_s21 + $0x5e8] sm:$0xff] }
 0x440   : > { %v2016_v54 = vmul.f32 %v3583_v26, %v7312_v0  ;;  %v2017_v11 = vmul.f32 %v3584_v14, %v7312_v0  ;;  %v2018_v21 = vmul.f32 %v3585_v61, %v7312_v0  ;;  %v2019_v59 = vmul.f32 %v3586_v18, %v7312_v0  ;;  %v3604_v50 = vld [vmem:[%s3919_s21 + $0x5f0] sm:$0xff]  ;;  %v3605_v6 = vld [vmem:[%s3919_s21 + $0x5f8] sm:$0xff] }
 0x441   : > { %v2020_v57 = vmul.f32 %v3587_v43, %v7312_v0  ;;  %v2021_v36 = vmul.f32 %v3588_v34, %v7312_v0  ;;  %v2022_v52 = vmul.f32 %v3589_v27, %v7312_v0  ;;  %v2023_v26 = vmul.f32 %v3590_v37, %v7312_v0 }
 0x442   : > { %v2024_v14 = vmul.f32 %v3591_v33, %v7312_v0  ;;  %v2025_v61 = vmul.f32 %v3592_v58, %v7312_v0  ;;  %v2026_v15 = vmul.f32 %v3593_v31, %v7312_v0  ;;  %v2027_v56 = vmul.f32 %v3594_v24, %v7312_v0 }
 0x443   : > { %v2028_v18 = vmul.f32 %v3595_v22, %v7312_v0  ;;  %v2029_v43 = vmul.f32 %v3596_v16, %v7312_v0  ;;  %v2030_v34 = vmul.f32 %v3597_v12, %v7312_v0  ;;  %v2031_v27 = vmul.f32 %v3598_v19, %v7312_v0  ;;  %v7337_v19 = vld [vmem:[#allocation150_spill] sm:$0xff] }
 0x444   : > { %v2032_v17 = vmul.f32 %v3599_v29, %v7312_v0  ;;  %v2033_v37 = vmul.f32 %v3600_v32, %v7312_v0  ;;  %v2034_v33 = vmul.f32 %v3601_v2, %v7312_v0  ;;  %v5725_v58 = vmul.f32 %v3602_v44, %v7312_v0  ;;  %v7335_v32 = vld [vmem:[#allocation145_spill] sm:$0xff] }
 0x445   : > { %v5728_v31 = vmul.f32 %v3603_v62, %v7312_v0  ;;  %v5731_v22 = vmul.f32 %v3604_v50, %v7312_v0  ;;  %v5734_v24 = vmul.f32 %v3605_v6, %v7312_v0  ;;  %v5738_v16 = vadd.f32 %v5625_v55, %v5438_v13  ;;  %v7320_v55 = vld [vmem:[#allocation93_spill] sm:$0xff]  ;;  %v7339_v6 = vld [vmem:[#allocation60_spill] sm:$0xff] }
 0x446   : > { %v5742_v29 = vadd.f32 %v5628_v47, %v5442_v4  ;;  %v5746_v44 = vadd.f32 %v5631_v41, %v5446_v49  ;;  %v5750_v62 = vadd.f32 %v5634_v48, %v5450_v30  ;;  %v5754_v50 = vadd.f32 %v5640_v38, %v5454_v40  ;;  %v7319_v38 = vld [vmem:[#allocation84_spill] sm:$0xff]  ;;  %v7321_v0 = vld [vmem:[#allocation85_spill] sm:$0xff]  ;;  %v7324_v41 = vld [vmem:[#allocation86_spill] sm:$0xff] }
 0x447   : > { %v5758_v13 = vadd.f32 %v5643_v5, %v5458_v63  ;;  %v5762_v4 = vadd.f32 %v5646_v23, %v5462_v35  ;;  %v5766_v49 = vadd.f32 %v5649_v9, %v5466_v45  ;;  %v5770_v30 = vadd.f32 %v5655_v46, %v5470_v20  ;;  %v7323_v47 = vld [vmem:[#allocation144_spill] sm:$0xff]  ;;  %v7326_v48 = vld [vmem:[#allocation94_spill] sm:$0xff]  ;;  %v7327_v5 = vld [vmem:[#allocation87_spill] sm:$0xff] }
 0x448   : > { %v5774_v40 = vadd.f32 %v5658_v25, %v5474_v51  ;;  %v5778_v63 = vadd.f32 %v7319_v38, %v5478_v8  ;;  %v5782_v35 = vadd.f32 %v7321_v0, %v7320_v55  ;;  %v5786_v45 = vadd.f32 %v7324_v41, %v7323_v47  ;;  %v7329_v46 = vld [vmem:[#allocation59_spill] sm:$0xff]  ;;  %v7330_v23 = vld [vmem:[#allocation88_spill] sm:$0xff]  ;;  %v7333_v25 = vld [vmem:[#allocation89_spill] sm:$0xff] }
 0x449   : > { %v5790_v20 = vadd.f32 %v7327_v5, %v7326_v48  ;;  %v5794_v51 = vadd.f32 %v7330_v23, %v7329_v46  ;;  %v7332_v9 = vld [vmem:[#allocation95_spill] sm:$0xff]  ;;  %v5801_v12 = vadd.f32 %v2007_v10, %v7335_v32  ;;  %v5804_v2 = vadd.f32 %v2008_v1, %v7337_v19  ;;  %v7343_v47 = vld [vmem:[#allocation146_spill] sm:$0xff]  ;;  %v7345_v48 = vld [vmem:[#allocation152_spill] sm:$0xff] }
 0x44a   : > { %7322 = vst [vmem:[#allocation90_spill] sm:$0xff] %v5782_v35  ;;  %7325 = vst [vmem:[#allocation84_spill] sm:$0xff] %v5786_v45  ;;  %v5798_v8 = vadd.f32 %v7333_v25, %v7332_v9  ;;  %v5807_v38 = vadd.f32 %v2009_v42, %v7339_v6  ;;  %v7341_v55 = vld [vmem:[#allocation151_spill] sm:$0xff]  ;;  %v5813_v41 = vadd.f32 %v2011_v60, %v7343_v47  ;;  %v7347_v10 = vld [vmem:[#allocation61_spill] sm:$0xff] }
 0x44b   : > { %7328 = vst [vmem:[#allocation93_spill] sm:$0xff] %v5790_v20  ;;  %7331 = vst [vmem:[#allocation85_spill] sm:$0xff] %v5794_v51  ;;  %v5810_v0 = vadd.f32 %v2010_v28, %v7341_v55  ;;  %v5816_v5 = vadd.f32 %v2012_v3, %v7345_v48  ;;  %v5819_v46 = vadd.f32 %v2013_v39, %v7347_v10  ;;  %v7349_v1 = vld [vmem:[#allocation147_spill] sm:$0xff]  ;;  %v7351_v9 = vld [vmem:[#allocation62_spill] sm:$0xff] }
 0x44c   : > { %7334 = vst [vmem:[#allocation144_spill] sm:$0xff] %v5798_v8  ;;  %7336 = vst [vmem:[#allocation86_spill] sm:$0xff] %v5801_v12  ;;  %v5822_v23 = vadd.f32 %v2014_v53, %v7349_v1  ;;  %v5825_v42 = vadd.f32 %v2015_v7, %v7351_v9  ;;  %v7353_v25 = vld [vmem:[#allocation148_spill] sm:$0xff]  ;;  %v7355_v32 = vld [vmem:[#allocation63_spill] sm:$0xff] }
 0x44d   : > { %7338 = vst [vmem:[#allocation94_spill] sm:$0xff] %v5804_v2  ;;  %7340 = vst [vmem:[#allocation87_spill] sm:$0xff] %v5807_v38  ;;  %v5828_v28 = vadd.f32 %v2016_v54, %v7353_v25  ;;  %v5831_v60 = vadd.f32 %v2017_v11, %v7355_v32  ;;  %v7357_v19 = vld [vmem:[#allocation149_spill] sm:$0xff]  ;;  %v7359_v39 = vld [vmem:[#allocation64_spill] sm:$0xff] }
 0x44e   : > { %7342 = vst [vmem:[#allocation59_spill] sm:$0xff] %v5810_v0  ;;  %7344 = vst [vmem:[#allocation88_spill] sm:$0xff] %v5813_v41  ;;  %v5834_v3 = vadd.f32 %v2018_v21, %v7357_v19  ;;  %v5837_v6 = vadd.f32 %v2019_v59, %v7359_v39  ;;  %v7361_v53 = vld [vmem:[#allocation65_spill] sm:$0xff]  ;;  %v7363_v7 = vld [vmem:[#allocation66_spill] sm:$0xff] }
 0x44f   : > { %7346 = vst [vmem:[#allocation95_spill] sm:$0xff] %v5816_v5  ;;  %7348 = vst [vmem:[#allocation89_spill] sm:$0xff] %v5819_v46  ;;  %v5840_v55 = vadd.f32 %v2020_v57, %v7361_v53  ;;  %v5843_v47 = vadd.f32 %v2021_v36, %v7363_v7  ;;  %v7365_v54 = vld [vmem:[#allocation67_spill] sm:$0xff]  ;;  %v3607_v11 = vld [vmem:[%s3919_s21 + $0x608] sm:$0xff] }
 0x450   : > { %7350 = vst [vmem:[#allocation145_spill] sm:$0xff] %v5822_v23  ;;  %7352 = vst [vmem:[#allocation150_spill] sm:$0xff] %v5825_v42  ;;  %v5846_v48 = vadd.f32 %v2022_v52, %v7365_v54  ;;  %v3606_v10 = vld [vmem:[%s3919_s21 + $0x600] sm:$0xff]  ;;  %v3608_v1 = vld [vmem:[%s3919_s21 + $0x610] sm:$0xff] }
 0x451   : > { %7354 = vst [vmem:[#allocation60_spill] sm:$0xff] %v5828_v28  ;;  %7356 = vst [vmem:[#allocation151_spill] sm:$0xff] %v5831_v60  ;;  %v3609_v21 = vld [vmem:[%s3919_s21 + $0x618] sm:$0xff]  ;;  %v7367_v9 = vld [vmem:[#allocation68_spill] sm:$0xff] }
 0x452   : > { %7358 = vst [vmem:[#allocation146_spill] sm:$0xff] %v5834_v3  ;;  %7360 = vst [vmem:[#allocation152_spill] sm:$0xff] %v5837_v6  ;;  %v5853_v59 = vadd.f32 %v2023_v26, %v7367_v9  ;;  %v7369_v25 = vld [vmem:[#allocation69_spill] sm:$0xff]  ;;  %v7371_v32 = vld [vmem:[#allocation70_spill] sm:$0xff] }
 0x453   : > { %7362 = vst [vmem:[#allocation61_spill] sm:$0xff] %v5840_v55  ;;  %7364 = vst [vmem:[#allocation147_spill] sm:$0xff] %v5843_v47  ;;  %v5856_v57 = vadd.f32 %v2024_v14, %v7369_v25  ;;  %v5859_v36 = vadd.f32 %v2025_v61, %v7371_v32  ;;  %v7373_v19 = vld [vmem:[#allocation71_spill] sm:$0xff]  ;;  %v3611_v53 = vld [vmem:[%s3919_s21 + $0x628] sm:$0xff] }
 0x454   : > { %7366 = vst [vmem:[#allocation62_spill] sm:$0xff] %v5846_v48  ;;  %7368 = vst [vmem:[#allocation148_spill] sm:$0xff] %v5853_v59  ;;  %v5862_v52 = vadd.f32 %v2026_v15, %v7373_v19  ;;  %v3610_v39 = vld [vmem:[%s3919_s21 + $0x620] sm:$0xff]  ;;  %v3612_v7 = vld [vmem:[%s3919_s21 + $0x630] sm:$0xff] }
 0x455   : > { %7370 = vst [vmem:[#allocation63_spill] sm:$0xff] %v5856_v57  ;;  %7372 = vst [vmem:[#allocation149_spill] sm:$0xff] %v5859_v36  ;;  %v3613_v54 = vld [vmem:[%s3919_s21 + $0x638] sm:$0xff]  ;;  %v7375_v48 = vld [vmem:[#allocation72_spill] sm:$0xff] }
 0x456   : > { %7374 = vst [vmem:[#allocation64_spill] sm:$0xff] %v5862_v52  ;;  %v5869_v26 = vadd.f32 %v2027_v56, %v7375_v48  ;;  %v7377_v9 = vld [vmem:[#allocation73_spill] sm:$0xff]  ;;  %v7379_v25 = vld [vmem:[#allocation74_spill] sm:$0xff]  ;;  %v7381_v32 = vld [vmem:[#allocation75_spill] sm:$0xff] }
 0x457   : > { %v5872_v14 = vadd.f32 %v2028_v18, %v7377_v9  ;;  %v5875_v61 = vadd.f32 %v2029_v43, %v7379_v25  ;;  %v5878_v15 = vadd.f32 %v2030_v34, %v7381_v32  ;;  %v3614_v19 = vld [vmem:[%s3919_s21 + $0x640] sm:$0xff]  ;;  %v3615_v52 = vld [vmem:[%s3919_s21 + $0x648] sm:$0xff]  ;;  %v3616_v36 = vld [vmem:[%s3919_s21 + $0x650] sm:$0xff] }
 0x458   : > { %7376 = vst [vmem:[#allocation65_spill] sm:$0xff] %v5869_v26  ;;  %v3617_v57 = vld [vmem:[%s3919_s21 + $0x658] sm:$0xff]  ;;  %v7383_v59 = vld [vmem:[#allocation76_spill] sm:$0xff]  ;;  %v7385_v48 = vld [vmem:[#allocation77_spill] sm:$0xff] }
 0x459   : > { %7378 = vst [vmem:[#allocation66_spill] sm:$0xff] %v5872_v14  ;;  %7380 = vst [vmem:[#allocation67_spill] sm:$0xff] %v5875_v61  ;;  %v5885_v56 = vadd.f32 %v2031_v27, %v7383_v59  ;;  %v5888_v18 = vadd.f32 %v2032_v17, %v7385_v48  ;;  %v7387_v43 = vld [vmem:[#allocation78_spill] sm:$0xff]  ;;  %v7389_v34 = vld [vmem:[#allocation79_spill] sm:$0xff] }
 0x45a   : > { %7382 = vst [vmem:[#allocation68_spill] sm:$0xff] %v5878_v15  ;;  %v5891_v9 = vadd.f32 %v2033_v37, %v7387_v43  ;;  %v5894_v25 = vadd.f32 %v2034_v33, %v7389_v34  ;;  %v3618_v32 = vld [vmem:[%s3919_s21 + $0x660] sm:$0xff]  ;;  %v3619_v15 = vld [vmem:[%s3919_s21 + $0x668] sm:$0xff]  ;;  %v3620_v61 = vld [vmem:[%s3919_s21 + $0x670] sm:$0xff] }
 0x45b   : > { %7384 = vst [vmem:[#allocation69_spill] sm:$0xff] %v5885_v56  ;;  %7386 = vst [vmem:[#allocation70_spill] sm:$0xff] %v5888_v18  ;;  %v3621_v14 = vld [vmem:[%s3919_s21 + $0x678] sm:$0xff]  ;;  %v7391_v26 = vld [vmem:[#allocation80_spill] sm:$0xff] }
 0x45c   : > { %7388 = vst [vmem:[#allocation71_spill] sm:$0xff] %v5891_v9  ;;  %7390 = vst [vmem:[#allocation72_spill] sm:$0xff] %v5894_v25  ;;  %v5902_v27 = vadd.f32 %v5725_v58, %v7391_v26  ;;  %v7393_v59 = vld [vmem:[#allocation81_spill] sm:$0xff]  ;;  %v7395_v37 = vld [vmem:[#allocation82_spill] sm:$0xff] }
 0x45d   : > { %v5906_v17 = vadd.f32 %v5728_v31, %v7393_v59  ;;  %v5910_v48 = vadd.f32 %v5731_v22, %v7395_v37  ;;  %v7397_v33 = vld [vmem:[#allocation83_spill] sm:$0xff]  ;;  %v3623_v25 = vld [vmem:[%s3919_s21 + $0x688] sm:$0xff]  ;;  %v3624_v9 = vld [vmem:[%s3919_s21 + $0x690] sm:$0xff] }
 0x45e   : > { %7392 = vst [vmem:[#allocation73_spill] sm:$0xff] %v5902_v27  ;;  %v5914_v43 = vadd.f32 %v5734_v24, %v7397_v33  ;;  %v3622_v34 = vld [vmem:[%s3919_s21 + $0x680] sm:$0xff]  ;;  %v3625_v58 = vld [vmem:[%s3919_s21 + $0x698] sm:$0xff]  ;;  %v3627_v27 = vld [vmem:[%s3919_s21 + $0x6a8] sm:$0xff] }
 0x45f   : > { %7394 = vst [vmem:[#allocation74_spill] sm:$0xff] %v5906_v17  ;;  %7396 = vst [vmem:[#allocation75_spill] sm:$0xff] %v5910_v48  ;;  %v3626_v26 = vld [vmem:[%s3919_s21 + $0x6a0] sm:$0xff]  ;;  %v3628_v31 = vld [vmem:[%s3919_s21 + $0x6b0] sm:$0xff] }
 0x460   : > { %7398 = vst [vmem:[#allocation76_spill] sm:$0xff] %v5914_v43  ;;  %v3629_v59 = vld [vmem:[%s3919_s21 + $0x6b8] sm:$0xff]  ;;  %v3630_v33 = vld [vmem:[%s3919_s21 + $0x6c0] sm:$0xff]  ;;  %v3631_v43 = vld [vmem:[%s3919_s21 + $0x6c8] sm:$0xff] }
 0x461   : > { %v7399_v17 = vld [vmem:[#allocation91_spill] sm:$0xff]  ;;  %v3632_v48 = vld [vmem:[%s3919_s21 + $0x6d0] sm:$0xff]  ;;  %v3635_v55 = vld [vmem:[%s3919_s21 + $0x6e8] sm:$0xff] }
 0x462   : > { %v5925_v18 = vmul.f32 %v3606_v10, %v7399_v17  ;;  %v5928_v22 = vmul.f32 %v3607_v11, %v7399_v17  ;;  %v5931_v24 = vmul.f32 %v3608_v1, %v7399_v17  ;;  %v5934_v37 = vmul.f32 %v3609_v21, %v7399_v17  ;;  %v3633_v21 = vld [vmem:[%s3919_s21 + $0x6d8] sm:$0xff]  ;;  %v3634_v47 = vld [vmem:[%s3919_s21 + $0x6e0] sm:$0xff]  ;;  %v3640_v42 = vld [vmem:[%s3919_s21 + $0x710] sm:$0xff] }
 0x463   : > { %v5940_v56 = vmul.f32 %v3610_v39, %v7399_v17  ;;  %v5943_v10 = vmul.f32 %v3611_v53, %v7399_v17  ;;  %v5946_v11 = vmul.f32 %v3612_v7, %v7399_v17  ;;  %v5949_v1 = vmul.f32 %v3613_v54, %v7399_v17  ;;  %v3636_v54 = vld [vmem:[%s3919_s21 + $0x6f0] sm:$0xff]  ;;  %v3637_v3 = vld [vmem:[%s3919_s21 + $0x6f8] sm:$0xff]  ;;  %v3638_v60 = vld [vmem:[%s3919_s21 + $0x700] sm:$0xff] }
 0x464   : > { %v5955_v6 = vmul.f32 %v3614_v19, %v7399_v17  ;;  %v5958_v39 = vmul.f32 %v3615_v52, %v7399_v17  ;;  %v5961_v53 = vmul.f32 %v3616_v36, %v7399_v17  ;;  %v5964_v7 = vmul.f32 %v3617_v57, %v7399_v17  ;;  %v3639_v57 = vld [vmem:[%s3919_s21 + $0x708] sm:$0xff]  ;;  %v3641_v23 = vld [vmem:[%s3919_s21 + $0x718] sm:$0xff]  ;;  %v3650_v51 = vld [vmem:[%s3919_s21 + $0x760] sm:$0xff] }
 0x465   : > { %v5970_v28 = vmul.f32 %v3618_v32, %v7399_v17  ;;  %v5973_v19 = vmul.f32 %v3619_v15, %v7399_v17  ;;  %v5976_v52 = vmul.f32 %v3620_v61, %v7399_v17  ;;  %v5979_v36 = vmul.f32 %v3621_v14, %v7399_v17  ;;  %v3642_v61 = vld [vmem:[%s3919_s21 + $0x720] sm:$0xff]  ;;  %v3643_v41 = vld [vmem:[%s3919_s21 + $0x728] sm:$0xff]  ;;  %v3644_v14 = vld [vmem:[%s3919_s21 + $0x730] sm:$0xff] }
 0x466   : > { %7400 = vst [vmem:[#allocation77_spill] sm:$0xff] %v5961_v53  ;;  %7401 = vst [vmem:[#allocation78_spill] sm:$0xff] %v5964_v7  ;;  %v2157_v46 = vmul.f32 %v3622_v34, %v7399_v17  ;;  %v2158_v32 = vmul.f32 %v3623_v25, %v7399_v17  ;;  %v2159_v5 = vmul.f32 %v3624_v9, %v7399_v17  ;;  %v3645_v25 = vld [vmem:[%s3919_s21 + $0x738] sm:$0xff]  ;;  %v3646_v9 = vld [vmem:[%s3919_s21 + $0x740] sm:$0xff] }
 0x467   : > { %7402 = vst [vmem:[#allocation79_spill] sm:$0xff] %v5970_v28  ;;  %7403 = vst [vmem:[#allocation80_spill] sm:$0xff] %v5973_v19  ;;  %v2160_v15 = vmul.f32 %v3625_v58, %v7399_v17  ;;  %v2161_v0 = vmul.f32 %v3626_v26, %v7399_v17  ;;  %v2162_v38 = vmul.f32 %v3627_v27, %v7399_v17  ;;  %v3647_v12 = vld [vmem:[%s3919_s21 + $0x748] sm:$0xff]  ;;  %v3649_v27 = vld [vmem:[%s3919_s21 + $0x758] sm:$0xff] }
 0x468   : > { %7404 = vst [vmem:[#allocation81_spill] sm:$0xff] %v5976_v52  ;;  %7405 = vst [vmem:[#allocation82_spill] sm:$0xff] %v5979_v36  ;;  %v2163_v2 = vmul.f32 %v3628_v31, %v7399_v17  ;;  %v2164_v34 = vmul.f32 %v3629_v59, %v7399_v17  ;;  %v2165_v58 = vmul.f32 %v3630_v33, %v7399_v17  ;;  %v3648_v52 = vld [vmem:[%s3919_s21 + $0x750] sm:$0xff]  ;;  %v3651_v28 = vld [vmem:[%s3919_s21 + $0x768] sm:$0xff] }
 0x469   : > { %v2166_v36 = vmul.f32 %v3631_v43, %v7399_v17  ;;  %v2167_v8 = vmul.f32 %v3632_v48, %v7399_v17  ;;  %v2168_v26 = vmul.f32 %v3633_v21, %v7399_v17  ;;  %v2169_v31 = vmul.f32 %v3634_v47, %v7399_v17  ;;  %v3652_v45 = vld [vmem:[%s3919_s21 + $0x770] sm:$0xff]  ;;  %v3653_v33 = vld [vmem:[%s3919_s21 + $0x778] sm:$0xff] }
 0x46a   : > { %v2170_v59 = vmul.f32 %v3635_v55, %v7399_v17  ;;  %v2171_v19 = vmul.f32 %v3636_v54, %v7399_v17  ;;  %v2172_v20 = vmul.f32 %v3637_v3, %v7399_v17  ;;  %v2173_v43 = vmul.f32 %v3638_v60, %v7399_v17 }
 0x46b   : > { %v2174_v48 = vmul.f32 %v3639_v57, %v7399_v17  ;;  %v2175_v21 = vmul.f32 %v3640_v42, %v7399_v17  ;;  %v2176_v7 = vmul.f32 %v3641_v23, %v7399_v17  ;;  %v2177_v35 = vmul.f32 %v3642_v61, %v7399_v17 }
 0x46c   : > { %v2178_v47 = vmul.f32 %v3643_v41, %v7399_v17  ;;  %v2179_v55 = vmul.f32 %v3644_v14, %v7399_v17  ;;  %v2180_v54 = vmul.f32 %v3645_v25, %v7399_v17  ;;  %v2181_v3 = vmul.f32 %v3646_v9, %v7399_v17  ;;  %v7415_v9 = vld [vmem:[#allocation144_spill] sm:$0xff] }
 0x46d   : > { %v2182_v53 = vmul.f32 %v3647_v12, %v7399_v17  ;;  %v2183_v60 = vmul.f32 %v3648_v52, %v7399_v17  ;;  %v2184_v57 = vmul.f32 %v3649_v27, %v7399_v17  ;;  %v2185_v42 = vmul.f32 %v3650_v51, %v7399_v17  ;;  %v7417_v27 = vld [vmem:[#allocation86_spill] sm:$0xff] }
 0x46e   : > { %v2186_v23 = vmul.f32 %v3651_v28, %v7399_v17  ;;  %v2187_v61 = vmul.f32 %v3652_v45, %v7399_v17  ;;  %v2188_v41 = vmul.f32 %v3653_v33, %v7399_v17  ;;  %v2189_v14 = vadd.f32 %v5925_v18, %v5738_v16  ;;  %v7407_v17 = vld [vmem:[#allocation90_spill] sm:$0xff] }
 0x46f   : > { %v2190_v25 = vadd.f32 %v5928_v22, %v5742_v29  ;;  %v2191_v12 = vadd.f32 %v5931_v24, %v5746_v44  ;;  %v2192_v52 = vadd.f32 %v5934_v37, %v5750_v62  ;;  %v2193_v51 = vadd.f32 %v5940_v56, %v5754_v50  ;;  %v7406_v62 = vld [vmem:[#allocation77_spill] sm:$0xff]  ;;  %v7408_v50 = vld [vmem:[#allocation78_spill] sm:$0xff]  ;;  %v7409_v22 = vld [vmem:[#allocation84_spill] sm:$0xff] }
 0x470   : > { %v2194_v45 = vadd.f32 %v5943_v10, %v5758_v13  ;;  %v2195_v28 = vadd.f32 %v5946_v11, %v5762_v4  ;;  %v2196_v16 = vadd.f32 %v5949_v1, %v5766_v49  ;;  %v2197_v29 = vadd.f32 %v5955_v6, %v5770_v30  ;;  %v7410_v13 = vld [vmem:[#allocation79_spill] sm:$0xff]  ;;  %v7411_v37 = vld [vmem:[#allocation93_spill] sm:$0xff]  ;;  %v7412_v4 = vld [vmem:[#allocation80_spill] sm:$0xff] }
 0x471   : > { %v2198_v44 = vadd.f32 %v5958_v39, %v5774_v40  ;;  %v2199_v18 = vadd.f32 %v7406_v62, %v5778_v63  ;;  %v2200_v56 = vadd.f32 %v7408_v50, %v7407_v17  ;;  %v2201_v24 = vadd.f32 %v7410_v13, %v7409_v22  ;;  %v7413_v11 = vld [vmem:[#allocation85_spill] sm:$0xff]  ;;  %v7416_v30 = vld [vmem:[#allocation82_spill] sm:$0xff]  ;;  %v7419_v63 = vld [vmem:[#allocation87_spill] sm:$0xff] }
 0x472   : > { %v2202_v10 = vadd.f32 %v7412_v4, %v7411_v37  ;;  %v7414_v49 = vld [vmem:[#allocation81_spill] sm:$0xff]  ;;  %v2204_v6 = vadd.f32 %v7416_v30, %v7415_v9  ;;  %v2205_v40 = vadd.f32 %v2157_v46, %v7417_v27  ;;  %v7418_v39 = vld [vmem:[#allocation94_spill] sm:$0xff]  ;;  %v2207_v62 = vadd.f32 %v2159_v5, %v7419_v63  ;;  %v7420_v17 = vld [vmem:[#allocation59_spill] sm:$0xff] }
 0x473   : > { %v2203_v1 = vadd.f32 %v7414_v49, %v7413_v11  ;;  %v2206_v33 = vadd.f32 %v2158_v32, %v7418_v39  ;;  %v2208_v50 = vadd.f32 %v2160_v15, %v7420_v17  ;;  %v7421_v13 = vld [vmem:[#allocation88_spill] sm:$0xff]  ;;  %v7422_v4 = vld [vmem:[#allocation95_spill] sm:$0xff]  ;;  %v7423_v11 = vld [vmem:[#allocation89_spill] sm:$0xff] }
 0x474   : > { %v2209_v22 = vadd.f32 %v2161_v0, %v7421_v13  ;;  %v2210_v37 = vadd.f32 %v2162_v38, %v7422_v4  ;;  %v2211_v49 = vadd.f32 %v2163_v2, %v7423_v11  ;;  %v7424_v9 = vld [vmem:[#allocation145_spill] sm:$0xff]  ;;  %v7425_v27 = vld [vmem:[#allocation150_spill] sm:$0xff]  ;;  %v7426_v32 = vld [vmem:[#allocation60_spill] sm:$0xff] }
 0x475   : > { %v2212_v30 = vadd.f32 %v2164_v34, %v7424_v9  ;;  %v2213_v46 = vadd.f32 %v2165_v58, %v7425_v27  ;;  %v2214_v39 = vadd.f32 %v2166_v36, %v7426_v32  ;;  %v7427_v5 = vld [vmem:[#allocation151_spill] sm:$0xff]  ;;  %v7428_v15 = vld [vmem:[#allocation146_spill] sm:$0xff]  ;;  %v7429_v0 = vld [vmem:[#allocation152_spill] sm:$0xff] }
 0x476   : > { %v2215_v63 = vadd.f32 %v2167_v8, %v7427_v5  ;;  %v2216_v17 = vadd.f32 %v2168_v26, %v7428_v15  ;;  %v2217_v13 = vadd.f32 %v2169_v31, %v7429_v0  ;;  %v7430_v4 = vld [vmem:[#allocation61_spill] sm:$0xff]  ;;  %v7431_v2 = vld [vmem:[#allocation147_spill] sm:$0xff]  ;;  %v7432_v9 = vld [vmem:[#allocation62_spill] sm:$0xff] }
 0x477   : > { %v2218_v38 = vadd.f32 %v2170_v59, %v7430_v4  ;;  %v2219_v11 = vadd.f32 %v2171_v19, %v7431_v2  ;;  %v2220_v34 = vadd.f32 %v2172_v20, %v7432_v9  ;;  %v7433_v27 = vld [vmem:[#allocation148_spill] sm:$0xff]  ;;  %v7434_v32 = vld [vmem:[#allocation63_spill] sm:$0xff]  ;;  %v7435_v5 = vld [vmem:[#allocation149_spill] sm:$0xff] }
 0x478   : > { %v2221_v58 = vadd.f32 %v2173_v43, %v7433_v27  ;;  %v2222_v36 = vadd.f32 %v2174_v48, %v7434_v32  ;;  %v2223_v8 = vadd.f32 %v2175_v21, %v7435_v5  ;;  %v7436_v15 = vld [vmem:[#allocation64_spill] sm:$0xff]  ;;  %v7437_v0 = vld [vmem:[#allocation65_spill] sm:$0xff]  ;;  %v7438_v4 = vld [vmem:[#allocation66_spill] sm:$0xff] }
 0x479   : > { %v2224_v26 = vadd.f32 %v2176_v7, %v7436_v15  ;;  %v2225_v31 = vadd.f32 %v2177_v35, %v7437_v0  ;;  %v2226_v59 = vadd.f32 %v2178_v47, %v7438_v4  ;;  %v7439_v2 = vld [vmem:[#allocation67_spill] sm:$0xff]  ;;  %v7440_v9 = vld [vmem:[#allocation68_spill] sm:$0xff]  ;;  %v7441_v27 = vld [vmem:[#allocation69_spill] sm:$0xff] }
 0x47a   : > { %v2227_v19 = vadd.f32 %v2179_v55, %v7439_v2  ;;  %v2228_v20 = vadd.f32 %v2180_v54, %v7440_v9  ;;  %v2229_v43 = vadd.f32 %v2181_v3, %v7441_v27  ;;  %v7442_v32 = vld [vmem:[#allocation70_spill] sm:$0xff]  ;;  %v7443_v5 = vld [vmem:[#allocation71_spill] sm:$0xff]  ;;  %v7444_v7 = vld [vmem:[#allocation72_spill] sm:$0xff] }
 0x47b   : > { %v2230_v48 = vadd.f32 %v2182_v53, %v7442_v32  ;;  %v2231_v21 = vadd.f32 %v2183_v60, %v7443_v5  ;;  %v2232_v15 = vadd.f32 %v2184_v57, %v7444_v7  ;;  %v7445_v0 = vld [vmem:[#allocation73_spill] sm:$0xff]  ;;  %v7446_v4 = vld [vmem:[#allocation74_spill] sm:$0xff]  ;;  %v7447_v2 = vld [vmem:[#allocation75_spill] sm:$0xff] }
 0x47c   : > { %v2233_v35 = vadd.f32 %v2185_v42, %v7445_v0  ;;  %v2234_v47 = vadd.f32 %v2186_v23, %v7446_v4  ;;  %v2235_v55 = vadd.f32 %v2187_v61, %v7447_v2  ;;  %v7448_v9 = vld [vmem:[#allocation76_spill] sm:$0xff]  ;;  %v7460_v2 = vld [vmem:[#allocation101_spill] sm:$0xff] }
 0x47d   : > { %v2236_v54 = vadd.f32 %v2188_v41, %v7448_v9  ;;  %v7449_v3 = vld [vmem:[#allocation92_spill] sm:$0xff] }
 0x47e   : > { %v2360_v27 = vmul.f32 %v7449_v3, %v2189_v14  ;;  %v2361_v32 = vmul.f32 %v7449_v3, %v2190_v25  ;;  %v2362_v53 = vmul.f32 %v7449_v3, %v2191_v12  ;;  %v2363_v5 = vmul.f32 %v7449_v3, %v2192_v52  ;;  %v7459_v4 = vld [vmem:[#allocation100_spill] sm:$0xff] }
 0x47f   : > { %v2364_v60 = vmul.f32 %v7449_v3, %v2193_v51  ;;  %v2365_v57 = vmul.f32 %v7449_v3, %v2194_v45  ;;  %v2366_v42 = vmul.f32 %v7449_v3, %v2195_v28  ;;  %v2367_v23 = vmul.f32 %v7449_v3, %v2196_v16 }
 0x480   : > { %v2368_v61 = vmul.f32 %v7449_v3, %v2197_v29  ;;  %v2369_v41 = vmul.f32 %v7449_v3, %v2198_v44  ;;  %v2370_v14 = vmul.f32 %v7449_v3, %v2199_v18  ;;  %v2371_v25 = vmul.f32 %v7449_v3, %v2200_v56 }
 0x481   : > { %v2372_v12 = vmul.f32 %v7449_v3, %v2201_v24  ;;  %v2373_v52 = vmul.f32 %v7449_v3, %v2202_v10  ;;  %v2374_v51 = vmul.f32 %v7449_v3, %v2203_v1  ;;  %v2375_v45 = vmul.f32 %v7449_v3, %v2204_v6 }
 0x482   : > { %v2376_v28 = vmul.f32 %v7449_v3, %v2205_v40  ;;  %v2377_v16 = vmul.f32 %v7449_v3, %v2206_v33  ;;  %v2378_v29 = vmul.f32 %v7449_v3, %v2207_v62  ;;  %v2379_v44 = vmul.f32 %v7449_v3, %v2208_v50 }
 0x483   : > { %v2380_v18 = vmul.f32 %v7449_v3, %v2209_v22  ;;  %v2381_v56 = vmul.f32 %v7449_v3, %v2210_v37  ;;  %v2382_v24 = vmul.f32 %v7449_v3, %v2211_v49  ;;  %v2383_v10 = vmul.f32 %v7449_v3, %v2212_v30 }
 0x484   : > { %v6117_v1 = vmul.f32 %v7449_v3, %v2213_v46  ;;  %v6120_v6 = vmul.f32 %v7449_v3, %v2214_v39  ;;  %v6123_v40 = vmul.f32 %v7449_v3, %v2215_v63  ;;  %v6126_v33 = vmul.f32 %v7449_v3, %v2216_v17 }
 0x485   : > { %v6129_v62 = vmul.f32 %v7449_v3, %v2217_v13  ;;  %v6132_v50 = vmul.f32 %v7449_v3, %v2218_v38  ;;  %v6135_v22 = vmul.f32 %v7449_v3, %v2219_v11  ;;  %v6138_v37 = vmul.f32 %v7449_v3, %v2220_v34 }
 0x486   : > { %v6141_v49 = vmul.f32 %v7449_v3, %v2221_v58  ;;  %v6144_v30 = vmul.f32 %v7449_v3, %v2222_v36  ;;  %v6147_v46 = vmul.f32 %v7449_v3, %v2223_v8  ;;  %v6150_v39 = vmul.f32 %v7449_v3, %v2224_v26 }
 0x487   : > { %v6153_v63 = vmul.f32 %v7449_v3, %v2225_v31  ;;  %v6156_v17 = vmul.f32 %v7449_v3, %v2226_v59  ;;  %v6159_v13 = vmul.f32 %v7449_v3, %v2227_v19  ;;  %v6162_v38 = vmul.f32 %v7449_v3, %v2228_v20  ;;  %v7455_v19 = vld [vmem:[#allocation96_spill] sm:$0xff] }
 0x488   : > { %v6165_v11 = vmul.f32 %v7449_v3, %v2229_v43  ;;  %v6168_v34 = vmul.f32 %v7449_v3, %v2230_v48  ;;  %v6171_v58 = vmul.f32 %v7449_v3, %v2231_v21  ;;  %v6174_v36 = vmul.f32 %v7449_v3, %v2232_v15  ;;  %v7456_v43 = vld [vmem:[#allocation97_spill] sm:$0xff]  ;;  %v7457_v21 = vld [vmem:[#allocation98_spill] sm:$0xff]  ;;  %v7458_v15 = vld [vmem:[#allocation99_spill] sm:$0xff] }
 0x489   : > { %v6177_v8 = vmul.f32 %v7449_v3, %v2233_v35  ;;  %v6180_v26 = vmul.f32 %v7449_v3, %v2234_v47  ;;  %v6183_v31 = vmul.f32 %v7449_v3, %v2235_v55  ;;  %v6186_v59 = vmul.f32 %v7449_v3, %v2236_v54  ;;  %v7461_v47 = vld [vmem:[#allocation102_spill] sm:$0xff]  ;;  %v7464_v54 = vld [vmem:[#allocation105_spill] sm:$0xff] }
 0x48a   : > { %7450 = vst [vmem:[#allocation83_spill] sm:$0xff] %v6174_v36  ;;  %v2408_v20 = vadd.f32 %v2360_v27, %v7455_v19  ;;  %v2409_v48 = vadd.f32 %v2361_v32, %v7456_v43  ;;  %v2410_v7 = vadd.f32 %v2362_v53, %v7457_v21  ;;  %v2411_v0 = vadd.f32 %v2363_v5, %v7458_v15  ;;  %v7466_v19 = vld [vmem:[#allocation107_spill] sm:$0xff]  ;;  %v7467_v53 = vld [vmem:[#allocation108_spill] sm:$0xff]  ;;  %v7469_v43 = vld [vmem:[#allocation110_spill] sm:$0xff] }
 0x48b   : > { %7451 = vst [vmem:[#allocation91_spill] sm:$0xff] %v6177_v8  ;;  %7452 = vst [vmem:[#allocation77_spill] sm:$0xff] %v6180_v26  ;;  %v2412_v35 = vadd.f32 %v2364_v60, %v7459_v4  ;;  %v2413_v9 = vadd.f32 %v2365_v57, %v7460_v2  ;;  %v2414_v26 = vadd.f32 %v2366_v42, %v7461_v47  ;;  %v7462_v8 = vld [vmem:[#allocation103_spill] sm:$0xff]  ;;  %v7468_v60 = vld [vmem:[#allocation109_spill] sm:$0xff] }
 0x48c   : > { %7453 = vst [vmem:[#allocation90_spill] sm:$0xff] %v6183_v31  ;;  %7454 = vst [vmem:[#allocation78_spill] sm:$0xff] %v6186_v59  ;;  %v2415_v55 = vadd.f32 %v2367_v23, %v7462_v8  ;;  %v7463_v31 = vld [vmem:[#allocation104_spill] sm:$0xff]  ;;  %v2417_v3 = vadd.f32 %v2369_v41, %v7464_v54  ;;  %v7465_v59 = vld [vmem:[#allocation106_spill] sm:$0xff]  ;;  %v2419_v32 = vadd.f32 %v2371_v25, %v7466_v19 }
 0x48d   : > { %v2416_v36 = vadd.f32 %v2368_v61, %v7463_v31  ;;  %v2418_v27 = vadd.f32 %v2370_v14, %v7465_v59  ;;  %2456 = vst [vmem:[#allocation4] sm:$0xff] %v2408_v20  ;;  %2457 = vst [vmem:[#allocation4 + $0x8] sm:$0xff] %v2409_v48  ;;  %v2420_v5 = vadd.f32 %v2372_v12, %v7467_v53  ;;  %v7470_v21 = vld [vmem:[#allocation111_spill] sm:$0xff]  ;;  %v7471_v61 = vld [vmem:[#allocation112_spill] sm:$0xff] }
 0x48e   : > { %2458 = vst [vmem:[#allocation4 + $0x10] sm:$0xff] %v2410_v7  ;;  %2459 = vst [vmem:[#allocation4 + $0x18] sm:$0xff] %v2411_v0  ;;  %v2421_v57 = vadd.f32 %v2373_v52, %v7468_v60  ;;  %v2422_v42 = vadd.f32 %v2374_v51, %v7469_v43  ;;  %v2423_v23 = vadd.f32 %v2375_v45, %v7470_v21  ;;  %v7472_v14 = vld [vmem:[#allocation113_spill] sm:$0xff]  ;;  %v7473_v8 = vld [vmem:[#allocation114_spill] sm:$0xff] }
 0x48f   : > { %2460 = vst [vmem:[#allocation4 + $0x20] sm:$0xff] %v2412_v35  ;;  %2461 = vst [vmem:[#allocation4 + $0x28] sm:$0xff] %v2413_v9  ;;  %v2424_v41 = vadd.f32 %v2376_v28, %v7471_v61  ;;  %v2425_v25 = vadd.f32 %v2377_v16, %v7472_v14  ;;  %v2426_v31 = vadd.f32 %v2378_v29, %v7473_v8  ;;  %v7474_v59 = vld [vmem:[#allocation115_spill] sm:$0xff]  ;;  %v7475_v12 = vld [vmem:[#allocation116_spill] sm:$0xff] }
 0x490   : > { %2462 = vst [vmem:[#allocation4 + $0x30] sm:$0xff] %v2414_v26  ;;  %2463 = vst [vmem:[#allocation4 + $0x38] sm:$0xff] %v2415_v55  ;;  %v2427_v20 = vadd.f32 %v2379_v44, %v7474_v59  ;;  %v2428_v52 = vadd.f32 %v2380_v18, %v7475_v12  ;;  %v7476_v51 = vld [vmem:[#allocation117_spill] sm:$0xff]  ;;  %v7477_v48 = vld [vmem:[#allocation118_spill] sm:$0xff] }
 0x491   : > { %2464 = vst [vmem:[#allocation4 + $0x40] sm:$0xff] %v2416_v36  ;;  %2465 = vst [vmem:[#allocation4 + $0x48] sm:$0xff] %v2417_v3  ;;  %v2429_v45 = vadd.f32 %v2381_v56, %v7476_v51  ;;  %v2430_v7 = vadd.f32 %v2382_v24, %v7477_v48  ;;  %v7478_v26 = vld [vmem:[#allocation119_spill] sm:$0xff]  ;;  %v7479_v28 = vld [vmem:[#allocation120_spill] sm:$0xff] }
 0x492   : > { %2466 = vst [vmem:[#allocation4 + $0x50] sm:$0xff] %v2418_v27  ;;  %2467 = vst [vmem:[#allocation4 + $0x58] sm:$0xff] %v2419_v32  ;;  %v2431_v15 = vadd.f32 %v2383_v10, %v7478_v26  ;;  %v2432_v16 = vadd.f32 %v6117_v1, %v7479_v28  ;;  %v7480_v29 = vld [vmem:[#allocation121_spill] sm:$0xff]  ;;  %v7481_v36 = vld [vmem:[#allocation122_spill] sm:$0xff] }
 0x493   : > { %2468 = vst [vmem:[#allocation4 + $0x60] sm:$0xff] %v2420_v5  ;;  %2469 = vst [vmem:[#allocation4 + $0x68] sm:$0xff] %v2421_v57  ;;  %v2433_v44 = vadd.f32 %v6120_v6, %v7480_v29  ;;  %v2434_v0 = vadd.f32 %v6123_v40, %v7481_v36  ;;  %v7482_v18 = vld [vmem:[#allocation123_spill] sm:$0xff]  ;;  %v7483_v24 = vld [vmem:[#allocation124_spill] sm:$0xff] }
 0x494   : > { %2470 = vst [vmem:[#allocation4 + $0x70] sm:$0xff] %v2422_v42  ;;  %2471 = vst [vmem:[#allocation4 + $0x78] sm:$0xff] %v2423_v23  ;;  %v2435_v56 = vadd.f32 %v6126_v33, %v7482_v18  ;;  %v2436_v10 = vadd.f32 %v6129_v62, %v7483_v24  ;;  %v7484_v4 = vld [vmem:[#allocation125_spill] sm:$0xff]  ;;  %v7485_v1 = vld [vmem:[#allocation126_spill] sm:$0xff] }
 0x495   : > { %2472 = vst [vmem:[#allocation4 + $0x80] sm:$0xff] %v2424_v41  ;;  %2473 = vst [vmem:[#allocation4 + $0x88] sm:$0xff] %v2425_v25  ;;  %v2437_v35 = vadd.f32 %v6132_v50, %v7484_v4  ;;  %v2438_v2 = vadd.f32 %v6135_v22, %v7485_v1  ;;  %v7486_v6 = vld [vmem:[#allocation127_spill] sm:$0xff]  ;;  %v7487_v40 = vld [vmem:[#allocation128_spill] sm:$0xff] }
 0x496   : > { %2474 = vst [vmem:[#allocation4 + $0x90] sm:$0xff] %v2426_v31  ;;  %2475 = vst [vmem:[#allocation4 + $0x98] sm:$0xff] %v2427_v20  ;;  %v2439_v9 = vadd.f32 %v6138_v37, %v7486_v6  ;;  %v2440_v33 = vadd.f32 %v6141_v49, %v7487_v40  ;;  %v7488_v47 = vld [vmem:[#allocation129_spill] sm:$0xff]  ;;  %v7489_v62 = vld [vmem:[#allocation130_spill] sm:$0xff] }
 0x497   : > { %2476 = vst [vmem:[#allocation4 + $0xa0] sm:$0xff] %v2428_v52  ;;  %2477 = vst [vmem:[#allocation4 + $0xa8] sm:$0xff] %v2429_v45  ;;  %v2441_v55 = vadd.f32 %v6144_v30, %v7488_v47  ;;  %v2442_v54 = vadd.f32 %v6147_v46, %v7489_v62  ;;  %v7490_v50 = vld [vmem:[#allocation131_spill] sm:$0xff]  ;;  %v7491_v22 = vld [vmem:[#allocation132_spill] sm:$0xff] }
 0x498   : > { %2478 = vst [vmem:[#allocation4 + $0xb0] sm:$0xff] %v2430_v7  ;;  %2479 = vst [vmem:[#allocation4 + $0xb8] sm:$0xff] %v2431_v15  ;;  %v2443_v3 = vadd.f32 %v6150_v39, %v7490_v50  ;;  %v2444_v37 = vadd.f32 %v6153_v63, %v7491_v22  ;;  %v7492_v27 = vld [vmem:[#allocation133_spill] sm:$0xff]  ;;  %v7493_v49 = vld [vmem:[#allocation134_spill] sm:$0xff]  ;;  %v1536_v39 = vpop.xlane.xlu1 %1535 }
 0x499   : > { %2480 = vst [vmem:[#allocation4 + $0xc0] sm:$0xff] %v2432_v16  ;;  %2481 = vst [vmem:[#allocation4 + $0xc8] sm:$0xff] %v2433_v44  ;;  %v2445_v19 = vadd.f32 %v6156_v17, %v7492_v27  ;;  %v2446_v32 = vadd.f32 %v6159_v13, %v7493_v49  ;;  %v7494_v30 = vld [vmem:[#allocation135_spill] sm:$0xff]  ;;  %v7495_v5 = vld [vmem:[#allocation136_spill] sm:$0xff] }
 0x49a   : > { %2482 = vst [vmem:[#allocation4 + $0xd0] sm:$0xff] %v2434_v0  ;;  %2483 = vst [vmem:[#allocation4 + $0xd8] sm:$0xff] %v2435_v56  ;;  %v2447_v53 = vadd.f32 %v6162_v38, %v7494_v30  ;;  %v2245_v46 = vld [vmem:[#allocation3] sm:$0x1]  ;;  %v2448_v60 = vadd.f32 %v6165_v11, %v7495_v5  ;;  %v7496_v57 = vld [vmem:[#allocation137_spill] sm:$0xff] }
 0x49b   : > { %2484 = vst [vmem:[#allocation4 + $0xe0] sm:$0xff] %v2436_v10  ;;  %2485 = vst [vmem:[#allocation4 + $0xe8] sm:$0xff] %v2437_v35  ;;  %v2449_v63 = vadd.f32 %v6168_v34, %v7496_v57  ;;  %v7497_v43 = vld [vmem:[#allocation138_spill] sm:$0xff]  ;;  %v7498_v42 = vld [vmem:[#allocation139_spill] sm:$0xff] }
 0x49c   : > { %2486 = vst [vmem:[#allocation4 + $0xf0] sm:$0xff] %v2438_v2  ;;  %2487 = vst [vmem:[#allocation4 + $0xf8] sm:$0xff] %v2439_v9  ;;  %v2450_v17 = vadd.f32 %v6171_v58, %v7497_v43  ;;  %v7499_v13 = vld [vmem:[#allocation83_spill] sm:$0xff]  ;;  %v7500_v38 = vld [vmem:[#allocation140_spill] sm:$0xff] }
 0x49d   : > { %v2451_v21 = vadd.f32 %v7499_v13, %v7498_v42  ;;  %2488 = vst [vmem:[#allocation4 + $0x100] sm:$0xff] %v2440_v33  ;;  %2489 = vst [vmem:[#allocation4 + $0x108] sm:$0xff] %v2441_v55  ;;  %v7501_v23 = vld [vmem:[#allocation91_spill] sm:$0xff]  ;;  %v7502_v41 = vld [vmem:[#allocation141_spill] sm:$0xff] }
 0x49e   : > { %2490 = vst [vmem:[#allocation4 + $0x110] sm:$0xff] %v2442_v54  ;;  %2491 = vst [vmem:[#allocation4 + $0x118] sm:$0xff] %v2443_v3  ;;  %v2452_v61 = vadd.f32 %v7501_v23, %v7500_v38  ;;  %v7503_v14 = vld [vmem:[#allocation77_spill] sm:$0xff]  ;;  %v7504_v11 = vld [vmem:[#allocation142_spill] sm:$0xff] }
 0x49f   : > { %v2453_v25 = vadd.f32 %v7503_v14, %v7502_v41  ;;  %v7505_v8 = vld [vmem:[#allocation90_spill] sm:$0xff]  ;;  %v7506_v34 = vld [vmem:[#allocation143_spill] sm:$0xff]  ;;  %2492 = vst [vmem:[#allocation4 + $0x120] sm:$0xff] %v2444_v37  ;;  %2493 = vst [vmem:[#allocation4 + $0x128] sm:$0xff] %v2445_v19 }
 0x4a0   : > { %v2454_v31 = vadd.f32 %v7505_v8, %v7504_v11  ;;  %v7507_v59 = vld [vmem:[#allocation78_spill] sm:$0xff]  ;;  %2494 = vst [vmem:[#allocation4 + $0x130] sm:$0xff] %v2446_v32  ;;  %2495 = vst [vmem:[#allocation4 + $0x138] sm:$0xff] %v2447_v53  ;;  %v7508_v58 = vld [vmem:[#allocation57_spill] sm:$0xff]  ;;  %2508 = sbr.rel (%p3654_p5) target bundleno = 1925 (0x785), region = 40 }
 0x4a1   : > { %v2455_v20 = vadd.f32 %v7507_v59, %v7506_v34  ;;  %2496 = vst [vmem:[#allocation4 + $0x140] sm:$0xff] %v2448_v60  ;;  %2497 = vst [vmem:[#allocation4 + $0x148] sm:$0xff] %v2449_v63  ;;  %v2246_v12 = vmul.f32 %v7508_v58, %v2245_v46  ;;  %v7509_v52 = vld [vmem:[#allocation58_spill] sm:$0xff] }
 0x4a2   : > { %2498 = vst [vmem:[#allocation4 + $0x150] sm:$0xff] %v2450_v17  ;;  %2499 = vst [vmem:[#allocation4 + $0x158] sm:$0xff] %v2451_v21  ;;  %v2247_v51 = vmul.f32 %v7509_v52, %v1536_v39 }
 0x4a3   : > { %2500 = vst [vmem:[#allocation4 + $0x160] sm:$0xff] %v2452_v61  ;;  %2501 = vst [vmem:[#allocation4 + $0x168] sm:$0xff] %v2453_v25 }
 0x4a4   : > { %2502 = vst [vmem:[#allocation4 + $0x170] sm:$0xff] %v2454_v31  ;;  %2503 = vst [vmem:[#allocation4 + $0x178] sm:$0xff] %v2455_v20  ;;  %v2248_v45 = vadd.f32 %v2247_v51, %v2246_v12 }
 0x4a6   : > { %2250 = vst.msk [vmem:[#allocation3] sm:$0x1] %vm2249_vm6, %v2248_v45 }
 0x4a7   : > { %v3876_v7 = vmov 0   ;;  %v7510_v15 = vld [vmem:[#allocation56_spill] sm:$0xff]  ;;  %v2510_v29 = vld [vmem:[#allocation4 + $0x8] sm:$0xff]  ;;  %v2511_v56 = vld [vmem:[#allocation4 + $0x10] sm:$0xff] }
 0x4a8   : > { %3730 = vset.pattern.permute.xlu0 %v3876_v7  ;;  %v7511_v28 = vsub.s32 0, %v7510_v15  ;;  %v2509_v44 = vld [vmem:[#allocation4] sm:$0xff]  ;;  %v2519_v24 = vld [vmem:[#allocation4 + $0x50] sm:$0xff]  ;;  %v2512_v35 = vld [vmem:[#allocation4 + $0x18] sm:$0xff] }
 0x4a9   : > { %v2521_v1 = vld [vmem:[#allocation4 + $0x60] sm:$0xff]  ;;  %v2523_v40 = vld [vmem:[#allocation4 + $0x70] sm:$0xff]  ;;  %v2514_v55 = vld [vmem:[#allocation4 + $0x28] sm:$0xff] }
 0x4aa   : > { %v2513_v9 = vld [vmem:[#allocation4 + $0x20] sm:$0xff]  ;;  %v2515_v3 = vld [vmem:[#allocation4 + $0x30] sm:$0xff]  ;;  %v2516_v19 = vld [vmem:[#allocation4 + $0x38] sm:$0xff] }
 0x4ab   : > { %v2525_v62 = vld [vmem:[#allocation4 + $0x80] sm:$0xff]  ;;  %v2527_v22 = vld [vmem:[#allocation4 + $0x90] sm:$0xff]  ;;  %v2518_v60 = vld [vmem:[#allocation4 + $0x48] sm:$0xff] }
 0x4ac   : > { %v2529_v49 = vld [vmem:[#allocation4 + $0xa0] sm:$0xff]  ;;  %v2531_v46 = vld [vmem:[#allocation4 + $0xb0] sm:$0xff]  ;;  %v2520_v17 = vld [vmem:[#allocation4 + $0x58] sm:$0xff] }
 0x4ad   : > { %v2557_v48 = vld [vmem:[#allocation3] sm:$0x1]  ;;  %v2517_v53 = vld [vmem:[#allocation4 + $0x40] sm:$0xff]  ;;  %v2535_v42 = vld [vmem:[#allocation4 + $0xd0] sm:$0xff] }
 0x4ae   : > { %3731 = vrcp.f32 %v2557_v48  ;;  %v2533_v57 = vld [vmem:[#allocation4 + $0xc0] sm:$0xff]  ;;  %v2522_v38 = vld [vmem:[#allocation4 + $0x68] sm:$0xff]  ;;  %v2524_v14 = vld [vmem:[#allocation4 + $0x78] sm:$0xff] }
 0x4af   : > { %v2537_v23 = vld [vmem:[#allocation4 + $0xe0] sm:$0xff]  ;;  %v2539_v25 = vld [vmem:[#allocation4 + $0xf0] sm:$0xff]  ;;  %v2526_v31 = vld [vmem:[#allocation4 + $0x88] sm:$0xff] }
 0x4b0   : > { %v2541_v34 = vld [vmem:[#allocation4 + $0x100] sm:$0xff]  ;;  %v2528_v58 = vld [vmem:[#allocation4 + $0x98] sm:$0xff]  ;;  %v2543_v12 = vld [vmem:[#allocation4 + $0x110] sm:$0xff] }
 0x4b1   : > { %v2530_v45 = vld [vmem:[#allocation4 + $0xa8] sm:$0xff]  ;;  %v2545_v48 = vld [vmem:[#allocation4 + $0x120] sm:$0xff]  ;;  %v2532_v15 = vld [vmem:[#allocation4 + $0xb8] sm:$0xff] }
 0x4b8   : > { %v3732_v26 = vpop.eup %3731 }
 0x4b9   : > { %v2563_v16 = vrot.slane %v3732_v26, %v7511_v28  ;;  %v2547_v28 = vld [vmem:[#allocation4 + $0x130] sm:$0xff] }
 0x4bb   : > { %2565 = vperm.xlu0 %3730, %v2563_v16  }
 0x53a   : > { %v6266_v36 = vpop.permute.xlu0 %2565 }
 0x53b   : > { %v6269_v0 = vmul.f32 %v6266_v36, %v2510_v29  ;;  %v6272_v18 = vmul.f32 %v6266_v36, %v2509_v44  ;;  %v6277_v10 = vmul.f32 %v6266_v36, %v2511_v56  ;;  %v6280_v4 = vmul.f32 %v6266_v36, %v2519_v24  ;;  %v2534_v44 = vld [vmem:[#allocation4 + $0xc8] sm:$0xff]  ;;  %v2549_v56 = vld [vmem:[#allocation4 + $0x140] sm:$0xff] }
 0x53c   : > { %v6285_v2 = vmul.f32 %v6266_v36, %v2512_v35  ;;  %v6288_v6 = vmul.f32 %v6266_v36, %v2521_v1  ;;  %v6293_v33 = vmul.f32 %v6266_v36, %v2513_v9  ;;  %v6296_v47 = vmul.f32 %v6266_v36, %v2523_v40  ;;  %v2536_v1 = vld [vmem:[#allocation4 + $0xd8] sm:$0xff]  ;;  %v2551_v9 = vld [vmem:[#allocation4 + $0x150] sm:$0xff] }
 0x53d   : > { %2618 = vmax.xlane.f32.xlu1 %v6269_v0  ;;  %2616 = vmax.xlane.f32.xlu0 %v6272_v18  ;;  %7512 = vst [vmem:[#allocation153_spill] sm:$0xff] %v6280_v4  ;;  %v6301_v54 = vmul.f32 %v6266_v36, %v2514_v55  ;;  %v6304_v50 = vmul.f32 %v6266_v36, %v2525_v62  ;;  %v2538_v62 = vld [vmem:[#allocation4 + $0xe8] sm:$0xff] }
 0x53e   : > { %7513 = vst [vmem:[#allocation154_spill] sm:$0xff] %v6288_v6  ;;  %7514 = vst [vmem:[#allocation155_spill] sm:$0xff] %v6296_v47  ;;  %v6309_v37 = vmul.f32 %v6266_v36, %v2515_v3  ;;  %v6312_v27 = vmul.f32 %v6266_v36, %v2527_v22  ;;  %v6317_v32 = vmul.f32 %v6266_v36, %v2516_v19  ;;  %v2553_v3 = vld [vmem:[#allocation4 + $0x160] sm:$0xff] }
 0x53f   : > { %7515 = vst [vmem:[#allocation156_spill] sm:$0xff] %v6304_v50  ;;  %v6320_v30 = vmul.f32 %v6266_v36, %v2529_v49  ;;  %v6325_v39 = vmul.f32 %v6266_v36, %v2517_v53  ;;  %v6328_v5 = vmul.f32 %v6266_v36, %v2531_v46  ;;  %v6333_v63 = vmul.f32 %v6266_v36, %v2518_v60  ;;  %v2540_v49 = vld [vmem:[#allocation4 + $0xf8] sm:$0xff]  ;;  %v2555_v53 = vld [vmem:[#allocation4 + $0x170] sm:$0xff] }
 0x540   : > { %7516 = vst [vmem:[#allocation157_spill] sm:$0xff] %v6312_v27  ;;  %v6336_v43 = vmul.f32 %v6266_v36, %v2533_v57  ;;  %v6341_v13 = vmul.f32 %v6266_v36, %v2520_v17  ;;  %v6344_v21 = vmul.f32 %v6266_v36, %v2535_v42  ;;  %v6349_v61 = vmul.f32 %v6266_v36, %v2522_v38  ;;  %v2542_v57 = vld [vmem:[#allocation4 + $0x108] sm:$0xff]  ;;  %v2544_v42 = vld [vmem:[#allocation4 + $0x118] sm:$0xff] }
 0x541   : > { %2620 = vmax.xlane.f32.xlu1 %v6277_v10  ;;  %2636 = vmax.xlane.f32.xlu0 %v6280_v4  ;;  %7517 = vst [vmem:[#allocation158_spill] sm:$0xff] %v6320_v30  ;;  %7518 = vst [vmem:[#allocation159_spill] sm:$0xff] %v6325_v39  ;;  %v6352_v41 = vmul.f32 %v6266_v36, %v2537_v23  ;;  %v6357_v11 = vmul.f32 %v6266_v36, %v2524_v14  ;;  %v2546_v23 = vld [vmem:[#allocation4 + $0x128] sm:$0xff] }
 0x542   : > { %7519 = vst [vmem:[#allocation160_spill] sm:$0xff] %v6328_v5  ;;  %7520 = vst [vmem:[#allocation161_spill] sm:$0xff] %v6336_v43  ;;  %v6360_v8 = vmul.f32 %v6266_v36, %v2539_v25  ;;  %v6365_v59 = vmul.f32 %v6266_v36, %v2526_v31  ;;  %v6368_v20 = vmul.f32 %v6266_v36, %v2541_v34  ;;  %v2548_v25 = vld [vmem:[#allocation4 + $0x138] sm:$0xff]  ;;  %v2550_v34 = vld [vmem:[#allocation4 + $0x148] sm:$0xff] }
 0x543   : > { %7521 = vst [vmem:[#allocation162_spill] sm:$0xff] %v6341_v13  ;;  %7522 = vst [vmem:[#allocation163_spill] sm:$0xff] %v6344_v21  ;;  %v6373_v52 = vmul.f32 %v6266_v36, %v2528_v58  ;;  %v6376_v51 = vmul.f32 %v6266_v36, %v2543_v12  ;;  %v6381_v7 = vmul.f32 %v6266_v36, %v2530_v45  ;;  %v2552_v12 = vld [vmem:[#allocation4 + $0x158] sm:$0xff] }
 0x544   : > { %7523 = vst [vmem:[#allocation164_spill] sm:$0xff] %v6349_v61  ;;  %7524 = vst [vmem:[#allocation165_spill] sm:$0xff] %v6352_v41  ;;  %v6384_v26 = vmul.f32 %v6266_v36, %v2545_v48  ;;  %v6389_v16 = vmul.f32 %v6266_v36, %v2532_v15  ;;  %v6392_v29 = vmul.f32 %v6266_v36, %v2547_v28  ;;  %v2554_v48 = vld [vmem:[#allocation4 + $0x168] sm:$0xff]  ;;  %v2556_v28 = vld [vmem:[#allocation4 + $0x178] sm:$0xff] }
 0x545   : > { %2622 = vmax.xlane.f32.xlu1 %v6285_v2  ;;  %2640 = vmax.xlane.f32.xlu0 %v6288_v6  ;;  %7525 = vst [vmem:[#allocation166_spill] sm:$0xff] %v6357_v11  ;;  %7526 = vst [vmem:[#allocation167_spill] sm:$0xff] %v6360_v8  ;;  %v6397_v24 = vmul.f32 %v6266_v36, %v2534_v44  ;;  %v6400_v35 = vmul.f32 %v6266_v36, %v2549_v56 }
 0x546   : > { %7527 = vst [vmem:[#allocation168_spill] sm:$0xff] %v6365_v59  ;;  %7528 = vst [vmem:[#allocation169_spill] sm:$0xff] %v6368_v20  ;;  %v6405_v40 = vmul.f32 %v6266_v36, %v2536_v1  ;;  %v6408_v55 = vmul.f32 %v6266_v36, %v2551_v9  ;;  %v6413_v22 = vmul.f32 %v6266_v36, %v2538_v62 }
 0x547   : > { %7529 = vst [vmem:[#allocation170_spill] sm:$0xff] %v6373_v52  ;;  %7530 = vst [vmem:[#allocation171_spill] sm:$0xff] %v6376_v51  ;;  %v6416_v19 = vmul.f32 %v6266_v36, %v2553_v3  ;;  %v6421_v46 = vmul.f32 %v6266_v36, %v2540_v49  ;;  %v6424_v60 = vmul.f32 %v6266_v36, %v2555_v53 }
 0x548   : > { %7531 = vst [vmem:[#allocation172_spill] sm:$0xff] %v6381_v7  ;;  %7532 = vst [vmem:[#allocation173_spill] sm:$0xff] %v6384_v26  ;;  %v6429_v17 = vmul.f32 %v6266_v36, %v2542_v57  ;;  %v6433_v38 = vmul.f32 %v6266_v36, %v2544_v42  ;;  %v6437_v14 = vmul.f32 %v6266_v36, %v2546_v23 }
 0x549   : > { %2624 = vmax.xlane.f32.xlu1 %v6293_v33  ;;  %2644 = vmax.xlane.f32.xlu0 %v6296_v47  ;;  %7533 = vst [vmem:[#allocation174_spill] sm:$0xff] %v6389_v16  ;;  %7534 = vst [vmem:[#allocation175_spill] sm:$0xff] %v6392_v29  ;;  %v6441_v31 = vmul.f32 %v6266_v36, %v2548_v25  ;;  %v6445_v58 = vmul.f32 %v6266_v36, %v2550_v34 }
 0x54a   : > { %7535 = vst [vmem:[#allocation176_spill] sm:$0xff] %v6397_v24  ;;  %7536 = vst [vmem:[#allocation177_spill] sm:$0xff] %v6400_v35  ;;  %v6449_v45 = vmul.f32 %v6266_v36, %v2552_v12  ;;  %v6453_v15 = vmul.f32 %v6266_v36, %v2554_v48  ;;  %v6457_v44 = vmul.f32 %v6266_v36, %v2556_v28 }
 0x54b   : > { %7537 = vst [vmem:[#allocation178_spill] sm:$0xff] %v6405_v40  ;;  %7538 = vst [vmem:[#allocation179_spill] sm:$0xff] %v6408_v55 }
 0x54c   : > { %7539 = vst [vmem:[#allocation180_spill] sm:$0xff] %v6413_v22  ;;  %7540 = vst [vmem:[#allocation181_spill] sm:$0xff] %v6416_v19 }
 0x54d   : > { %2626 = vmax.xlane.f32.xlu1 %v6301_v54  ;;  %2648 = vmax.xlane.f32.xlu0 %v6304_v50  ;;  %7541 = vst [vmem:[#allocation182_spill] sm:$0xff] %v6421_v46  ;;  %7542 = vst [vmem:[#allocation183_spill] sm:$0xff] %v6424_v60 }
 0x54e   : > { %7543 = vst [vmem:[#allocation184_spill] sm:$0xff] %v6429_v17  ;;  %7544 = vst [vmem:[#allocation185_spill] sm:$0xff] %v6433_v38 }
 0x54f   : > { %7545 = vst [vmem:[#allocation186_spill] sm:$0xff] %v6437_v14  ;;  %7546 = vst [vmem:[#allocation187_spill] sm:$0xff] %v6441_v31 }
 0x550   : > { %7547 = vst [vmem:[#allocation188_spill] sm:$0xff] %v6445_v58  ;;  %7548 = vst [vmem:[#allocation189_spill] sm:$0xff] %v6449_v45 }
 0x551   : > { %2628 = vmax.xlane.f32.xlu1 %v6309_v37  ;;  %2652 = vmax.xlane.f32.xlu0 %v6312_v27  ;;  %7549 = vst [vmem:[#allocation190_spill] sm:$0xff] %v6453_v15  ;;  %7550 = vst [vmem:[#allocation191_spill] sm:$0xff] %v6457_v44 }
 0x555   : > { %2630 = vmax.xlane.f32.xlu1 %v6317_v32  ;;  %2656 = vmax.xlane.f32.xlu0 %v6320_v30 }
 0x559   : > { %2632 = vmax.xlane.f32.xlu1 %v6325_v39  ;;  %2660 = vmax.xlane.f32.xlu0 %v6328_v5 }
 0x55d   : > { %2634 = vmax.xlane.f32.xlu1 %v6333_v63  ;;  %2664 = vmax.xlane.f32.xlu0 %v6336_v43 }
 0x561   : > { %2638 = vmax.xlane.f32.xlu1 %v6341_v13  ;;  %2668 = vmax.xlane.f32.xlu0 %v6344_v21 }
 0x565   : > { %2642 = vmax.xlane.f32.xlu1 %v6349_v61  ;;  %2672 = vmax.xlane.f32.xlu0 %v6352_v41 }
 0x569   : > { %2646 = vmax.xlane.f32.xlu1 %v6357_v11  ;;  %2676 = vmax.xlane.f32.xlu0 %v6360_v8 }
 0x56d   : > { %2650 = vmax.xlane.f32.xlu1 %v6365_v59  ;;  %2680 = vmax.xlane.f32.xlu0 %v6368_v20 }
 0x571   : > { %2654 = vmax.xlane.f32.xlu1 %v6373_v52  ;;  %2684 = vmax.xlane.f32.xlu0 %v6376_v51 }
 0x575   : > { %2658 = vmax.xlane.f32.xlu1 %v6381_v7  ;;  %2688 = vmax.xlane.f32.xlu0 %v6384_v26 }
 0x579   : > { %2662 = vmax.xlane.f32.xlu1 %v6389_v16  ;;  %2692 = vmax.xlane.f32.xlu0 %v6392_v29 }
 0x57d   : > { %2666 = vmax.xlane.f32.xlu1 %v6397_v24  ;;  %2696 = vmax.xlane.f32.xlu0 %v6400_v35 }
 0x581   : > { %2670 = vmax.xlane.f32.xlu1 %v6405_v40  ;;  %2700 = vmax.xlane.f32.xlu0 %v6408_v55 }
 0x585   : > { %2674 = vmax.xlane.f32.xlu1 %v6413_v22  ;;  %2704 = vmax.xlane.f32.xlu0 %v6416_v19 }
 0x589   : > { %2678 = vmax.xlane.f32.xlu1 %v6421_v46  ;;  %2708 = vmax.xlane.f32.xlu0 %v6424_v60 }
 0x58d   : > { %2682 = vmax.xlane.f32.xlu1 %v6429_v17 }
 0x591   : > { %2686 = vmax.xlane.f32.xlu1 %v6433_v38 }
 0x595   : > { %2690 = vmax.xlane.f32.xlu1 %v6437_v14 }
 0x599   : > { %2694 = vmax.xlane.f32.xlu1 %v6441_v31 }
 0x59d   : > { %2698 = vmax.xlane.f32.xlu1 %v6445_v58 }
 0x5a1   : > { %2702 = vmax.xlane.f32.xlu1 %v6449_v45 }
 0x5a5   : > { %2706 = vmax.xlane.f32.xlu1 %v6453_v15 }
 0x5a9   : > { %2710 = vmax.xlane.f32.xlu1 %v6457_v44 }
 0x5ca   : > { %v2619_v56 = vpop.xlane.xlu1 %2618  ;;  %v2617_v1 = vpop.xlane.xlu0 %2616 }
 0x5ce   : > { %v2621_v9 = vpop.xlane.xlu1 %2620  ;;  %v2637_v62 = vpop.xlane.xlu0 %2636 }
 0x5d2   : > { %v2623_v3 = vpop.xlane.xlu1 %2622  ;;  %v2641_v49 = vpop.xlane.xlu0 %2640 }
 0x5d6   : > { %v2625_v53 = vpop.xlane.xlu1 %2624  ;;  %v2645_v57 = vpop.xlane.xlu0 %2644 }
 0x5d7   : > { %v2712_v22 = vmax.f32 %v2617_v1, %v2625_v53 }
 0x5da   : > { %v2627_v42 = vpop.xlane.xlu1 %2626  ;;  %v2649_v23 = vpop.xlane.xlu0 %2648 }
 0x5db   : > { %v2713_v30 = vmax.f32 %v2619_v56, %v2627_v42 }
 0x5de   : > { %v2629_v25 = vpop.xlane.xlu1 %2628  ;;  %v2653_v34 = vpop.xlane.xlu0 %2652 }
 0x5df   : > { %v2714_v43 = vmax.f32 %v2621_v9, %v2629_v25 }
 0x5e1   : > { %v2718_v7 = vmax.f32 %v2714_v43, %v2637_v62 }
 0x5e2   : > { %v2631_v12 = vpop.xlane.xlu1 %2630  ;;  %v2657_v48 = vpop.xlane.xlu0 %2656 }
 0x5e3   : > { %v2722_v47 = vmax.f32 %v2718_v7, %v2645_v57  ;;  %v2715_v11 = vmax.f32 %v2623_v3, %v2631_v12 }
 0x5e5   : > { %v2726_v1 = vmax.f32 %v2722_v47, %v2653_v34 }
 0x5e6   : > { %v2633_v60 = vpop.xlane.xlu1 %2632  ;;  %v2661_v36 = vpop.xlane.xlu0 %2660 }
 0x5e7   : > { %v2716_v21 = vmax.f32 %v2712_v22, %v2633_v60  ;;  %v2730_v43 = vmax.f32 %v2726_v1, %v2661_v36 }
 0x5e9   : > { %v2720_v5 = vmax.f32 %v2716_v21, %v2641_v49 }
 0x5ea   : > { %v2635_v19 = vpop.xlane.xlu1 %2634  ;;  %v2665_v15 = vpop.xlane.xlu0 %2664 }
 0x5eb   : > { %v2717_v27 = vmax.f32 %v2713_v30, %v2635_v19  ;;  %v2724_v52 = vmax.f32 %v2720_v5, %v2649_v23 }
 0x5ed   : > { %v2728_v61 = vmax.f32 %v2724_v52, %v2657_v48 }
 0x5ee   : > { %v2639_v28 = vpop.xlane.xlu1 %2638  ;;  %v2669_v45 = vpop.xlane.xlu0 %2668 }
 0x5ef   : > { %v2719_v4 = vmax.f32 %v2715_v11, %v2639_v28  ;;  %v2732_v53 = vmax.f32 %v2728_v61, %v2665_v15  ;;  %v2734_v62 = vmax.f32 %v2730_v43, %v2669_v45 }
 0x5f2   : > { %v2643_v44 = vpop.xlane.xlu1 %2642  ;;  %v2673_v58 = vpop.xlane.xlu0 %2672 }
 0x5f3   : > { %v2721_v6 = vmax.f32 %v2717_v27, %v2643_v44  ;;  %v2736_v30 = vmax.f32 %v2732_v53, %v2673_v58 }
 0x5f6   : > { %v2647_v55 = vpop.xlane.xlu1 %2646  ;;  %v2677_v26 = vpop.xlane.xlu0 %2676 }
 0x5f7   : > { %v2723_v22 = vmax.f32 %v2719_v4, %v2647_v55 }
 0x5fa   : > { %v2651_v35 = vpop.xlane.xlu1 %2650  ;;  %v2681_v51 = vpop.xlane.xlu0 %2680 }
 0x5fb   : > { %v2725_v13 = vmax.f32 %v2721_v6, %v2651_v35  ;;  %v2740_v7 = vmax.f32 %v2736_v30, %v2681_v51  ;;  %v2738_v6 = vmax.f32 %v2734_v62, %v2677_v26 }
 0x5fe   : > { %v2655_v29 = vpop.xlane.xlu1 %2654  ;;  %v2685_v17 = vpop.xlane.xlu0 %2684 }
 0x5ff   : > { %v2727_v21 = vmax.f32 %v2723_v22, %v2655_v29 }
 0x602   : > { %v2659_v31 = vpop.xlane.xlu1 %2658  ;;  %v2689_v46 = vpop.xlane.xlu0 %2688 }
 0x603   : > { %v2729_v60 = vmax.f32 %v2725_v13, %v2659_v31  ;;  %v2744_v35 = vmax.f32 %v2740_v7, %v2689_v46  ;;  %v2742_v13 = vmax.f32 %v2738_v6, %v2685_v17 }
 0x606   : > { %v2663_v14 = vpop.xlane.xlu1 %2662  ;;  %v2693_v24 = vpop.xlane.xlu0 %2692 }
 0x607   : > { %v2731_v5 = vmax.f32 %v2727_v21, %v2663_v14  ;;  %v2746_v31 = vmax.f32 %v2742_v13, %v2693_v24  ;;  %v7557_v13 = vld [vmem:[#allocation155_spill] sm:$0xff] }
 0x60a   : > { %v2667_v38 = vpop.xlane.xlu1 %2666  ;;  %v2697_v50 = vpop.xlane.xlu0 %2696 }
 0x60b   : > { %v2733_v49 = vmax.f32 %v2729_v60, %v2667_v38  ;;  %v2748_v55 = vmax.f32 %v2744_v35, %v2697_v50  ;;  %v7551_v60 = vld [vmem:[#allocation159_spill] sm:$0xff]  ;;  %v7556_v35 = vld [vmem:[#allocation166_spill] sm:$0xff] }
 0x60e   : > { %v2671_v20 = vpop.xlane.xlu1 %2670  ;;  %v2701_v9 = vpop.xlane.xlu0 %2700 }
 0x60f   : > { %v2735_v3 = vmax.f32 %v2731_v5, %v2671_v20  ;;  %v2750_v45 = vmax.f32 %v2746_v31, %v2701_v9  ;;  %v7558_v31 = vld [vmem:[#allocation168_spill] sm:$0xff] }
 0x612   : > { %v2675_v8 = vpop.xlane.xlu1 %2674  ;;  %v2705_v52 = vpop.xlane.xlu0 %2704 }
 0x613   : > { %v2737_v19 = vmax.f32 %v2733_v49, %v2675_v8  ;;  %v2752_v15 = vmax.f32 %v2748_v55, %v2705_v52 }
 0x616   : > { %v2679_v41 = vpop.xlane.xlu1 %2678  ;;  %v2709_v8 = vpop.xlane.xlu0 %2708 }
 0x617   : > { %v2739_v47 = vmax.f32 %v2735_v3, %v2679_v41  ;;  %v2754_v44 = vmax.f32 %v2750_v45, %v2709_v8  ;;  %v7555_v3 = vld [vmem:[#allocation154_spill] sm:$0xff] }
 0x61a   : > { %v2683_v40 = vpop.xlane.xlu1 %2682 }
 0x61b   : > { %v2741_v27 = vmax.f32 %v2737_v19, %v2683_v40  ;;  %v7554_v19 = vld [vmem:[#allocation164_spill] sm:$0xff] }
 0x61e   : > { %v2687_v16 = vpop.xlane.xlu1 %2686 }
 0x61f   : > { %v2743_v61 = vmax.f32 %v2739_v47, %v2687_v16 }
 0x622   : > { %v2691_v59 = vpop.xlane.xlu1 %2690 }
 0x623   : > { %v2745_v4 = vmax.f32 %v2741_v27, %v2691_v59 }
 0x626   : > { %v2695_v39 = vpop.xlane.xlu1 %2694 }
 0x627   : > { %v2747_v58 = vmax.f32 %v2743_v61, %v2695_v39 }
 0x62a   : > { %v2699_v56 = vpop.xlane.xlu1 %2698 }
 0x62b   : > { %v2749_v29 = vmax.f32 %v2745_v4, %v2699_v56 }
 0x62e   : > { %v2703_v11 = vpop.xlane.xlu1 %2702 }
 0x62f   : > { %v2751_v51 = vmax.f32 %v2747_v58, %v2703_v11 }
 0x632   : > { %v2707_v38 = vpop.xlane.xlu1 %2706 }
 0x633   : > { %v2753_v14 = vmax.f32 %v2749_v29, %v2707_v38 }
 0x635   : > { %v2756_v20 = vmax.f32 %v2752_v15, %v2753_v14  ;;  %v7559_v14 = vld [vmem:[#allocation156_spill] sm:$0xff] }
 0x636   : > { %v2711_v40 = vpop.xlane.xlu1 %2710 }
 0x637   : > { %v2755_v57 = vmax.f32 %v2751_v51, %v2711_v40  ;;  %v7560_v40 = vld [vmem:[#allocation170_spill] sm:$0xff] }
 0x639   : > { %v2757_v26 = vmax.f32 %v2754_v44, %v2755_v57 }
 0x63b   : > { %v2758_v46 = vmax.f32 %v2756_v20, %v2757_v26  ;;  %v7561_v26 = vld [vmem:[#allocation157_spill] sm:$0xff] }
 0x63d   : > { %v2759_v41 = vrot.slane %v2758_v46, 4 }
 0x63f   : > { %v2760_v59 = vmax.f32 %v2758_v46, %v2759_v41 }
 0x641   : > { %v2761_v17 = vrot.slane %v2760_v59, 2 }
 0x643   : > { %v2762_v50 = vmax.f32 %v2760_v59, %v2761_v17 }
 0x645   : > { %v2763_v16 = vrot.slane %v2762_v50, 1 }
 0x647   : > { %v6460_v42 = vmax.f32 %v2762_v50, %v2763_v16  ;;  %v7562_v50 = vld [vmem:[#allocation172_spill] sm:$0xff] }
 0x649   : > { %v2765_v39 = vsub.f32 %v6272_v18, %v6460_v42  ;;  %v2766_v24 = vsub.f32 %v6269_v0, %v6460_v42  ;;  %v2768_v23 = vsub.f32 %v6285_v2, %v6460_v42  ;;  %v2767_v25 = vsub.f32 %v6277_v10, %v6460_v42 }
 0x64a   : > { %v2770_v48 = vsub.f32 %v6301_v54, %v6460_v42  ;;  %v2769_v28 = vsub.f32 %v6293_v33, %v6460_v42  ;;  %v2772_v0 = vsub.f32 %v6317_v32, %v6460_v42  ;;  %v2771_v10 = vsub.f32 %v6309_v37, %v6460_v42  ;;  %v7552_v37 = vld [vmem:[#allocation162_spill] sm:$0xff] }
 0x64b   : > { %v2815_v34 = vmul.f32 1.442695, %v2766_v24  ;;  %v2813_v12 = vmul.f32 1.442695, %v2765_v39  ;;  %v2819_v36 = vmul.f32 1.442695, %v2768_v23  ;;  %v2774_v54 = vsub.f32 %v6333_v63, %v6460_v42 }
 0x64c   : > { %v2817_v18 = vmul.f32 1.442695, %v2767_v25  ;;  %v2823_v1 = vmul.f32 1.442695, %v2770_v48  ;;  %v2821_v2 = vmul.f32 1.442695, %v2769_v28  ;;  %v2773_v33 = vsub.f32 %v7551_v60, %v6460_v42 }
 0x64d   : > { %3733 = vpow2.f32 %v2815_v34  ;;  %v2827_v22 = vmul.f32 1.442695, %v2772_v0  ;;  %v2825_v9 = vmul.f32 1.442695, %v2771_v10  ;;  %v2776_v21 = vsub.f32 %v7552_v37, %v6460_v42  ;;  %v7553_v63 = vld [vmem:[#allocation153_spill] sm:$0xff]  ;;  %v7563_v24 = vld [vmem:[#allocation158_spill] sm:$0xff] }
 0x64e   : > { %3735 = vpow2.f32 %v2813_v12  ;;  %v2831_v49 = vmul.f32 1.442695, %v2774_v54  ;;  %v2775_v56 = vsub.f32 %v7553_v63, %v6460_v42  ;;  %v2829_v43 = vmul.f32 1.442695, %v2773_v33  ;;  %v7564_v48 = vld [vmem:[#allocation174_spill] sm:$0xff]  ;;  %v7566_v54 = vld [vmem:[#allocation176_spill] sm:$0xff] }
 0x64f   : > { %3737 = vpow2.f32 %v2819_v36  ;;  %v2778_v62 = vsub.f32 %v7554_v19, %v6460_v42  ;;  %v2835_v7 = vmul.f32 1.442695, %v2776_v21  ;;  %v2777_v27 = vsub.f32 %v7555_v3, %v6460_v42  ;;  %v7567_v33 = vld [vmem:[#allocation161_spill] sm:$0xff]  ;;  %v7568_v63 = vld [vmem:[#allocation178_spill] sm:$0xff]  ;;  %v7569_v19 = vld [vmem:[#allocation163_spill] sm:$0xff] }
 0x650   : > { %3739 = vpow2.f32 %v2817_v18  ;;  %v2833_v52 = vmul.f32 1.442695, %v2775_v56  ;;  %v2780_v47 = vsub.f32 %v7556_v35, %v6460_v42  ;;  %v2779_v55 = vsub.f32 %v7557_v13, %v6460_v42  ;;  %v7565_v18 = vld [vmem:[#allocation160_spill] sm:$0xff] }
 0x651   : > { %3741 = vpow2.f32 %v2823_v1  ;;  %v2839_v4 = vmul.f32 1.442695, %v2778_v62  ;;  %v2837_v61 = vmul.f32 1.442695, %v2777_v27  ;;  %v2782_v15 = vsub.f32 %v7558_v31, %v6460_v42 }
 0x652   : > { %3743 = vpow2.f32 %v2821_v2  ;;  %v2843_v58 = vmul.f32 1.442695, %v2780_v47  ;;  %v2781_v8 = vsub.f32 %v7559_v14, %v6460_v42  ;;  %v2841_v45 = vmul.f32 1.442695, %v2779_v55 }
 0x653   : > { %3745 = vpow2.f32 %v2827_v22  ;;  %v2784_v44 = vsub.f32 %v7560_v40, %v6460_v42  ;;  %v2847_v57 = vmul.f32 1.442695, %v2782_v15  ;;  %v2783_v46 = vsub.f32 %v7561_v26, %v6460_v42  ;;  %v7572_v15 = vld [vmem:[#allocation182_spill] sm:$0xff]  ;;  %v7574_v26 = vld [vmem:[#allocation184_spill] sm:$0xff] }
 0x654   : > { %3747 = vpow2.f32 %v2825_v9  ;;  %v2845_v41 = vmul.f32 1.442695, %v2781_v8  ;;  %v2786_v16 = vsub.f32 %v7562_v50, %v6460_v42  ;;  %v2785_v23 = vsub.f32 %v7563_v24, %v6460_v42  ;;  %v7573_v8 = vld [vmem:[#allocation167_spill] sm:$0xff]  ;;  %v7575_v50 = vld [vmem:[#allocation169_spill] sm:$0xff] }
 0x655   : > { %3749 = vpow2.f32 %v2831_v49  ;;  %v2851_v39 = vmul.f32 1.442695, %v2784_v44  ;;  %v2849_v25 = vmul.f32 1.442695, %v2783_v46  ;;  %v2788_v36 = vsub.f32 %v7564_v48, %v6460_v42 }
 0x656   : > { %3751 = vpow2.f32 %v2829_v43  ;;  %v2855_v28 = vmul.f32 1.442695, %v2786_v16  ;;  %v2787_v0 = vsub.f32 %v7565_v18, %v6460_v42  ;;  %v2853_v1 = vmul.f32 1.442695, %v2785_v23 }
 0x657   : > { %v6482_v53 = vpop.eup %3733  ;;  %3753 = vpow2.f32 %v2835_v7  ;;  %v2790_v22 = vsub.f32 %v7566_v54, %v6460_v42  ;;  %v2859_v60 = vmul.f32 1.442695, %v2788_v36  ;;  %v2789_v9 = vsub.f32 %v7567_v33, %v6460_v42 }
 0x658   : > { %v6484_v32 = vpop.eup %3735  ;;  %2911 = vadd.xlane.f32.xlu1 %v6482_v53  ;;  %3755 = vpow2.f32 %v2833_v52  ;;  %v2857_v37 = vmul.f32 1.442695, %v2787_v0  ;;  %v2792_v56 = vsub.f32 %v7568_v63, %v6460_v42  ;;  %v2791_v62 = vsub.f32 %v7569_v19, %v6460_v42  ;;  %v7570_v52 = vld [vmem:[#allocation180_spill] sm:$0xff]  ;;  %v7580_v19 = vld [vmem:[#allocation187_spill] sm:$0xff] }
 0x659   : > { %2909 = vadd.xlane.f32.xlu0 %v6484_v32  ;;  %v6492_v30 = vpop.eup %3737  ;;  %3757 = vpow2.f32 %v2839_v4  ;;  %v2863_v43 = vmul.f32 1.442695, %v2790_v22  ;;  %v2861_v7 = vmul.f32 1.442695, %v2789_v9  ;;  %v2794_v35 = vsub.f32 %v7570_v52, %v6460_v42  ;;  %v7571_v4 = vld [vmem:[#allocation165_spill] sm:$0xff]  ;;  %v7578_v22 = vld [vmem:[#allocation186_spill] sm:$0xff] }
 0x65a   : > { %v6494_v5 = vpop.eup %3739  ;;  %3759 = vpow2.f32 %v2837_v61  ;;  %v2867_v47 = vmul.f32 1.442695, %v2792_v56  ;;  %v2793_v13 = vsub.f32 %v7571_v4, %v6460_v42  ;;  %v2865_v55 = vmul.f32 1.442695, %v2791_v62  ;;  %v7579_v9 = vld [vmem:[#allocation173_spill] sm:$0xff]  ;;  %v7581_v52 = vld [vmem:[#allocation175_spill] sm:$0xff] }
 0x65b   : > { %v6502_v11 = vpop.eup %3741  ;;  %3761 = vpow2.f32 %v2843_v58  ;;  %v2796_v58 = vsub.f32 %v7572_v15, %v6460_v42  ;;  %v2871_v14 = vmul.f32 1.442695, %v2794_v35  ;;  %v2798_v46 = vsub.f32 %v7574_v26, %v6460_v42 }
 0x65c   : > { %2915 = vadd.xlane.f32.xlu1 %v6492_v30  ;;  %v6504_v6 = vpop.eup %3743  ;;  %3763 = vpow2.f32 %v2841_v45  ;;  %v2795_v45 = vsub.f32 %v7573_v8, %v6460_v42  ;;  %v2869_v40 = vmul.f32 1.442695, %v2793_v13  ;;  %v2797_v16 = vsub.f32 %v7575_v50, %v6460_v42 }
 0x65d   : > { %2913 = vadd.xlane.f32.xlu0 %v6494_v5  ;;  %v6512_v29 = vpop.eup %3745  ;;  %3765 = vpow2.f32 %v2847_v57  ;;  %v2879_v36 = vmul.f32 1.442695, %v2798_v46  ;;  %v2804_v62 = vsub.f32 %v7580_v19, %v6460_v42  ;;  %v2803_v35 = vsub.f32 %v7581_v52, %v6460_v42  ;;  %v7584_v46 = vld [vmem:[#allocation189_spill] sm:$0xff] }
 0x65e   : > { %v6514_v38 = vpop.eup %3747  ;;  %3767 = vpow2.f32 %v2845_v41  ;;  %v2875_v41 = vmul.f32 1.442695, %v2796_v58  ;;  %v2877_v0 = vmul.f32 1.442695, %v2797_v16  ;;  %v7585_v16 = vld [vmem:[#allocation179_spill] sm:$0xff] }
 0x65f   : > { %v6522_v51 = vpop.eup %3749  ;;  %3769 = vpow2.f32 %v2851_v39  ;;  %v2873_v39 = vmul.f32 1.442695, %v2795_v45  ;;  %v2891_v58 = vmul.f32 1.442695, %v2804_v62  ;;  %v2889_v45 = vmul.f32 1.442695, %v2803_v35 }
 0x660   : > { %2919 = vadd.xlane.f32.xlu1 %v6502_v11  ;;  %v6524_v20 = vpop.eup %3751  ;;  %3771 = vpow2.f32 %v2849_v25  ;;  %v7576_v25 = vld [vmem:[#allocation185_spill] sm:$0xff] }
 0x661   : > { %2917 = vadd.xlane.f32.xlu0 %v6504_v6  ;;  %v6532_v59 = vpop.eup %3753  ;;  %3773 = vpow2.f32 %v2855_v28  ;;  %v2800_v48 = vsub.f32 %v7576_v25, %v6460_v42  ;;  %v7577_v28 = vld [vmem:[#allocation171_spill] sm:$0xff] }
 0x662   : > { %v6534_v17 = vpop.eup %3755  ;;  %3775 = vpow2.f32 %v2853_v1  ;;  %v2799_v18 = vsub.f32 %v7577_v28, %v6460_v42  ;;  %v7586_v28 = vld [vmem:[#allocation190_spill] sm:$0xff] }
 0x663   : > { %v6542_v34 = vpop.eup %3757  ;;  %3777 = vpow2.f32 %v2859_v60  ;;  %v2802_v60 = vsub.f32 %v7578_v22, %v6460_v42  ;;  %v2883_v33 = vmul.f32 1.442695, %v2800_v48  ;;  %v7587_v22 = vld [vmem:[#allocation181_spill] sm:$0xff] }
 0x664   : > { %2923 = vadd.xlane.f32.xlu1 %v6512_v29  ;;  %v6544_v12 = vpop.eup %3759  ;;  %3779 = vpow2.f32 %v2857_v37  ;;  %v2801_v37 = vsub.f32 %v7579_v9, %v6460_v42  ;;  %v2881_v63 = vmul.f32 1.442695, %v2799_v18  ;;  %v2810_v18 = vsub.f32 %v7586_v28, %v6460_v42 }
 0x665   : > { %2921 = vadd.xlane.f32.xlu0 %v6514_v38  ;;  %v6552_v10 = vpop.eup %3761  ;;  %3781 = vpow2.f32 %v2863_v43 }
 0x666   : > { %v6554_v2 = vpop.eup %3763  ;;  %3783 = vpow2.f32 %v2861_v7  ;;  %v2887_v7 = vmul.f32 1.442695, %v2802_v60  ;;  %v2809_v60 = vsub.f32 %v7587_v22, %v6460_v42  ;;  %v2903_v62 = vmul.f32 1.442695, %v2810_v18 }
 0x667   : > { %v6562_v21 = vpop.eup %3765  ;;  %3785 = vpow2.f32 %v2867_v47  ;;  %v2885_v47 = vmul.f32 1.442695, %v2801_v37 }
 0x668   : > { %2927 = vadd.xlane.f32.xlu1 %v6522_v51  ;;  %v6564_v49 = vpop.eup %3767  ;;  %3787 = vpow2.f32 %v2865_v55  ;;  %v7582_v55 = vld [vmem:[#allocation188_spill] sm:$0xff]  ;;  %v2901_v35 = vmul.f32 1.442695, %v2809_v60 }
 0x669   : > { %2925 = vadd.xlane.f32.xlu0 %v6524_v20  ;;  %v6572_v3 = vpop.eup %3769  ;;  %3789 = vpow2.f32 %v2871_v14  ;;  %v2806_v15 = vsub.f32 %v7582_v55, %v6460_v42  ;;  %v7583_v14 = vld [vmem:[#allocation177_spill] sm:$0xff] }
 0x66a   : > { %v6574_v27 = vpop.eup %3771  ;;  %3791 = vpow2.f32 %v2869_v40  ;;  %v2805_v8 = vsub.f32 %v7583_v14, %v6460_v42 }
 0x66b   : > { %v6582_v61 = vpop.eup %3773  ;;  %3793 = vpow2.f32 %v2875_v41  ;;  %v2808_v41 = vsub.f32 %v7584_v46, %v6460_v42  ;;  %v2895_v50 = vmul.f32 1.442695, %v2806_v15 }
 0x66c   : > { %2931 = vadd.xlane.f32.xlu1 %v6532_v59  ;;  %v6584_v31 = vpop.eup %3775  ;;  %3795 = vpow2.f32 %v2873_v39  ;;  %v2807_v39 = vsub.f32 %v7585_v16, %v6460_v42  ;;  %v2893_v25 = vmul.f32 1.442695, %v2805_v8 }
 0x66d   : > { %2929 = vadd.xlane.f32.xlu0 %v6534_v17  ;;  %v6592_v44 = vpop.eup %3777  ;;  %3797 = vpow2.f32 %v2879_v36 }
 0x66e   : > { %v6594_v57 = vpop.eup %3779  ;;  %3799 = vpow2.f32 %v2877_v0  ;;  %v2899_v0 = vmul.f32 1.442695, %v2808_v41 }
 0x66f   : > { %v6602_v24 = vpop.eup %3781  ;;  %3801 = vpow2.f32 %v2883_v33  ;;  %v2897_v33 = vmul.f32 1.442695, %v2807_v39 }
 0x670   : > { %2935 = vadd.xlane.f32.xlu1 %v6542_v34  ;;  %v6604_v23 = vpop.eup %3783  ;;  %3803 = vpow2.f32 %v2881_v63  ;;  %v7588_v63 = vld [vmem:[#allocation191_spill] sm:$0xff] }
 0x671   : > { %2933 = vadd.xlane.f32.xlu0 %v6544_v12  ;;  %v6612_v1 = vpop.eup %3785  ;;  %3805 = vpow2.f32 %v2887_v7  ;;  %v2812_v19 = vsub.f32 %v7588_v63, %v6460_v42  ;;  %v7589_v7 = vld [vmem:[#allocation183_spill] sm:$0xff] }
 0x672   : > { %v6614_v54 = vpop.eup %3787  ;;  %3807 = vpow2.f32 %v2885_v47  ;;  %v2811_v52 = vsub.f32 %v7589_v7, %v6460_v42 }
 0x673   : > { %v6622_v56 = vpop.eup %3789  ;;  %3809 = vpow2.f32 %v2891_v58  ;;  %v2907_v15 = vmul.f32 1.442695, %v2812_v19 }
 0x674   : > { %2939 = vadd.xlane.f32.xlu1 %v6552_v10  ;;  %v6624_v43 = vpop.eup %3791  ;;  %3811 = vpow2.f32 %v2889_v45  ;;  %v2905_v58 = vmul.f32 1.442695, %v2811_v52 }
 0x675   : > { %2937 = vadd.xlane.f32.xlu0 %v6554_v2  ;;  %v6632_v4 = vpop.eup %3793  ;;  %3813 = vpow2.f32 %v2895_v50 }
 0x676   : > { %v6634_v13 = vpop.eup %3795  ;;  %3815 = vpow2.f32 %v2893_v25 }
 0x677   : > { %v6642_v40 = vpop.eup %3797  ;;  %3817 = vpow2.f32 %v2899_v0 }
 0x678   : > { %2943 = vadd.xlane.f32.xlu1 %v6562_v21  ;;  %v6644_v26 = vpop.eup %3799  ;;  %3819 = vpow2.f32 %v2897_v33 }
 0x679   : > { %2941 = vadd.xlane.f32.xlu0 %v6564_v49  ;;  %v6652_v48 = vpop.eup %3801  ;;  %3821 = vpow2.f32 %v2903_v62 }
 0x67a   : > { %v6654_v36 = vpop.eup %3803  ;;  %3823 = vpow2.f32 %v2901_v35 }
 0x67b   : > { %v6662_v9 = vpop.eup %3805  ;;  %3825 = vpow2.f32 %v2907_v15 }
 0x67c   : > { %2947 = vadd.xlane.f32.xlu1 %v6572_v3  ;;  %v6664_v37 = vpop.eup %3807  ;;  %3827 = vpow2.f32 %v2905_v58 }
 0x67d   : > { %2945 = vadd.xlane.f32.xlu0 %v6574_v27  ;;  %v6672_v47 = vpop.eup %3809 }
 0x67e   : > { %v6674_v55 = vpop.eup %3811 }
 0x67f   : > { %v6678_v14 = vpop.eup %3813 }
 0x680   : > { %2951 = vadd.xlane.f32.xlu1 %v6582_v61  ;;  %7590 = vst [vmem:[#allocation159_spill] sm:$0xff] %v6678_v14  ;;  %v6680_v8 = vpop.eup %3815 }
 0x681   : > { %2949 = vadd.xlane.f32.xlu0 %v6584_v31  ;;  %v6684_v42 = vpop.eup %3817 }
 0x682   : > { %7591 = vst [vmem:[#allocation162_spill] sm:$0xff] %v6684_v42  ;;  %v6686_v45 = vpop.eup %3819 }
 0x683   : > { %7592 = vst [vmem:[#allocation153_spill] sm:$0xff] %v6686_v45  ;;  %v6690_v46 = vpop.eup %3821 }
 0x684   : > { %2955 = vadd.xlane.f32.xlu1 %v6592_v44  ;;  %7593 = vst [vmem:[#allocation164_spill] sm:$0xff] %v6690_v46  ;;  %v6692_v41 = vpop.eup %3823 }
 0x685   : > { %2953 = vadd.xlane.f32.xlu0 %v6594_v57  ;;  %7594 = vst [vmem:[#allocation154_spill] sm:$0xff] %v6692_v41  ;;  %v6696_v50 = vpop.eup %3825 }
 0x686   : > { %7595 = vst [vmem:[#allocation166_spill] sm:$0xff] %v6696_v50  ;;  %v6698_v16 = vpop.eup %3827 }
 0x687   : > { %7596 = vst [vmem:[#allocation155_spill] sm:$0xff] %v6698_v16 }
 0x688   : > { %2959 = vadd.xlane.f32.xlu1 %v6602_v24 }
 0x689   : > { %2957 = vadd.xlane.f32.xlu0 %v6604_v23 }
 0x68c   : > { %2963 = vadd.xlane.f32.xlu1 %v6612_v1 }
 0x68d   : > { %2961 = vadd.xlane.f32.xlu0 %v6614_v54 }
 0x690   : > { %2967 = vadd.xlane.f32.xlu1 %v6622_v56 }
 0x691   : > { %2965 = vadd.xlane.f32.xlu0 %v6624_v43 }
 0x694   : > { %2971 = vadd.xlane.f32.xlu1 %v6632_v4 }
 0x695   : > { %2969 = vadd.xlane.f32.xlu0 %v6634_v13 }
 0x698   : > { %2975 = vadd.xlane.f32.xlu1 %v6642_v40 }
 0x699   : > { %2973 = vadd.xlane.f32.xlu0 %v6644_v26 }
 0x69c   : > { %2979 = vadd.xlane.f32.xlu1 %v6652_v48 }
 0x69d   : > { %2977 = vadd.xlane.f32.xlu0 %v6654_v36 }
 0x6a0   : > { %2983 = vadd.xlane.f32.xlu1 %v6662_v9 }
 0x6a1   : > { %2981 = vadd.xlane.f32.xlu0 %v6664_v37 }
 0x6a4   : > { %2987 = vadd.xlane.f32.xlu1 %v6672_v47 }
 0x6a5   : > { %2985 = vadd.xlane.f32.xlu0 %v6674_v55 }
 0x6a8   : > { %2991 = vadd.xlane.f32.xlu1 %v6678_v14 }
 0x6a9   : > { %2989 = vadd.xlane.f32.xlu0 %v6680_v8 }
 0x6ac   : > { %2995 = vadd.xlane.f32.xlu1 %v6684_v42 }
 0x6ad   : > { %2993 = vadd.xlane.f32.xlu0 %v6686_v45 }
 0x6b0   : > { %2999 = vadd.xlane.f32.xlu1 %v6690_v46 }
 0x6b1   : > { %2997 = vadd.xlane.f32.xlu0 %v6692_v41 }
 0x6b4   : > { %3003 = vadd.xlane.f32.xlu1 %v6696_v50 }
 0x6b5   : > { %3001 = vadd.xlane.f32.xlu0 %v6698_v16 }
 0x6e5   : > { %v2912_v39 = vpop.xlane.xlu1 %2911 }
 0x6e6   : > { %v2910_v25 = vpop.xlane.xlu0 %2909 }
 0x6e7   : > { %v3005_v28 = vadd.f32 %v2912_v39, %v2910_v25 }
 0x6e9   : > { %v2916_v18 = vpop.xlane.xlu1 %2915 }
 0x6ea   : > { %v2914_v0 = vpop.xlane.xlu0 %2913 }
 0x6eb   : > { %v3006_v22 = vadd.f32 %v3005_v28, %v2914_v0 }
 0x6ed   : > { %v2920_v60 = vpop.xlane.xlu1 %2919  ;;  %v3007_v33 = vadd.f32 %v3006_v22, %v2916_v18 }
 0x6ee   : > { %v2918_v63 = vpop.xlane.xlu0 %2917 }
 0x6ef   : > { %v3008_v19 = vadd.f32 %v3007_v33, %v2918_v63 }
 0x6f1   : > { %v2924_v62 = vpop.xlane.xlu1 %2923  ;;  %v3009_v7 = vadd.f32 %v3008_v19, %v2920_v60 }
 0x6f2   : > { %v2922_v52 = vpop.xlane.xlu0 %2921 }
 0x6f3   : > { %v3010_v35 = vadd.f32 %v3009_v7, %v2922_v52 }
 0x6f5   : > { %v2928_v15 = vpop.xlane.xlu1 %2927  ;;  %v3011_v58 = vadd.f32 %v3010_v35, %v2924_v62 }
 0x6f6   : > { %v2926_v46 = vpop.xlane.xlu0 %2925 }
 0x6f7   : > { %v3012_v50 = vadd.f32 %v3011_v58, %v2926_v46 }
 0x6f9   : > { %v2932_v41 = vpop.xlane.xlu1 %2931  ;;  %v3013_v16 = vadd.f32 %v3012_v50, %v2928_v15 }
 0x6fa   : > { %v2930_v42 = vpop.xlane.xlu0 %2929 }
 0x6fb   : > { %v3014_v45 = vadd.f32 %v3013_v16, %v2930_v42 }
 0x6fd   : > { %v2936_v39 = vpop.xlane.xlu1 %2935  ;;  %v3015_v25 = vadd.f32 %v3014_v45, %v2932_v41 }
 0x6fe   : > { %v2934_v14 = vpop.xlane.xlu0 %2933 }
 0x6ff   : > { %v3016_v28 = vadd.f32 %v3015_v25, %v2934_v14 }
 0x701   : > { %v2940_v0 = vpop.xlane.xlu1 %2939  ;;  %v3017_v18 = vadd.f32 %v3016_v28, %v2936_v39 }
 0x702   : > { %v2938_v22 = vpop.xlane.xlu0 %2937 }
 0x703   : > { %v3018_v33 = vadd.f32 %v3017_v18, %v2938_v22 }
 0x705   : > { %v2944_v63 = vpop.xlane.xlu1 %2943  ;;  %v3019_v60 = vadd.f32 %v3018_v33, %v2940_v0 }
 0x706   : > { %v2942_v19 = vpop.xlane.xlu0 %2941 }
 0x707   : > { %v3020_v7 = vadd.f32 %v3019_v60, %v2942_v19 }
 0x709   : > { %v2948_v52 = vpop.xlane.xlu1 %2947  ;;  %v3021_v62 = vadd.f32 %v3020_v7, %v2944_v63 }
 0x70a   : > { %v2946_v35 = vpop.xlane.xlu0 %2945 }
 0x70b   : > { %v3022_v46 = vadd.f32 %v3021_v62, %v2946_v35 }
 0x70d   : > { %v2952_v58 = vpop.xlane.xlu1 %2951  ;;  %v3023_v50 = vadd.f32 %v3022_v46, %v2948_v52 }
 0x70e   : > { %v2950_v15 = vpop.xlane.xlu0 %2949 }
 0x70f   : > { %v3024_v42 = vadd.f32 %v3023_v50, %v2950_v15 }
 0x711   : > { %v2956_v16 = vpop.xlane.xlu1 %2955  ;;  %v3025_v45 = vadd.f32 %v3024_v42, %v2952_v58 }
 0x712   : > { %v2954_v41 = vpop.xlane.xlu0 %2953 }
 0x713   : > { %v3026_v14 = vadd.f32 %v3025_v45, %v2954_v41 }
 0x715   : > { %v2960_v25 = vpop.xlane.xlu1 %2959  ;;  %v3027_v39 = vadd.f32 %v3026_v14, %v2956_v16 }
 0x716   : > { %v2958_v28 = vpop.xlane.xlu0 %2957 }
 0x717   : > { %v3028_v18 = vadd.f32 %v3027_v39, %v2958_v28 }
 0x719   : > { %v2964_v22 = vpop.xlane.xlu1 %2963  ;;  %v3029_v0 = vadd.f32 %v3028_v18, %v2960_v25 }
 0x71a   : > { %v2962_v33 = vpop.xlane.xlu0 %2961 }
 0x71b   : > { %v3030_v60 = vadd.f32 %v3029_v0, %v2962_v33 }
 0x71d   : > { %v2968_v19 = vpop.xlane.xlu1 %2967  ;;  %v3031_v63 = vadd.f32 %v3030_v60, %v2964_v22 }
 0x71e   : > { %v2966_v7 = vpop.xlane.xlu0 %2965 }
 0x71f   : > { %v3032_v62 = vadd.f32 %v3031_v63, %v2966_v7 }
 0x721   : > { %v2972_v35 = vpop.xlane.xlu1 %2971  ;;  %v3033_v52 = vadd.f32 %v3032_v62, %v2968_v19 }
 0x722   : > { %v2970_v46 = vpop.xlane.xlu0 %2969 }
 0x723   : > { %v3034_v50 = vadd.f32 %v3033_v52, %v2970_v46 }
 0x725   : > { %v2976_v15 = vpop.xlane.xlu1 %2975  ;;  %v3035_v58 = vadd.f32 %v3034_v50, %v2972_v35 }
 0x726   : > { %v2974_v42 = vpop.xlane.xlu0 %2973 }
 0x727   : > { %v3036_v45 = vadd.f32 %v3035_v58, %v2974_v42 }
 0x729   : > { %v2980_v41 = vpop.xlane.xlu1 %2979  ;;  %v3037_v16 = vadd.f32 %v3036_v45, %v2976_v15 }
 0x72a   : > { %v2978_v14 = vpop.xlane.xlu0 %2977 }
 0x72b   : > { %v3038_v39 = vadd.f32 %v3037_v16, %v2978_v14 }
 0x72d   : > { %v2984_v28 = vpop.xlane.xlu1 %2983  ;;  %v3039_v25 = vadd.f32 %v3038_v39, %v2980_v41 }
 0x72e   : > { %v2982_v18 = vpop.xlane.xlu0 %2981 }
 0x72f   : > { %v3040_v0 = vadd.f32 %v3039_v25, %v2982_v18 }
 0x731   : > { %v2988_v33 = vpop.xlane.xlu1 %2987  ;;  %v3041_v22 = vadd.f32 %v3040_v0, %v2984_v28 }
 0x732   : > { %v2986_v60 = vpop.xlane.xlu0 %2985 }
 0x733   : > { %v3042_v63 = vadd.f32 %v3041_v22, %v2986_v60 }
 0x735   : > { %v2992_v7 = vpop.xlane.xlu1 %2991  ;;  %v3043_v19 = vadd.f32 %v3042_v63, %v2988_v33 }
 0x736   : > { %v2990_v62 = vpop.xlane.xlu0 %2989 }
 0x737   : > { %v3044_v52 = vadd.f32 %v3043_v19, %v2990_v62 }
 0x739   : > { %v2996_v46 = vpop.xlane.xlu1 %2995  ;;  %v3045_v35 = vadd.f32 %v3044_v52, %v2992_v7 }
 0x73a   : > { %v2994_v50 = vpop.xlane.xlu0 %2993 }
 0x73b   : > { %v3046_v58 = vadd.f32 %v3045_v35, %v2994_v50 }
 0x73d   : > { %v3047_v42 = vadd.f32 %v3046_v58, %v2996_v46  ;;  %v3000_v15 = vpop.xlane.xlu1 %2999 }
 0x73e   : > { %v2998_v45 = vpop.xlane.xlu0 %2997 }
 0x73f   : > { %v3048_v16 = vadd.f32 %v3047_v42, %v2998_v45 }
 0x741   : > { %v3049_v14 = vadd.f32 %v3048_v16, %v3000_v15  ;;  %v3004_v25 = vpop.xlane.xlu1 %3003 }
 0x742   : > { %v3002_v41 = vpop.xlane.xlu0 %3001 }
 0x743   : > { %v3050_v39 = vadd.f32 %v3049_v14, %v3002_v41 }
 0x745   : > { %v3051_v18 = vadd.f32 %v3050_v39, %v3004_v25  ;;  %v7609_v25 = vld [vmem:[#allocation9_spill] sm:$0xff] }
 0x747   : > { %v3052_v28 = vrot.slane %v3051_v18, 4 }
 0x749   : > { %v3053_v0 = vadd.f32 %v3052_v28, %v3051_v18  ;;  %v7610_v28 = vld [vmem:[#allocation11_spill] sm:$0xff] }
 0x74b   : > { %v3054_v22 = vrot.slane %v3053_v0, 2 }
 0x74d   : > { %v3055_v60 = vadd.f32 %v3054_v22, %v3053_v0  ;;  %v7611_v22 = vld [vmem:[#allocation8_spill] sm:$0xff] }
 0x74f   : > { %v3056_v33 = vrot.slane %v3055_v60, 1 }
 0x751   : > { %v3057_v63 = vadd.f32 %v3056_v33, %v3055_v60  ;;  %v7612_v33 = vld [vmem:[#allocation10_spill] sm:$0xff] }
 0x753   : > { %3829 = vrcp.f32 %v3057_v63 }
 0x75d   : > { %v3830_v19 = vpop.eup %3829 }
 0x75e   : > { %v3059_v7 = vmul.f32 %v3830_v19, %v6484_v32  ;;  %v3060_v62 = vmul.f32 %v3830_v19, %v6482_v53  ;;  %v3061_v52 = vmul.f32 %v3830_v19, %v6494_v5  ;;  %v3062_v46 = vmul.f32 %v3830_v19, %v6492_v30 }
 0x75f   : > { %v3063_v35 = vmul.f32 %v3830_v19, %v6504_v6  ;;  %v3064_v50 = vmul.f32 %v3830_v19, %v6502_v11  ;;  %v3065_v58 = vmul.f32 %v3830_v19, %v6514_v38  ;;  %v3066_v42 = vmul.f32 %v3830_v19, %v6512_v29 }
 0x760   : > { %v3067_v15 = vmul.f32 %v3830_v19, %v6524_v20  ;;  %v3068_v45 = vmul.f32 %v3830_v19, %v6522_v51  ;;  %v3069_v32 = vmul.f32 %v3830_v19, %v6534_v17  ;;  %v3070_v53 = vmul.f32 %v3830_v19, %v6532_v59 }
 0x761   : > { %v3071_v5 = vmul.f32 %v3830_v19, %v6544_v12  ;;  %v3072_v30 = vmul.f32 %v3830_v19, %v6542_v34  ;;  %v3073_v6 = vmul.f32 %v3830_v19, %v6554_v2  ;;  %v3074_v11 = vmul.f32 %v3830_v19, %v6552_v10 }
 0x762   : > { %v3075_v38 = vmul.f32 %v3830_v19, %v6564_v49  ;;  %v3076_v29 = vmul.f32 %v3830_v19, %v6562_v21  ;;  %v3077_v20 = vmul.f32 %v3830_v19, %v6574_v27  ;;  %v3078_v51 = vmul.f32 %v3830_v19, %v6572_v3 }
 0x763   : > { %v3079_v17 = vmul.f32 %v3830_v19, %v6584_v31  ;;  %v3080_v59 = vmul.f32 %v3830_v19, %v6582_v61  ;;  %v3081_v12 = vmul.f32 %v3830_v19, %v6594_v57  ;;  %v3082_v34 = vmul.f32 %v3830_v19, %v6592_v44 }
 0x764   : > { %v6727_v2 = vmul.f32 %v3830_v19, %v6604_v23  ;;  %v6730_v10 = vmul.f32 %v3830_v19, %v6602_v24  ;;  %v6733_v21 = vmul.f32 %v3830_v19, %v6614_v54  ;;  %v6736_v49 = vmul.f32 %v3830_v19, %v6612_v1 }
 0x765   : > { %v6739_v3 = vmul.f32 %v3830_v19, %v6624_v43  ;;  %v6742_v27 = vmul.f32 %v3830_v19, %v6622_v56  ;;  %v6745_v61 = vmul.f32 %v3830_v19, %v6634_v13  ;;  %v6748_v31 = vmul.f32 %v3830_v19, %v6632_v4  ;;  %v7597_v13 = vld [vmem:[#allocation159_spill] sm:$0xff] }
 0x766   : > { %v6751_v44 = vmul.f32 %v3830_v19, %v6644_v26  ;;  %v6754_v57 = vmul.f32 %v3830_v19, %v6642_v40  ;;  %v6757_v24 = vmul.f32 %v3830_v19, %v6654_v36  ;;  %v6760_v23 = vmul.f32 %v3830_v19, %v6652_v48  ;;  %v7598_v26 = vld [vmem:[#allocation153_spill] sm:$0xff]  ;;  %v7599_v36 = vld [vmem:[#allocation162_spill] sm:$0xff] }
 0x767   : > { %v6763_v1 = vmul.f32 %v3830_v19, %v6664_v37  ;;  %v6766_v54 = vmul.f32 %v3830_v19, %v6662_v9  ;;  %v6769_v56 = vmul.f32 %v3830_v19, %v6674_v55  ;;  %v6772_v43 = vmul.f32 %v3830_v19, %v6672_v47  ;;  %v7601_v9 = vld [vmem:[#allocation154_spill] sm:$0xff]  ;;  %v7603_v55 = vld [vmem:[#allocation164_spill] sm:$0xff]  ;;  %v7605_v47 = vld [vmem:[#allocation155_spill] sm:$0xff] }
 0x768   : > { %v6775_v4 = vmul.f32 %v3830_v19, %v6680_v8  ;;  %v6778_v40 = vmul.f32 %v3830_v19, %v7597_v13  ;;  %v6781_v48 = vmul.f32 %v3830_v19, %v7598_v26  ;;  %v6784_v37 = vmul.f32 %v3830_v19, %v7599_v36  ;;  %v7607_v8 = vld [vmem:[#allocation166_spill] sm:$0xff]  ;;  %v7613_v13 = vld [vmem:[#allocation13_spill] sm:$0xff]  ;;  %v7614_v36 = vld [vmem:[#allocation12_spill] sm:$0xff] }
 0x769   : > { %v6787_v16 = vmul.f32 %v3830_v19, %v7601_v9  ;;  %v6790_v14 = vmul.f32 %v3830_v19, %v7603_v55  ;;  %v6793_v41 = vmul.f32 %v3830_v19, %v7605_v47  ;;  %v6796_v39 = vmul.f32 %v3830_v19, %v7607_v8  ;;  %v7615_v55 = vld [vmem:[#allocation15_spill] sm:$0xff]  ;;  %v7618_v19 = vld [vmem:[#allocation16_spill] sm:$0xff] }
 0x76a   : > { %7600 = vst [vmem:[#allocation168_spill] sm:$0xff] %v6784_v37  ;;  %v3107_v18 = vmul.f32 %v3059_v7, %v7609_v25  ;;  %v3108_v0 = vmul.f32 %v3060_v62, %v7610_v28  ;;  %v3109_v60 = vmul.f32 %v3061_v52, %v7611_v22  ;;  %v3110_v63 = vmul.f32 %v3062_v46, %v7612_v33  ;;  %v7620_v25 = vld [vmem:[#allocation18_spill] sm:$0xff]  ;;  %v7621_v52 = vld [vmem:[#allocation21_spill] sm:$0xff]  ;;  %v7623_v28 = vld [vmem:[#allocation23_spill] sm:$0xff] }
 0x76b   : > { %7602 = vst [vmem:[#allocation156_spill] sm:$0xff] %v6787_v16  ;;  %7604 = vst [vmem:[#allocation170_spill] sm:$0xff] %v6790_v14  ;;  %v3111_v26 = vmul.f32 %v3063_v35, %v7613_v13  ;;  %v3112_v9 = vmul.f32 %v3064_v50, %v7614_v36  ;;  %v3113_v14 = vmul.f32 %v3065_v58, %v7615_v55  ;;  %v7616_v16 = vld [vmem:[#allocation14_spill] sm:$0xff]  ;;  %v7622_v35 = vld [vmem:[#allocation20_spill] sm:$0xff] }
 0x76c   : > { %7606 = vst [vmem:[#allocation157_spill] sm:$0xff] %v6793_v41  ;;  %7608 = vst [vmem:[#allocation172_spill] sm:$0xff] %v6796_v39  ;;  %v3114_v47 = vmul.f32 %v3066_v42, %v7616_v16  ;;  %v7617_v41 = vld [vmem:[#allocation17_spill] sm:$0xff]  ;;  %v3116_v8 = vmul.f32 %v3068_v45, %v7618_v19  ;;  %v7619_v39 = vld [vmem:[#allocation19_spill] sm:$0xff]  ;;  %v3118_v62 = vmul.f32 %v3070_v53, %v7620_v25 }
 0x76d   : > { %v3115_v37 = vmul.f32 %v3067_v15, %v7617_v41  ;;  %v3117_v7 = vmul.f32 %v3069_v32, %v7619_v39  ;;  %3155 = vst [vmem:[#allocation5] sm:$0xff] %v3107_v18  ;;  %3156 = vst [vmem:[#allocation5 + $0x8] sm:$0xff] %v3108_v0  ;;  %v3119_v46 = vmul.f32 %v3071_v5, %v7621_v52  ;;  %v7624_v22 = vld [vmem:[#allocation22_spill] sm:$0xff]  ;;  %v7625_v15 = vld [vmem:[#allocation25_spill] sm:$0xff] }
 0x76e   : > { %3157 = vst [vmem:[#allocation5 + $0x10] sm:$0xff] %v3109_v60  ;;  %3158 = vst [vmem:[#allocation5 + $0x18] sm:$0xff] %v3110_v63  ;;  %v3120_v50 = vmul.f32 %v3072_v30, %v7622_v35  ;;  %v3121_v58 = vmul.f32 %v3073_v6, %v7623_v28  ;;  %v3122_v42 = vmul.f32 %v3074_v11, %v7624_v22  ;;  %v7626_v32 = vld [vmem:[#allocation24_spill] sm:$0xff]  ;;  %v7627_v16 = vld [vmem:[#allocation27_spill] sm:$0xff] }
 0x76f   : > { %3159 = vst [vmem:[#allocation5 + $0x20] sm:$0xff] %v3111_v26  ;;  %3160 = vst [vmem:[#allocation5 + $0x28] sm:$0xff] %v3112_v9  ;;  %v3123_v45 = vmul.f32 %v3075_v38, %v7625_v15  ;;  %v3124_v53 = vmul.f32 %v3076_v29, %v7626_v32  ;;  %v3125_v41 = vmul.f32 %v3077_v20, %v7627_v16  ;;  %v7628_v39 = vld [vmem:[#allocation26_spill] sm:$0xff]  ;;  %v7629_v5 = vld [vmem:[#allocation29_spill] sm:$0xff] }
 0x770   : > { %3161 = vst [vmem:[#allocation5 + $0x30] sm:$0xff] %v3113_v14  ;;  %3162 = vst [vmem:[#allocation5 + $0x38] sm:$0xff] %v3114_v47  ;;  %v3126_v18 = vmul.f32 %v3078_v51, %v7628_v39  ;;  %v3127_v30 = vmul.f32 %v3079_v17, %v7629_v5  ;;  %v7630_v6 = vld [vmem:[#allocation28_spill] sm:$0xff]  ;;  %v7631_v0 = vld [vmem:[#allocation31_spill] sm:$0xff] }
 0x771   : > { %3163 = vst [vmem:[#allocation5 + $0x40] sm:$0xff] %v3115_v37  ;;  %3164 = vst [vmem:[#allocation5 + $0x48] sm:$0xff] %v3116_v8  ;;  %v3128_v11 = vmul.f32 %v3080_v59, %v7630_v6  ;;  %v3129_v60 = vmul.f32 %v3081_v12, %v7631_v0  ;;  %v7632_v14 = vld [vmem:[#allocation30_spill] sm:$0xff]  ;;  %v7633_v38 = vld [vmem:[#allocation33_spill] sm:$0xff] }
 0x772   : > { %3165 = vst [vmem:[#allocation5 + $0x50] sm:$0xff] %v3117_v7  ;;  %3166 = vst [vmem:[#allocation5 + $0x58] sm:$0xff] %v3118_v62  ;;  %v3130_v33 = vmul.f32 %v3082_v34, %v7632_v14  ;;  %v3131_v29 = vmul.f32 %v6727_v2, %v7633_v38  ;;  %v7634_v20 = vld [vmem:[#allocation32_spill] sm:$0xff]  ;;  %v7635_v37 = vld [vmem:[#allocation35_spill] sm:$0xff] }
 0x773   : > { %3167 = vst [vmem:[#allocation5 + $0x60] sm:$0xff] %v3119_v46  ;;  %3168 = vst [vmem:[#allocation5 + $0x68] sm:$0xff] %v3120_v50  ;;  %v3132_v51 = vmul.f32 %v6730_v10, %v7634_v20  ;;  %v3133_v63 = vmul.f32 %v6733_v21, %v7635_v37  ;;  %v7636_v17 = vld [vmem:[#allocation34_spill] sm:$0xff]  ;;  %v7637_v12 = vld [vmem:[#allocation37_spill] sm:$0xff] }
 0x774   : > { %3169 = vst [vmem:[#allocation5 + $0x70] sm:$0xff] %v3121_v58  ;;  %3170 = vst [vmem:[#allocation5 + $0x78] sm:$0xff] %v3122_v42  ;;  %v3134_v59 = vmul.f32 %v6736_v49, %v7636_v17  ;;  %v3135_v34 = vmul.f32 %v6739_v3, %v7637_v12  ;;  %v7638_v13 = vld [vmem:[#allocation36_spill] sm:$0xff]  ;;  %v7639_v2 = vld [vmem:[#allocation39_spill] sm:$0xff] }
 0x775   : > { %3171 = vst [vmem:[#allocation5 + $0x80] sm:$0xff] %v3123_v45  ;;  %3172 = vst [vmem:[#allocation5 + $0x88] sm:$0xff] %v3124_v53  ;;  %v3136_v26 = vmul.f32 %v6742_v27, %v7638_v13  ;;  %v3137_v36 = vmul.f32 %v6745_v61, %v7639_v2  ;;  %v7640_v10 = vld [vmem:[#allocation38_spill] sm:$0xff]  ;;  %v7641_v21 = vld [vmem:[#allocation41_spill] sm:$0xff] }
 0x776   : > { %3173 = vst [vmem:[#allocation5 + $0x90] sm:$0xff] %v3125_v41  ;;  %3174 = vst [vmem:[#allocation5 + $0x98] sm:$0xff] %v3126_v18  ;;  %v3138_v9 = vmul.f32 %v6748_v31, %v7640_v10  ;;  %v3139_v49 = vmul.f32 %v6751_v44, %v7641_v21  ;;  %v7642_v55 = vld [vmem:[#allocation40_spill] sm:$0xff]  ;;  %v7643_v3 = vld [vmem:[#allocation43_spill] sm:$0xff] }
 0x777   : > { %3175 = vst [vmem:[#allocation5 + $0xa0] sm:$0xff] %v3127_v30  ;;  %3176 = vst [vmem:[#allocation5 + $0xa8] sm:$0xff] %v3128_v11  ;;  %v3140_v47 = vmul.f32 %v6754_v57, %v7642_v55  ;;  %v3141_v19 = vmul.f32 %v6757_v24, %v7643_v3  ;;  %v7644_v27 = vld [vmem:[#allocation42_spill] sm:$0xff]  ;;  %v7645_v61 = vld [vmem:[#allocation45_spill] sm:$0xff] }
 0x778   : > { %3177 = vst [vmem:[#allocation5 + $0xb0] sm:$0xff] %v3129_v60  ;;  %3178 = vst [vmem:[#allocation5 + $0xb8] sm:$0xff] %v3130_v33  ;;  %v3142_v8 = vmul.f32 %v6760_v23, %v7644_v27  ;;  %v3143_v31 = vmul.f32 %v6763_v1, %v7645_v61  ;;  %v7646_v7 = vld [vmem:[#allocation44_spill] sm:$0xff]  ;;  %v7647_v44 = vld [vmem:[#allocation47_spill] sm:$0xff] }
 0x779   : > { %3179 = vst [vmem:[#allocation5 + $0xc0] sm:$0xff] %v3131_v29  ;;  %3180 = vst [vmem:[#allocation5 + $0xc8] sm:$0xff] %v3132_v51  ;;  %v3144_v25 = vmul.f32 %v6766_v54, %v7646_v7  ;;  %v3145_v62 = vmul.f32 %v6769_v56, %v7647_v44  ;;  %v7648_v57 = vld [vmem:[#allocation46_spill] sm:$0xff]  ;;  %v7649_v24 = vld [vmem:[#allocation49_spill] sm:$0xff] }
 0x77a   : > { %3181 = vst [vmem:[#allocation5 + $0xd0] sm:$0xff] %v3133_v63  ;;  %3182 = vst [vmem:[#allocation5 + $0xd8] sm:$0xff] %v3134_v59  ;;  %v3146_v52 = vmul.f32 %v6772_v43, %v7648_v57  ;;  %v3147_v23 = vmul.f32 %v6775_v4, %v7649_v24  ;;  %v7650_v46 = vld [vmem:[#allocation48_spill] sm:$0xff]  ;;  %v7651_v1 = vld [vmem:[#allocation51_spill] sm:$0xff] }
 0x77b   : > { %3183 = vst [vmem:[#allocation5 + $0xe0] sm:$0xff] %v3135_v34  ;;  %3184 = vst [vmem:[#allocation5 + $0xe8] sm:$0xff] %v3136_v26  ;;  %v3148_v35 = vmul.f32 %v6778_v40, %v7650_v46  ;;  %v3149_v50 = vmul.f32 %v6781_v48, %v7651_v1  ;;  %v7652_v54 = vld [vmem:[#allocation50_spill] sm:$0xff]  ;;  %v7653_v28 = vld [vmem:[#allocation168_spill] sm:$0xff] }
 0x77c   : > { %3185 = vst [vmem:[#allocation5 + $0xf0] sm:$0xff] %v3137_v36  ;;  %3186 = vst [vmem:[#allocation5 + $0xf8] sm:$0xff] %v3138_v9  ;;  %v3150_v58 = vmul.f32 %v7653_v28, %v7652_v54  ;;  %v7654_v56 = vld [vmem:[#allocation53_spill] sm:$0xff]  ;;  %v7655_v43 = vld [vmem:[#allocation156_spill] sm:$0xff] }
 0x77d   : > { %3187 = vst [vmem:[#allocation5 + $0x100] sm:$0xff] %v3139_v49  ;;  %3188 = vst [vmem:[#allocation5 + $0x108] sm:$0xff] %v3140_v47  ;;  %v3151_v22 = vmul.f32 %v7655_v43, %v7654_v56  ;;  %v7656_v42 = vld [vmem:[#allocation52_spill] sm:$0xff]  ;;  %v7657_v15 = vld [vmem:[#allocation170_spill] sm:$0xff] }
 0x77e   : > { %3189 = vst [vmem:[#allocation5 + $0x110] sm:$0xff] %v3141_v19  ;;  %3190 = vst [vmem:[#allocation5 + $0x118] sm:$0xff] %v3142_v8  ;;  %v3152_v45 = vmul.f32 %v7657_v15, %v7656_v42  ;;  %v7658_v4 = vld [vmem:[#allocation55_spill] sm:$0xff]  ;;  %v7659_v32 = vld [vmem:[#allocation157_spill] sm:$0xff] }
 0x77f   : > { %v3153_v53 = vmul.f32 %v7659_v32, %v7658_v4  ;;  %v7660_v40 = vld [vmem:[#allocation54_spill] sm:$0xff]  ;;  %v7661_v16 = vld [vmem:[#allocation172_spill] sm:$0xff]  ;;  %3191 = vst [vmem:[#allocation5 + $0x120] sm:$0xff] %v3143_v31  ;;  %3192 = vst [vmem:[#allocation5 + $0x128] sm:$0xff] %v3144_v25 }
 0x780   : > { %v3154_v41 = vmul.f32 %v7661_v16, %v7660_v40  ;;  %3193 = vst [vmem:[#allocation5 + $0x130] sm:$0xff] %v3145_v62  ;;  %3194 = vst [vmem:[#allocation5 + $0x138] sm:$0xff] %v3146_v52 }
 0x781   : > { %3195 = vst [vmem:[#allocation5 + $0x140] sm:$0xff] %v3147_v23  ;;  %3196 = vst [vmem:[#allocation5 + $0x148] sm:$0xff] %v3148_v35 }
 0x782   : > { %3197 = vst [vmem:[#allocation5 + $0x150] sm:$0xff] %v3149_v50  ;;  %3198 = vst [vmem:[#allocation5 + $0x158] sm:$0xff] %v3150_v58 }
 0x783   : > { %3199 = vst [vmem:[#allocation5 + $0x160] sm:$0xff] %v3151_v22  ;;  %3200 = vst [vmem:[#allocation5 + $0x168] sm:$0xff] %v3152_v45 }
 0x784   : > { %3201 = vst [vmem:[#allocation5 + $0x170] sm:$0xff] %v3153_v53  ;;  %3202 = vst [vmem:[#allocation5 + $0x178] sm:$0xff] %v3154_v41 }
 0x785 PF: > { %p3676_p6 = scmp.eq.s32.totalorder %s3906_s13, 1  ;;  %s3877_s21 = smov [#allocation5]  }
 0x786   : > { %s3209_s16 = sshll.u32 %s3877_s21, 4  ;;  %s3210_s16 = int_to_ptr.vmem [resolvable:$true] %s3209_s16 }
 0x787   : > { %s3831_s17 = scalar_lea.vmem %s3210_s16, 6144  ;;  %p3838_p10 = scmp.lt.s32.totalorder %s3210_s16, %s3210_s16 }
 0x788   : > { %p3832_p7 = scmp.ne.s32.totalorder %s3210_s16, %s3831_s17  ;;  %p3839_p11 = scmp.lt.s32.totalorder %s3831_s17, %s3831_s17 }
 0x78a   : > { %p3833_p8 = pnand %p3832_p7, %p3676_p6  ;;  %p3840_p12 = por %p3839_p11, %p3838_p10 }
 0x78c   : > { %p3834_p9 = pneg %p3833_p8 }
 0x78e   : > { %p3841_p13 = pnand %p3840_p12, %p3834_p9 }
 0x790   : > { %3844 = shalt.err (!%p3841_p13)
}
 0x791   : > { %s3845_s22 = scalar_lea.hbm %s6899_s3, 6144 }
 0x792   : > { %p3846_p0 = scmp.ne.s32.totalorder %s6899_s3, %s3845_s22  ;;  %p3851_p3 = scmp.lt.u32.totalorder %s3845_s22, %s6899_s3 }
 0x794   : > { %p3847_p1 = pnand %p3846_p0, %p3676_p6 }
 0x796   : > { %p3848_p2 = pneg %p3847_p1 }
 0x798   : > { %p3853_p4 = pnand %p3851_p3, %p3848_p2 }
 0x79a   : > { %3856 = shalt.err (!%p3853_p4)
}
 0x79b   : > { %s3878_s27 = smov 128   ;;  %s3879_s28 = smov 8  }
 0x79c   : > { %3673 = dma.vmem_to_hbm [thread:$0]  (%p3676_p6), %s3210_s16, 6144, %s6899_s3, [#allocation6], %s3878_s27, %s3878_s27, %s3879_s28  }
 0x79d   : > { %3862 = dma.done.wait (%p3676_p6), [#allocation6], 6144  }
 0x79e   : > { %3864 = vsyncadd (%p3676_p6), [#allocation6], 4294961152 }
 0x79f PF: > { %s14_s12 = sadd.s32 1, %s3867_s12  }
 0x7a0   : > { %p11_p5 = scmp.ge.s32.totalorder %s14_s12, 4  }
 0x7a2   :  { %13 = sbr.rel (!%p11_p5) target bundleno = 1 (0x1), region = 78 }
 0x7a9   :  { %3225 = vsyncpa [#allocation6], 1 }
 0x7aa   :  { %3227 = vsyncpa [#allocation6 + $0x1], 1 }

</bundles_post_ra>
